<compile_context>
chip_gen: v6e
topology: v6e:2x2x1
jax: 0.10.0
libtpu: 0.0.40
codegen_flags: <defaults>
</compile_context>

<pallas_src>
import functools
import math

import numpy as np
import jax
import jax.numpy as jnp
from jax import lax
from jax.scipy.special import xlogy
from jax.experimental import pallas as pl
from jax.experimental.pallas import tpu as pltpu

# ------------------------- hyper-parameters (module __init__ defaults) ------
IGNORE_ID = -1
CTC_WEIGHT = 0.5
PREDICTOR_WEIGHT = 1.0
PREDICTOR_BIAS = 0           # default -> no sos/eos added to targets
LSM_WEIGHT = 0.0
N_HEADS = 4
SMOOTH_FACTOR = 1.0
NOISE_THRESHOLD = 0.0
CIF_THRESHOLD = 1.0

TM = 512                                  # row tile for M-tiled kernels
TQ = 256                                  # query tile for attention


def _default_vmem_limit():
    # ~75% of physical VMEM, capped: ~96 MiB on v5e/v6e (128 MiB), ~48 MiB on v7x (64 MiB).
    try:
        cap = pltpu.get_tpu_info().vmem_capacity_bytes
        return min(int(cap * 3 // 4), 112 * 1024 * 1024)
    except Exception:
        return 48 * 1024 * 1024


VMEM_LIMIT = _default_vmem_limit()


def _cp(dims):
    return pltpu.CompilerParams(dimension_semantics=dims,
                                vmem_limit_bytes=VMEM_LIMIT)


# ----------------------------- Pallas kernels -------------------------------
def _ln(x, g, b):
    mu = jnp.mean(x, axis=-1, keepdims=True)
    var = jnp.mean(jnp.square(x - mu), axis=-1, keepdims=True)
    return (x - mu) * lax.rsqrt(var + 1e-5) * g + b


def _linear_kernel(x_ref, w_ref, b_ref, o_ref):
    y = jnp.dot(x_ref[...].astype(jnp.bfloat16), w_ref[...],
                preferred_element_type=jnp.float32) + b_ref[...]
    o_ref[...] = y.astype(o_ref.dtype)


def _ln_linear_kernel(x_ref, g_ref, b_ref, w_ref, bias_ref, o_ref):
    xn = _ln(x_ref[...].astype(jnp.float32), g_ref[...], b_ref[...])
    y = jnp.dot(xn.astype(jnp.bfloat16), w_ref[...],
                preferred_element_type=jnp.float32) + bias_ref[...]
    o_ref[...] = y.astype(o_ref.dtype)


def _ffn_block_kernel(x_ref, g_ref, b_ref, w1_ref, b1_ref, w2_ref, b2_ref, *rest,
                      after_ln):
    # out = x + W2(relu(W1(LN(x))))  [+ optional after-norm epilogue]
    if after_ln:
        ag_ref, ab_ref, o_ref = rest
    else:
        (o_ref,) = rest
    x = x_ref[...].astype(jnp.float32)
    xn = _ln(x, g_ref[...], b_ref[...])
    h = jnp.dot(xn.astype(jnp.bfloat16), w1_ref[...],
                preferred_element_type=jnp.float32) + b1_ref[...]
    h = jnp.maximum(h, 0.0)
    y = jnp.dot(h.astype(jnp.bfloat16), w2_ref[...],
                preferred_element_type=jnp.float32) + b2_ref[...]
    out = x + y
    if after_ln:
        out = _ln(out, ag_ref[...], ab_ref[...])
    o_ref[...] = out.astype(o_ref.dtype)


def _embed_kernel(x_ref, w_ref, b_ref, g_ref, be_ref, pe_ref, o_ref, *, scale):
    # linear embed -> LayerNorm -> *sqrt(D) + positional encoding
    y = jnp.dot(x_ref[0].astype(jnp.bfloat16), w_ref[...],
                preferred_element_type=jnp.float32) + b_ref[...]
    yn = _ln(y, g_ref[...], be_ref[...])
    o_ref[0] = (yn * scale + pe_ref[...]).astype(o_ref.dtype)


def _mha_kernel(lens_ref, q_ref, k_ref, v_ref, wo_ref, bo_ref, res_ref, o_ref, *, scale):
    """Head-batched attention with key-length mask, output proj + residual folded in.

    q_ref: (1,H,tq,Dh)  k_ref/v_ref: (1,H,Tk,Dh)  wo_ref: (H,Dh,D)  res/o: (1,tq,D)
    """
    kv_len = lens_ref[pl.program_id(0)]
    q = q_ref[0]                                  # (H, tq, Dh) bf16
    k = k_ref[0]
    v = v_ref[0]
    s = lax.dot_general(q, k, (((2,), (2,)), ((0,), (0,))),
                        preferred_element_type=jnp.float32) * scale      # (H,tq,Tk)
    mask = lax.broadcasted_iota(jnp.int32, s.shape, 2) < kv_len
    s = jnp.where(mask, s, -1e30)
    s = s - jnp.max(s, axis=-1, keepdims=True)
    p = jnp.exp(s)
    denom = jnp.maximum(jnp.sum(p, axis=-1, keepdims=True), 1e-30)
    p = p * pl.reciprocal(denom, approx=True)
    ctx = lax.dot_general(p.astype(jnp.bfloat16), v, (((2,), (1,)), ((0,), (0,))),
                          preferred_element_type=jnp.float32)             # (H,tq,Dh)
    outh = lax.dot_general(ctx.astype(jnp.bfloat16), wo_ref[...],
                           (((2,), (1,)), ((0,), (0,))),
                           preferred_element_type=jnp.float32)            # (H,tq,D)
    out = jnp.sum(outh, axis=0) + bo_ref[...]                             # (tq,D)
    o_ref[0] = (res_ref[0].astype(jnp.float32) + out).astype(o_ref.dtype)


def _predictor_alpha_kernel(lens_ref, h_ref, cw_ref, cb_ref, ow_ref, ob_ref, o_ref,
                            *, smooth, noise):
    # depthwise conv1d(k=3) + residual + relu + 1-dim projection + sigmoid + mask;
    # projection done as a (1,D)x(T,D)^T matvec so the alpha output is lane-dense.
    b = pl.program_id(0)
    T = h_ref.shape[1]
    x = h_ref[0].astype(jnp.float32)              # (T, D)
    row = lax.broadcasted_iota(jnp.int32, x.shape, 0)
    x_prev = jnp.where(row == 0, 0.0, pltpu.roll(x, shift=1, axis=0))
    x_next = jnp.where(row == T - 1, 0.0, pltpu.roll(x, shift=T - 1, axis=0))
    conv = (cb_ref[...] + cw_ref[0:1, :] * x_prev + cw_ref[1:2, :] * x
            + cw_ref[2:3, :] * x_next)
    act = jnp.maximum(x + conv, 0.0)              # (T, D)
    a = lax.dot_general(ow_ref[...], act, (((1,), (1,)), ((), ())),
                        preferred_element_type=jnp.float32) + ob_ref[...]  # (1, T)
    alpha = jax.nn.sigmoid(a)
    alpha = jnp.maximum(alpha * smooth - noise, 0.0)
    tmask = lax.broadcasted_iota(jnp.int32, (1, T), 1) < lens_ref[b]
    o_ref[0] = jnp.where(tmask, alpha, 0.0)


def _cif_gather_kernel(pos_ref, fired_ref, fr_ref, o_ref):
    # compact fired frames: one-hot built already transposed (U,T) -> plain matmul.
    U = o_ref.shape[1]
    T = fr_ref.shape[1]
    p = pos_ref[0]                                # (1, T) int32
    f = fired_ref[0]                              # (1, T) f32
    iu = lax.broadcasted_iota(jnp.int32, (U, T), 0)
    oh = jnp.where((iu == p) & (f > 0.5), 1.0, 0.0)          # (U, T)
    o_ref[0] = jnp.dot(oh, fr_ref[0], preferred_element_type=jnp.float32)


def _ctc_emit_kernel(x_ref, w_ref, b_ref, ext_ref, emit_ref):
    # fused CTC head: logits -> logsumexp -> gather only blank/label log-probs.
    x = x_ref[0].astype(jnp.bfloat16)                                     # (tt, D)
    logits = jnp.dot(x, w_ref[...], preferred_element_type=jnp.float32) + b_ref[...]
    m = jnp.max(logits, axis=-1, keepdims=True)
    lse = m + jnp.log(jnp.sum(jnp.exp(logits - m), axis=-1, keepdims=True))
    V = logits.shape[-1]
    S = emit_ref.shape[-1]
    iv = lax.broadcasted_iota(jnp.int32, (V, S), 0)
    oh = (iv == ext_ref[0]).astype(jnp.float32)                           # (V, S)
    emit_ref[0] = jnp.dot(logits, oh, preferred_element_type=jnp.float32) - lse


def _head_nll_kernel(x_ref, g_ref, b_ref, w_ref, bias_ref, tgt_ref, lpt_ref, slp_ref):
    # fused decoder vocab head: after-norm -> logits -> target log-prob + sum(log-probs),
    # the only statistics LabelSmoothingLoss needs (no (B,U,V) in HBM).
    xn = _ln(x_ref[...].astype(jnp.float32), g_ref[...], b_ref[...])
    logits = jnp.dot(xn.astype(jnp.bfloat16), w_ref[...],
                     preferred_element_type=jnp.float32) + bias_ref[...]  # (tm, V)
    V = logits.shape[-1]
    m = jnp.max(logits, axis=-1, keepdims=True)
    lse = m + jnp.log(jnp.sum(jnp.exp(logits - m), axis=-1, keepdims=True))
    iv = lax.broadcasted_iota(jnp.int32, logits.shape, 1)
    oh = (iv == tgt_ref[...]).astype(jnp.float32)
    lpt_ref[...] = jnp.sum(logits * oh, axis=-1, keepdims=True) - lse
    slp_ref[...] = jnp.sum(logits, axis=-1, keepdims=True) - V * lse


# ----------------------------- Pallas wrappers -------------------------------
def fused_linear(x2d, w, b, *, ln=None, out_dtype=jnp.bfloat16, tm=TM):
    """(M,K)@(K,N)+b, optionally preceded by LayerNorm; bf16 output by default."""
    M, K = x2d.shape
    N = w.shape[1]
    tm = min(tm, M)
    grid = (pl.cdiv(M, tm),)
    out_shape = jax.ShapeDtypeStruct((M, N), out_dtype)
    out_spec = pl.BlockSpec((tm, N), lambda i: (i, 0))
    if ln is None:
        return pl.pallas_call(
            _linear_kernel,
            out_shape=out_shape, grid=grid,
            in_specs=[pl.BlockSpec((tm, K), lambda i: (i, 0)),
                      pl.BlockSpec((K, N), lambda i: (0, 0)),
                      pl.BlockSpec((1, N), lambda i: (0, 0))],
            out_specs=out_spec, compiler_params=_cp(("parallel",)),
        )(x2d, w, b.reshape(1, N))
    g, be = ln
    return pl.pallas_call(
        _ln_linear_kernel,
        out_shape=out_shape, grid=grid,
        in_specs=[pl.BlockSpec((tm, K), lambda i: (i, 0)),
                  pl.BlockSpec((1, K), lambda i: (0, 0)),
                  pl.BlockSpec((1, K), lambda i: (0, 0)),
                  pl.BlockSpec((K, N), lambda i: (0, 0)),
                  pl.BlockSpec((1, N), lambda i: (0, 0))],
        out_specs=out_spec, compiler_params=_cp(("parallel",)),
    )(x2d, g.reshape(1, K), be.reshape(1, K), w, b.reshape(1, N))


def ffn_block(x, g, b, fp, after_ln=None, tm=TM):
    """x + W2(relu(W1(LN(x)))) [+ optional fused after-norm], bf16 out."""
    B, T, D = x.shape
    M = B * T
    tm = min(tm, M)
    dff = fp['w1'].shape[1]
    in_specs = [pl.BlockSpec((tm, D), lambda i: (i, 0)),
                pl.BlockSpec((1, D), lambda i: (0, 0)),
                pl.BlockSpec((1, D), lambda i: (0, 0)),
                pl.BlockSpec((D, dff), lambda i: (0, 0)),
                pl.BlockSpec((1, dff), lambda i: (0, 0)),
                pl.BlockSpec((dff, D), lambda i: (0, 0)),
                pl.BlockSpec((1, D), lambda i: (0, 0))]
    args = [x.reshape(M, D), g.reshape(1, D), b.reshape(1, D),
            fp['w1'], fp['b1'].reshape(1, dff), fp['w2'], fp['b2'].reshape(1, D)]
    if after_ln is not None:
        ag, ab = after_ln
        in_specs += [pl.BlockSpec((1, D), lambda i: (0, 0)),
                     pl.BlockSpec((1, D), lambda i: (0, 0))]
        args += [ag.reshape(1, D), ab.reshape(1, D)]
    y = pl.pallas_call(
        functools.partial(_ffn_block_kernel, after_ln=after_ln is not None),
        out_shape=jax.ShapeDtypeStruct((M, D), jnp.bfloat16),
        grid=(pl.cdiv(M, tm),),
        in_specs=in_specs,
        out_specs=pl.BlockSpec((tm, D), lambda i: (i, 0)),
        compiler_params=_cp(("parallel",)),
    )(*args)
    return y.reshape(B, T, D)


def encoder_embed(p, speech, tt=512):
    B, T, F = speech.shape
    D = p['embed_w'].shape[1]
    tt = min(T, tt)
    return pl.pallas_call(
        functools.partial(_embed_kernel, scale=math.sqrt(D)),
        out_shape=jax.ShapeDtypeStruct((B, T, D), jnp.bfloat16),
        grid=(B, pl.cdiv(T, tt)),
        in_specs=[pl.BlockSpec((1, tt, F), lambda b, t: (b, t, 0)),
                  pl.BlockSpec((F, D), lambda b, t: (0, 0)),
                  pl.BlockSpec((1, D), lambda b, t: (0, 0)),
                  pl.BlockSpec((1, D), lambda b, t: (0, 0)),
                  pl.BlockSpec((1, D), lambda b, t: (0, 0)),
                  pl.BlockSpec((tt, D), lambda b, t: (t, 0))],
        out_specs=pl.BlockSpec((1, tt, D), lambda b, t: (b, t, 0)),
        compiler_params=_cp(("parallel", "parallel")),
    )(speech, p['embed_w'], p['embed_b'].reshape(1, D),
      p['embed_ln_g'].reshape(1, D), p['embed_ln_b'].reshape(1, D), p['pe'][:T])


def _split_heads(x2d, B, T, D, n_heads, n_mats):
    """(B*T, n_mats*D) -> n_mats tensors of head-major (B, H, T, Dh), bf16."""
    Dh = D // n_heads
    x = x2d.reshape(B, T, n_mats, n_heads, Dh)
    x = jnp.transpose(x, (2, 0, 3, 1, 4))         # (n_mats, B, H, T, Dh)
    return tuple(x[i] for i in range(n_mats))


def mha_block(kv_lens, q, k, v, wo3, bo, res, tq=TQ):
    """Multi-head attention (key-length masked) + output proj + residual; bf16 out."""
    B, H, Tq, Dh = q.shape
    Tk = k.shape[2]
    D = res.shape[-1]
    scale = 1.0 / math.sqrt(Dh)
    tq = min(tq, Tq)
    return pl.pallas_call(
        functools.partial(_mha_kernel, scale=scale),
        out_shape=jax.ShapeDtypeStruct((B, Tq, D), jnp.bfloat16),
        grid_spec=pltpu.PrefetchScalarGridSpec(
            num_scalar_prefetch=1, grid=(B, pl.cdiv(Tq, tq)),
            in_specs=[pl.BlockSpec((1, H, tq, Dh), lambda b, i, lens: (b, 0, i, 0)),
                      pl.BlockSpec((1, H, Tk, Dh), lambda b, i, lens: (b, 0, 0, 0)),
                      pl.BlockSpec((1, H, Tk, Dh), lambda b, i, lens: (b, 0, 0, 0)),
                      pl.BlockSpec((H, Dh, D), lambda b, i, lens: (0, 0, 0)),
                      pl.BlockSpec((1, D), lambda b, i, lens: (0, 0)),
                      pl.BlockSpec((1, tq, D), lambda b, i, lens: (b, i, 0))],
            out_specs=pl.BlockSpec((1, tq, D), lambda b, i, lens: (b, i, 0))),
        compiler_params=_cp(("parallel", "parallel")),
    )(kv_lens.astype(jnp.int32), q, k, v, wo3, bo.reshape(1, D), res)


# --------------------------------- encoder ----------------------------------
def encoder_forward(p, speech, speech_lengths):
    B, T, _ = speech.shape
    D = p['embed_w'].shape[1]
    x = encoder_embed(p, speech)                                        # embed+LN+PE fused
    qkv = fused_linear(x.reshape(-1, D), p['attn']['wqkv'], p['attn']['bqkv'],
                       ln=(p['ln1_g'], p['ln1_b']))
    q, k, v = _split_heads(qkv, B, T, D, N_HEADS, 3)
    x = mha_block(speech_lengths, q, k, v, p['attn']['wo3'], p['attn']['bo'], x)
    # FFN + residual + encoder after-norm fused in one kernel
    x = ffn_block(x, p['ln2_g'], p['ln2_b'], p['ff'],
                  after_ln=(p['after_g'], p['after_b']))
    return x, speech_lengths.astype(jnp.int32)                          # no subsampling


# ----------------------------- CIF predictor --------------------------------
def cif_fire(hidden, alphas, threshold, max_len):
    """Integrate-and-fire; hidden (B,T,D) bf16, alphas (B,T) -> (B,max_len,D), fires."""
    B, T, D = hidden.shape
    hidden_f = hidden.astype(jnp.float32)

    # TODO(synk): CIF integrate-and-fire is an inherently sequential per-frame scan.
    def step(carry, inp):
        integrate, frame = carry
        alpha, h = inp
        dist_comp = 1.0 - integrate
        integrate = integrate + alpha
        fire_val = integrate
        fire = integrate >= threshold
        integrate = jnp.where(fire, integrate - 1.0, integrate)
        cur = jnp.where(fire, dist_comp, alpha)
        remainds = alpha - cur
        frame_out = frame + cur[:, None] * h
        frame_next = jnp.where(fire[:, None], remainds[:, None] * h, frame_out)
        return (integrate, frame_next), (fire_val, frame_out)

    init = (jnp.zeros((B,), jnp.float32), jnp.zeros((B, D), jnp.float32))
    xs = (jnp.swapaxes(alphas, 0, 1), jnp.swapaxes(hidden_f, 0, 1))
    _, (fires_t, frames_t) = lax.scan(step, init, xs)
    fires = jnp.swapaxes(fires_t, 0, 1)                                 # (B,T)
    frames = jnp.swapaxes(frames_t, 0, 1)                               # (B,T,D)

    fired = fires >= threshold
    pos = jnp.cumsum(fired.astype(jnp.int32), axis=1) - 1               # (B,T)
    acoustic = pl.pallas_call(
        _cif_gather_kernel,
        out_shape=jax.ShapeDtypeStruct((B, max_len, D), jnp.float32),
        grid=(B,),
        in_specs=[pl.BlockSpec((1, 1, T), lambda b: (b, 0, 0)),
                  pl.BlockSpec((1, 1, T), lambda b: (b, 0, 0)),
                  pl.BlockSpec((1, T, D), lambda b: (b, 0, 0))],
        out_specs=pl.BlockSpec((1, max_len, D), lambda b: (b, 0, 0)),
        compiler_params=_cp(("parallel",)),
    )(pos[:, None, :], fired.astype(jnp.float32)[:, None, :], frames)
    return acoustic, fires


def predictor_forward(p, hidden, ys_pad, enc_lens, ignore_id=IGNORE_ID):
    # TODO(synk): reference predictor uses a full (cross-channel) Conv1d; depthwise kept.
    B, T, D = hidden.shape
    U = ys_pad.shape[1]
    alphas = pl.pallas_call(
        functools.partial(_predictor_alpha_kernel,
                          smooth=SMOOTH_FACTOR, noise=NOISE_THRESHOLD),
        out_shape=jax.ShapeDtypeStruct((B, 1, T), jnp.float32),
        grid_spec=pltpu.PrefetchScalarGridSpec(
            num_scalar_prefetch=1, grid=(B,),
            in_specs=[pl.BlockSpec((1, T, D), lambda b, lens: (b, 0, 0)),
                      pl.BlockSpec((3, D), lambda b, lens: (0, 0)),
                      pl.BlockSpec((1, D), lambda b, lens: (0, 0)),
                      pl.BlockSpec((1, D), lambda b, lens: (0, 0)),
                      pl.BlockSpec((1, 1), lambda b, lens: (0, 0))],
            out_specs=pl.BlockSpec((1, 1, T), lambda b, lens: (b, 0, 0))),
        compiler_params=_cp(("parallel",)),
    )(enc_lens.astype(jnp.int32), hidden, p['conv_w'], p['conv_b'].reshape(1, D),
      p['out_w'].reshape(1, D), p['out_b'].reshape(1, 1))[:, 0, :]      # (B,T)

    target_length = jnp.sum((ys_pad != ignore_id).astype(jnp.float32), axis=-1)
    token_num = jnp.sum(alphas, axis=-1)                                # pre-scaling
    alphas = alphas * (target_length / jnp.maximum(token_num, 1e-6))[:, None]
    acoustic, fires = cif_fire(hidden, alphas, CIF_THRESHOLD, U)
    return acoustic, token_num, alphas, fires


# --------------------------------- decoder ----------------------------------
def decoder_forward(p, memory, memory_lens, tgt, tgt_lens):
    """Single SAN decoder layer; returns pre-after-norm hidden (after-norm fused in head)."""
    B, U, D = tgt.shape
    T = memory.shape[1]
    H = N_HEADS
    # self-attention sub-layer (pre-norm, packed head-major QKV, residual inside kernel)
    qkv = fused_linear(tgt.reshape(-1, D), p['self_attn']['wqkv'], p['self_attn']['bqkv'],
                       ln=(p['ln1_g'], p['ln1_b']))
    q, k, v = _split_heads(qkv, B, U, D, H, 3)
    x = mha_block(tgt_lens, q, k, v, p['self_attn']['wo3'], p['self_attn']['bo'], tgt)
    # cross-attention sub-layer: q from LN(x), packed K|V from memory
    q2 = fused_linear(x.reshape(-1, D), p['src_attn']['wq'], p['src_attn']['bq'],
                      ln=(p['ln2_g'], p['ln2_b']))
    (qh,) = _split_heads(q2, B, U, D, H, 1)
    kv = fused_linear(memory.reshape(-1, D), p['src_attn']['wkv'], p['src_attn']['bkv'])
    kh, vh = _split_heads(kv, B, T, D, H, 2)
    x = mha_block(memory_lens, qh, kh, vh, p['src_attn']['wo3'], p['src_attn']['bo'], x)
    # FFN sub-layer
    x = ffn_block(x, p['ln3_g'], p['ln3_b'], p['ff'])
    return x                                                            # (B,U,D) bf16


def decoder_head_stats(x2d, p, tgt_flat, V, tm=256):
    """Fused after-norm + vocab projection; emits (target log-prob, sum log-prob) per row."""
    M, D = x2d.shape
    tm = min(tm, M)
    lpt, slp = pl.pallas_call(
        _head_nll_kernel,
        out_shape=(jax.ShapeDtypeStruct((M, 1), jnp.float32),
                   jax.ShapeDtypeStruct((M, 1), jnp.float32)),
        grid=(pl.cdiv(M, tm),),
        in_specs=[pl.BlockSpec((tm, D), lambda i: (i, 0)),
                  pl.BlockSpec((1, D), lambda i: (0, 0)),
                  pl.BlockSpec((1, D), lambda i: (0, 0)),
                  pl.BlockSpec((D, V), lambda i: (0, 0)),
                  pl.BlockSpec((1, V), lambda i: (0, 0)),
                  pl.BlockSpec((tm, 1), lambda i: (i, 0))],
        out_specs=(pl.BlockSpec((tm, 1), lambda i: (i, 0)),
                   pl.BlockSpec((tm, 1), lambda i: (i, 0))),
        compiler_params=_cp(("parallel",)),
    )(x2d, p['after_g'].reshape(1, D), p['after_b'].reshape(1, D),
      p['out_w'], p['out_b'].reshape(1, V), tgt_flat.reshape(M, 1).astype(jnp.int32))
    return lpt[:, 0], slp[:, 0]


def ctc_emit(encoder_out, ctc_w, ctc_b, ext, tt=256):
    """Fused CTC head: only the (B,T,2U+1) emission table ever hits HBM."""
    B, T, D = encoder_out.shape
    V = ctc_w.shape[1]
    S = ext.shape[1]
    tt = min(tt, T)
    return pl.pallas_call(
        _ctc_emit_kernel,
        out_shape=jax.ShapeDtypeStruct((B, T, S), jnp.float32),
        grid=(B, pl.cdiv(T, tt)),
        in_specs=[pl.BlockSpec((1, tt, D), lambda b, t: (b, t, 0)),
                  pl.BlockSpec((D, V), lambda b, t: (0, 0)),
                  pl.BlockSpec((1, V), lambda b, t: (0, 0)),
                  pl.BlockSpec((1, 1, S), lambda b, t: (b, 0, 0))],
        out_specs=pl.BlockSpec((1, tt, S), lambda b, t: (b, t, 0)),
        compiler_params=_cp(("parallel", "parallel")),
    )(encoder_out, ctc_w, ctc_b.reshape(1, V), ext[:, None, :])


# ---------------------------------- losses ----------------------------------
def label_smoothing_from_stats(lp_t, sum_lp, target, vocab_size, smoothing, ignore_id):
    """LabelSmoothingLoss from per-row (target log-prob, sum log-prob)."""
    B = target.shape[0]
    tgt = target.reshape(-1)
    ignore = tgt == ignore_id
    confidence = 1.0 - smoothing
    low = smoothing / (vocab_size - 1)
    const = xlogy(confidence, confidence) + (vocab_size - 1) * xlogy(low, low)
    kl = const - (confidence - low) * lp_t - low * sum_lp
    kl = jnp.where(ignore, 0.0, kl)
    return jnp.sum(kl) / B                                              # normalize_length=False


def ctc_loss_from_emit(emit, ext, input_lengths, label_lengths, blank=0):
    # TODO(synk): CTC forward DP is a sequential log-space recursion; kept as lax.scan.
    B, T, S = emit.shape
    NEG = -1e30
    same2 = jnp.concatenate([jnp.zeros((B, 2), bool), ext[:, 2:] == ext[:, :-2]], axis=1)
    can_skip = (ext != blank) & (~same2)

    alpha0 = jnp.full((B, S), NEG)
    alpha0 = alpha0.at[:, 0].set(emit[:, 0, 0])
    alpha0 = alpha0.at[:, 1].set(emit[:, 0, 1])

    def logadd3(a, b, c):
        m = jnp.maximum(jnp.maximum(a, b), c)
        return m + jnp.log(jnp.exp(a - m) + jnp.exp(b - m) + jnp.exp(c - m))

    def step(alpha, emit_t):
        a1 = jnp.concatenate([jnp.full((B, 1), NEG), alpha[:, :-1]], axis=1)
        a2 = jnp.concatenate([jnp.full((B, 2), NEG), alpha[:, :-2]], axis=1)
        a2 = jnp.where(can_skip, a2, NEG)
        new = logadd3(alpha, a1, a2) + emit_t
        return new, new

    _, alphas_rest = lax.scan(step, alpha0, jnp.swapaxes(emit[:, 1:, :], 0, 1))
    alphas = jnp.concatenate([alpha0[None], alphas_rest], axis=0)       # (T,B,S)
    t_last = jnp.clip(input_lengths - 1, 0, T - 1)
    alpha_final = alphas[t_last, jnp.arange(B)]                         # (B,S)
    s_last = jnp.clip(2 * label_lengths, 0, S - 1)
    s_prev = jnp.clip(2 * label_lengths - 1, 0, S - 1)
    a_last = alpha_final[jnp.arange(B), s_last]
    a_prev = alpha_final[jnp.arange(B), s_prev]
    a_prev = jnp.where(label_lengths > 0, a_prev, NEG)                  # no double count
    m = jnp.maximum(a_last, a_prev)
    log_p = m + jnp.log(jnp.exp(a_last - m) + jnp.exp(a_prev - m))
    return -jnp.sum(log_p)                                              # reduction='sum'


# ------------------------------- full forward --------------------------------
def asr_cif_forward(params, speech, speech_lengths, text, text_lengths):
    B, U = text.shape
    V = params['ctc']['w'].shape[1]
    speech_lengths = speech_lengths.astype(jnp.int32)
    text_lengths_i = text_lengths.astype(jnp.int32)

    encoder_out, encoder_out_lens = encoder_forward(params['encoder'], speech, speech_lengths)
    D = encoder_out.shape[-1]

    # ---- attention / CIF branch (ctc_weight != 1.0) ----
    pre_acoustic, pre_token_len, _alphas, _peaks = predictor_forward(
        params['predictor'], encoder_out, text, encoder_out_lens)
    dec_hidden = decoder_forward(params['decoder'], encoder_out, encoder_out_lens,
                                 pre_acoustic.astype(jnp.bfloat16), text_lengths_i)
    tgt_safe = jnp.where(text == IGNORE_ID, 0, text).astype(jnp.int32)
    lp_t, sum_lp = decoder_head_stats(dec_hidden.reshape(-1, D), params['decoder'],
                                      tgt_safe.reshape(-1), V)
    loss_att = label_smoothing_from_stats(lp_t, sum_lp, text, V, LSM_WEIGHT, IGNORE_ID)
    loss_pre = jnp.sum(jnp.abs(text_lengths.astype(jnp.float32) - pre_token_len)) / B  # MAELoss

    # ---- CTC branch (ctc_weight != 0.0): fused head + emission gather ----
    S = 2 * U + 1
    ext = jnp.full((B, S), 0, jnp.int32).at[:, 1::2].set(tgt_safe)
    emit = ctc_emit(encoder_out, params['ctc']['w'], params['ctc']['b'], ext)
    loss_ctc = ctc_loss_from_emit(emit, ext, encoder_out_lens, text_lengths_i) / B

    loss = CTC_WEIGHT * loss_ctc + (1.0 - CTC_WEIGHT) * loss_att + PREDICTOR_WEIGHT * loss_pre
    return {'loss': loss, 'loss_att': loss_att, 'loss_ctc': loss_ctc, 'loss_pre': loss_pre}


# ------------------------------- param init ----------------------------------
def sinusoidal_pe(T, D):
    pos = np.arange(T)[:, None].astype(np.float32)
    div = np.exp(np.arange(0, D, 2).astype(np.float32) * -(math.log(10000.0) / D))
    pe = np.zeros((T, D), np.float32)
    pe[:, 0::2] = np.sin(pos * div)
    pe[:, 1::2] = np.cos(pos * div)
    return jnp.asarray(pe)


def init_params(key, feat, D, dff, V, max_t=64, n_heads=N_HEADS):
    keys = iter(jax.random.split(key, 64))
    Dh = D // n_heads

    def w(shape, scale=0.05, dtype=jnp.bfloat16):
        # matmul weights pre-cast to bf16 once: half the DMA + VMEM on every layer
        return (scale * jax.random.normal(next(keys), shape, jnp.float32)).astype(dtype)

    def self_attn_p():                 # packed Q|K|V projection + head-major output proj
        return dict(wqkv=w((D, 3 * D)), bqkv=jnp.zeros(3 * D, jnp.float32),
                    wo3=w((D, D)).reshape(n_heads, Dh, D), bo=jnp.zeros(D, jnp.float32))

    def cross_attn_p():                # separate Q projection, packed K|V projection
        return dict(wq=w((D, D)), bq=jnp.zeros(D, jnp.float32),
                    wkv=w((D, 2 * D)), bkv=jnp.zeros(2 * D, jnp.float32),
                    wo3=w((D, D)).reshape(n_heads, Dh, D), bo=jnp.zeros(D, jnp.float32))

    def ffn_p():
        return dict(w1=w((D, dff)), b1=jnp.zeros(dff, jnp.float32),
                    w2=w((dff, D)), b2=jnp.zeros(D, jnp.float32))

    encoder = dict(
        embed_w=w((feat, D)), embed_b=jnp.zeros(D, jnp.float32),
        embed_ln_g=jnp.ones(D, jnp.float32), embed_ln_b=jnp.zeros(D, jnp.float32),
        pe=sinusoidal_pe(max_t, D),
        ln1_g=jnp.ones(D, jnp.float32), ln1_b=jnp.zeros(D, jnp.float32),
        ln2_g=jnp.ones(D, jnp.float32), ln2_b=jnp.zeros(D, jnp.float32),
        attn=self_attn_p(), ff=ffn_p(),
        after_g=jnp.ones(D, jnp.float32), after_b=jnp.zeros(D, jnp.float32))

    predictor = dict(conv_w=w((3, D), 0.1, jnp.float32), conv_b=jnp.zeros(D, jnp.float32),
                     out_w=w((D, 1), 0.1, jnp.float32), out_b=jnp.zeros(1, jnp.float32))

    decoder = dict(
        ln1_g=jnp.ones(D, jnp.float32), ln1_b=jnp.zeros(D, jnp.float32),
        ln2_g=jnp.ones(D, jnp.float32), ln2_b=jnp.zeros(D, jnp.float32),
        ln3_g=jnp.ones(D, jnp.float32), ln3_b=jnp.zeros(D, jnp.float32),
        self_attn=self_attn_p(), src_attn=cross_attn_p(), ff=ffn_p(),
        after_g=jnp.ones(D, jnp.float32), after_b=jnp.zeros(D, jnp.float32),
        out_w=w((D, V)), out_b=jnp.zeros(V, jnp.float32))

    ctc = dict(w=w((D, V)), b=jnp.zeros(V, jnp.float32))
    return dict(encoder=encoder, predictor=predictor, decoder=decoder, ctc=ctc)


# ----------------------------------- main ------------------------------------
if __name__ == "__main__":
    B, T, FEAT, D, DFF, V, U = 2, 16, 8, 32, 64, 16, 6

    key = jax.random.PRNGKey(0)
    k_speech, k_text, k_params = jax.random.split(key, 3)

    speech = jax.random.normal(k_speech, (B, T, FEAT), jnp.float32)
    speech_lengths = jnp.array([16, 12], jnp.int32)
    text_lengths = jnp.array([6, 4], jnp.int32)
    raw_text = jax.random.randint(k_text, (B, U), 1, V - 1)
    text = jnp.where(jnp.arange(U)[None, :] < text_lengths[:, None],
                     raw_text, IGNORE_ID).astype(jnp.int32)

    params = init_params(k_params, FEAT, D, DFF, V)

    fwd = jax.jit(functools.partial(asr_cif_forward, params))
    out = fwd(speech, speech_lengths, text, text_lengths)
    jax.block_until_ready(out)

    print("KERNEL_OK")
</pallas_src>

<mosaic_0001>
module attributes {stable_mosaic.version = 11 : i64} {
  func.func @_embed_kernel(%arg0: i32, %arg1: i32, %arg2: memref<1x16x8xf32, #tpu.memory_space<vmem>>, %arg3: memref<8x32xbf16, #tpu.memory_space<vmem>>, %arg4: memref<1x32xf32, #tpu.memory_space<vmem>>, %arg5: memref<1x32xf32, #tpu.memory_space<vmem>>, %arg6: memref<1x32xf32, #tpu.memory_space<vmem>>, %arg7: memref<16x32xf32, #tpu.memory_space<vmem>>, %arg8: memref<1x16x32xbf16, #tpu.memory_space<vmem>>) attributes {dimension_semantics = [#tpu.dimension_semantics<parallel>, #tpu.dimension_semantics<parallel>], iteration_bounds = array<i64: 2, 1>, scalar_prefetch = 0 : i64, scratch_operands = 0 : i64, tpu.core_type = #tpu.core_type<tc>, window_params = [{transform_indices = @transform_0, window_bounds = array<i64: 1, 16, 8>}, {pipeline_mode = #tpu.pipeline_mode<synchronous>, transform_indices = @transform_1, window_bounds = array<i64: 8, 32>}, {pipeline_mode = #tpu.pipeline_mode<synchronous>, transform_indices = @transform_2, window_bounds = array<i64: 1, 32>}, {pipeline_mode = #tpu.pipeline_mode<synchronous>, transform_indices = @transform_3, window_bounds = array<i64: 1, 32>}, {pipeline_mode = #tpu.pipeline_mode<synchronous>, transform_indices = @transform_4, window_bounds = array<i64: 1, 32>}, {transform_indices = @transform_5, window_bounds = array<i64: 16, 32>}, {transform_indices = @transform_6, window_bounds = array<i64: 1, 16, 32>}]} {
    %c0 = arith.constant 0 : index
    %c0_0 = arith.constant 0 : index
    %c0_1 = arith.constant 0 : index
    %0 = vector.load %arg2[%c0, %c0_0, %c0_1] : memref<1x16x8xf32, #tpu.memory_space<vmem>>, vector<1x16x8xf32>
    %1 = vector.shape_cast %0 : vector<1x16x8xf32> to vector<16x8xf32>
    %2 = arith.truncf %1 : vector<16x8xf32> to vector<16x8xbf16>
    %c0_2 = arith.constant 0 : index
    %c0_3 = arith.constant 0 : index
    %3 = vector.load %arg3[%c0_2, %c0_3] : memref<8x32xbf16, #tpu.memory_space<vmem>>, vector<8x32xbf16>
    %cst = arith.constant dense<0.000000e+00> : vector<16x32xf32>
    %4 = tpu.matmul %2, %3, %cst {dimension_numbers = #tpu.dot_dimension_numbers<[1], [0], [0], [1], [0, 0, 1, 1], [], []>} : vector<16x8xbf16>, vector<8x32xbf16>, vector<16x32xf32> -> vector<16x32xf32>
    %c0_4 = arith.constant 0 : index
    %c0_5 = arith.constant 0 : index
    %5 = vector.load %arg4[%c0_4, %c0_5] : memref<1x32xf32, #tpu.memory_space<vmem>>, vector<1x32xf32>
    %6 = vector.broadcast %5 : vector<1x32xf32> to vector<16x32xf32>
    %7 = arith.addf %4, %6 : vector<16x32xf32>
    %c0_6 = arith.constant 0 : index
    %c0_7 = arith.constant 0 : index
    %8 = vector.load %arg5[%c0_6, %c0_7] : memref<1x32xf32, #tpu.memory_space<vmem>>, vector<1x32xf32>
    %c0_8 = arith.constant 0 : index
    %c0_9 = arith.constant 0 : index
    %9 = vector.load %arg6[%c0_8, %c0_9] : memref<1x32xf32, #tpu.memory_space<vmem>>, vector<1x32xf32>
    %cst_10 = arith.constant dense<0.000000e+00> : vector<16xf32>
    %10 = vector.multi_reduction <add>, %7, %cst_10 [1] : vector<16x32xf32> to vector<16xf32>
    %11 = vector.shape_cast %10 : vector<16xf32> to vector<16x1xf32>
    %cst_11 = arith.constant 3.200000e+01 : f32
    %12 = vector.broadcast %cst_11 : f32 to vector<16x1xf32>
    %13 = arith.divf %11, %12 : vector<16x1xf32>
    %14 = vector.broadcast %13 : vector<16x1xf32> to vector<16x32xf32>
    %15 = arith.subf %7, %14 : vector<16x32xf32>
    %16 = arith.mulf %15, %15 : vector<16x32xf32>
    %cst_12 = arith.constant dense<0.000000e+00> : vector<16xf32>
    %17 = vector.multi_reduction <add>, %16, %cst_12 [1] : vector<16x32xf32> to vector<16xf32>
    %18 = vector.shape_cast %17 : vector<16xf32> to vector<16x1xf32>
    %cst_13 = arith.constant 3.200000e+01 : f32
    %19 = vector.broadcast %cst_13 : f32 to vector<16x1xf32>
    %20 = arith.divf %18, %19 : vector<16x1xf32>
    %21 = vector.broadcast %13 : vector<16x1xf32> to vector<16x32xf32>
    %22 = arith.subf %7, %21 : vector<16x32xf32>
    %cst_14 = arith.constant 9.99999974E-6 : f32
    %23 = vector.broadcast %cst_14 : f32 to vector<16x1xf32>
    %24 = arith.addf %20, %23 : vector<16x1xf32>
    %25 = math.rsqrt %24 : vector<16x1xf32>
    %26 = vector.broadcast %25 : vector<16x1xf32> to vector<16x32xf32>
    %27 = arith.mulf %22, %26 : vector<16x32xf32>
    %28 = vector.broadcast %8 : vector<1x32xf32> to vector<16x32xf32>
    %29 = arith.mulf %27, %28 : vector<16x32xf32>
    %30 = vector.broadcast %9 : vector<1x32xf32> to vector<16x32xf32>
    %31 = arith.addf %29, %30 : vector<16x32xf32>
    %cst_15 = arith.constant 5.65685415 : f32
    %32 = vector.broadcast %cst_15 : f32 to vector<16x32xf32>
    %33 = arith.mulf %31, %32 : vector<16x32xf32>
    %c0_16 = arith.constant 0 : index
    %c0_17 = arith.constant 0 : index
    %34 = vector.load %arg7[%c0_16, %c0_17] : memref<16x32xf32, #tpu.memory_space<vmem>>, vector<16x32xf32>
    %35 = arith.addf %33, %34 : vector<16x32xf32>
    %36 = arith.truncf %35 : vector<16x32xf32> to vector<16x32xbf16>
    %c0_18 = arith.constant 0 : index
    %c0_19 = arith.constant 0 : index
    %c0_20 = arith.constant 0 : index
    %37 = vector.load %arg8[%c0_18, %c0_19, %c0_20] : memref<1x16x32xbf16, #tpu.memory_space<vmem>>, vector<1x16x32xbf16>
    %38 = vector.shape_cast %37 : vector<1x16x32xbf16> to vector<16x32xbf16>
    %39 = vector.shape_cast %36 : vector<16x32xbf16> to vector<1x16x32xbf16>
    tpu.vector_store %arg8[%c0_18, %c0_19, %c0_20], %39 {strides = array<i32>} : memref<1x16x32xbf16, #tpu.memory_space<vmem>>, vector<1x16x32xbf16>,
    return
  }
  func.func @transform_0(%arg0: i32, %arg1: i32) -> (i32, i32, i32) {
    %c0_i32 = arith.constant 0 : i32
    %c0_i32_0 = arith.constant 0 : i32
    return %arg0, %arg1, %c0_i32 : i32, i32, i32
  }
  func.func @transform_1(%arg0: i32, %arg1: i32) -> (i32, i32) {
    %c0_i32 = arith.constant 0 : i32
    %c0_i32_0 = arith.constant 0 : i32
    %c0_i32_1 = arith.constant 0 : i32
    return %c0_i32, %c0_i32_0 : i32, i32
  }
  func.func @transform_2(%arg0: i32, %arg1: i32) -> (i32, i32) {
    %c0_i32 = arith.constant 0 : i32
    %c0_i32_0 = arith.constant 0 : i32
    %c0_i32_1 = arith.constant 0 : i32
    return %c0_i32, %c0_i32_0 : i32, i32
  }
  func.func @transform_3(%arg0: i32, %arg1: i32) -> (i32, i32) {
    %c0_i32 = arith.constant 0 : i32
    %c0_i32_0 = arith.constant 0 : i32
    %c0_i32_1 = arith.constant 0 : i32
    return %c0_i32, %c0_i32_0 : i32, i32
  }
  func.func @transform_4(%arg0: i32, %arg1: i32) -> (i32, i32) {
    %c0_i32 = arith.constant 0 : i32
    %c0_i32_0 = arith.constant 0 : i32
    %c0_i32_1 = arith.constant 0 : i32
    return %c0_i32, %c0_i32_0 : i32, i32
  }
  func.func @transform_5(%arg0: i32, %arg1: i32) -> (i32, i32) {
    %c0_i32 = arith.constant 0 : i32
    %c0_i32_0 = arith.constant 0 : i32
    return %arg1, %c0_i32 : i32, i32
  }
  func.func @transform_6(%arg0: i32, %arg1: i32) -> (i32, i32, i32) {
    %c0_i32 = arith.constant 0 : i32
    %c0_i32_0 = arith.constant 0 : i32
    return %arg0, %arg1, %c0_i32 : i32, i32, i32
  }
}

module attributes {stable_mosaic.version = 11 : i64} {
  func.func @_ln_linear_kernel(%arg0: i32, %arg1: memref<32x32xbf16, #tpu.memory_space<vmem>>, %arg2: memref<1x32xf32, #tpu.memory_space<vmem>>, %arg3: memref<1x32xf32, #tpu.memory_space<vmem>>, %arg4: memref<32x96xbf16, #tpu.memory_space<vmem>>, %arg5: memref<1x96xf32, #tpu.memory_space<vmem>>, %arg6: memref<32x96xbf16, #tpu.memory_space<vmem>>) attributes {dimension_semantics = [#tpu.dimension_semantics<parallel>], iteration_bounds = array<i64: 1>, scalar_prefetch = 0 : i64, scratch_operands = 0 : i64, tpu.core_type = #tpu.core_type<tc>, window_params = [{transform_indices = @transform_0, window_bounds = array<i64: 32, 32>}, {pipeline_mode = #tpu.pipeline_mode<synchronous>, transform_indices = @transform_1, window_bounds = array<i64: 1, 32>}, {pipeline_mode = #tpu.pipeline_mode<synchronous>, transform_indices = @transform_2, window_bounds = array<i64: 1, 32>}, {pipeline_mode = #tpu.pipeline_mode<synchronous>, transform_indices = @transform_3, window_bounds = array<i64: 32, 96>}, {pipeline_mode = #tpu.pipeline_mode<synchronous>, transform_indices = @transform_4, window_bounds = array<i64: 1, 96>}, {transform_indices = @transform_5, window_bounds = array<i64: 32, 96>}]} {
    %c0 = arith.constant 0 : index
    %c0_0 = arith.constant 0 : index
    %0 = vector.load %arg1[%c0, %c0_0] : memref<32x32xbf16, #tpu.memory_space<vmem>>, vector<32x32xbf16>
    %1 = arith.extf %0 : vector<32x32xbf16> to vector<32x32xf32>
    %c0_1 = arith.constant 0 : index
    %c0_2 = arith.constant 0 : index
    %2 = vector.load %arg2[%c0_1, %c0_2] : memref<1x32xf32, #tpu.memory_space<vmem>>, vector<1x32xf32>
    %c0_3 = arith.constant 0 : index
    %c0_4 = arith.constant 0 : index
    %3 = vector.load %arg3[%c0_3, %c0_4] : memref<1x32xf32, #tpu.memory_space<vmem>>, vector<1x32xf32>
    %cst = arith.constant dense<0.000000e+00> : vector<32xf32>
    %4 = vector.multi_reduction <add>, %1, %cst [1] : vector<32x32xf32> to vector<32xf32>
    %5 = vector.shape_cast %4 : vector<32xf32> to vector<32x1xf32>
    %cst_5 = arith.constant 3.200000e+01 : f32
    %6 = vector.broadcast %cst_5 : f32 to vector<32x1xf32>
    %7 = arith.divf %5, %6 : vector<32x1xf32>
    %8 = vector.broadcast %7 : vector<32x1xf32> to vector<32x32xf32>
    %9 = arith.subf %1, %8 : vector<32x32xf32>
    %10 = arith.mulf %9, %9 : vector<32x32xf32>
    %cst_6 = arith.constant dense<0.000000e+00> : vector<32xf32>
    %11 = vector.multi_reduction <add>, %10, %cst_6 [1] : vector<32x32xf32> to vector<32xf32>
    %12 = vector.shape_cast %11 : vector<32xf32> to vector<32x1xf32>
    %cst_7 = arith.constant 3.200000e+01 : f32
    %13 = vector.broadcast %cst_7 : f32 to vector<32x1xf32>
    %14 = arith.divf %12, %13 : vector<32x1xf32>
    %15 = vector.broadcast %7 : vector<32x1xf32> to vector<32x32xf32>
    %16 = arith.subf %1, %15 : vector<32x32xf32>
    %cst_8 = arith.constant 9.99999974E-6 : f32
    %17 = vector.broadcast %cst_8 : f32 to vector<32x1xf32>
    %18 = arith.addf %14, %17 : vector<32x1xf32>
    %19 = math.rsqrt %18 : vector<32x1xf32>
    %20 = vector.broadcast %19 : vector<32x1xf32> to vector<32x32xf32>
    %21 = arith.mulf %16, %20 : vector<32x32xf32>
    %22 = vector.broadcast %2 : vector<1x32xf32> to vector<32x32xf32>
    %23 = arith.mulf %21, %22 : vector<32x32xf32>
    %24 = vector.broadcast %3 : vector<1x32xf32> to vector<32x32xf32>
    %25 = arith.addf %23, %24 : vector<32x32xf32>
    %26 = arith.truncf %25 : vector<32x32xf32> to vector<32x32xbf16>
    %c0_9 = arith.constant 0 : index
    %c0_10 = arith.constant 0 : index
    %27 = vector.load %arg4[%c0_9, %c0_10] : memref<32x96xbf16, #tpu.memory_space<vmem>>, vector<32x96xbf16>
    %cst_11 = arith.constant dense<0.000000e+00> : vector<32x96xf32>
    %28 = tpu.matmul %26, %27, %cst_11 {dimension_numbers = #tpu.dot_dimension_numbers<[1], [0], [0], [1], [0, 0, 1, 1], [], []>} : vector<32x32xbf16>, vector<32x96xbf16>, vector<32x96xf32> -> vector<32x96xf32>
    %c0_12 = arith.constant 0 : index
    %c0_13 = arith.constant 0 : index
    %29 = vector.load %arg5[%c0_12, %c0_13] : memref<1x96xf32, #tpu.memory_space<vmem>>, vector<1x96xf32>
    %30 = vector.broadcast %29 : vector<1x96xf32> to vector<32x96xf32>
    %31 = arith.addf %28, %30 : vector<32x96xf32>
    %32 = arith.truncf %31 : vector<32x96xf32> to vector<32x96xbf16>
    %c0_14 = arith.constant 0 : index
    %c0_15 = arith.constant 0 : index
    %33 = vector.load %arg6[%c0_14, %c0_15] : memref<32x96xbf16, #tpu.memory_space<vmem>>, vector<32x96xbf16>
    tpu.vector_store %arg6[%c0_14, %c0_15], %32 {strides = array<i32>} : memref<32x96xbf16, #tpu.memory_space<vmem>>, vector<32x96xbf16>,
    return
  }
  func.func @transform_0(%arg0: i32) -> (i32, i32) {
    %c0_i32 = arith.constant 0 : i32
    %c0_i32_0 = arith.constant 0 : i32
    return %arg0, %c0_i32 : i32, i32
  }
  func.func @transform_1(%arg0: i32) -> (i32, i32) {
    %c0_i32 = arith.constant 0 : i32
    %c0_i32_0 = arith.constant 0 : i32
    %c0_i32_1 = arith.constant 0 : i32
    return %c0_i32, %c0_i32_0 : i32, i32
  }
  func.func @transform_2(%arg0: i32) -> (i32, i32) {
    %c0_i32 = arith.constant 0 : i32
    %c0_i32_0 = arith.constant 0 : i32
    %c0_i32_1 = arith.constant 0 : i32
    return %c0_i32, %c0_i32_0 : i32, i32
  }
  func.func @transform_3(%arg0: i32) -> (i32, i32) {
    %c0_i32 = arith.constant 0 : i32
    %c0_i32_0 = arith.constant 0 : i32
    %c0_i32_1 = arith.constant 0 : i32
    return %c0_i32, %c0_i32_0 : i32, i32
  }
  func.func @transform_4(%arg0: i32) -> (i32, i32) {
    %c0_i32 = arith.constant 0 : i32
    %c0_i32_0 = arith.constant 0 : i32
    %c0_i32_1 = arith.constant 0 : i32
    return %c0_i32, %c0_i32_0 : i32, i32
  }
  func.func @transform_5(%arg0: i32) -> (i32, i32) {
    %c0_i32 = arith.constant 0 : i32
    %c0_i32_0 = arith.constant 0 : i32
    return %arg0, %c0_i32 : i32, i32
  }
}

module attributes {stable_mosaic.version = 11 : i64} {
  func.func @_mha_kernel(%arg0: i32, %arg1: i32, %arg2: memref<2xi32, #tpu.memory_space<smem>>, %arg3: memref<1x4x16x8xbf16, #tpu.memory_space<vmem>>, %arg4: memref<1x4x16x8xbf16, #tpu.memory_space<vmem>>, %arg5: memref<1x4x16x8xbf16, #tpu.memory_space<vmem>>, %arg6: memref<4x8x32xbf16, #tpu.memory_space<vmem>>, %arg7: memref<1x32xf32, #tpu.memory_space<vmem>>, %arg8: memref<1x16x32xbf16, #tpu.memory_space<vmem>>, %arg9: memref<1x16x32xbf16, #tpu.memory_space<vmem>>) attributes {dimension_semantics = [#tpu.dimension_semantics<parallel>, #tpu.dimension_semantics<parallel>], iteration_bounds = array<i64: 2, 1>, scalar_prefetch = 1 : i64, scratch_operands = 0 : i64, tpu.core_type = #tpu.core_type<tc>, window_params = [{transform_indices = @transform_0, window_bounds = array<i64: 1, 4, 16, 8>}, {transform_indices = @transform_1, window_bounds = array<i64: 1, 4, 16, 8>}, {transform_indices = @transform_2, window_bounds = array<i64: 1, 4, 16, 8>}, {pipeline_mode = #tpu.pipeline_mode<synchronous>, transform_indices = @transform_3, window_bounds = array<i64: 4, 8, 32>}, {pipeline_mode = #tpu.pipeline_mode<synchronous>, transform_indices = @transform_4, window_bounds = array<i64: 1, 32>}, {transform_indices = @transform_5, window_bounds = array<i64: 1, 16, 32>}, {transform_indices = @transform_6, window_bounds = array<i64: 1, 16, 32>}]} {
    %0 = arith.index_cast %arg0 : i32 to index
    %1 = memref.load %arg2[%0] : memref<2xi32, #tpu.memory_space<smem>>
    %c0 = arith.constant 0 : index
    %c0_0 = arith.constant 0 : index
    %c0_1 = arith.constant 0 : index
    %c0_2 = arith.constant 0 : index
    %2 = vector.load %arg3[%c0, %c0_0, %c0_1, %c0_2] : memref<1x4x16x8xbf16, #tpu.memory_space<vmem>>, vector<1x4x16x8xbf16>
    %3 = vector.shape_cast %2 : vector<1x4x16x8xbf16> to vector<4x16x8xbf16>
    %c0_3 = arith.constant 0 : index
    %c0_4 = arith.constant 0 : index
    %c0_5 = arith.constant 0 : index
    %c0_6 = arith.constant 0 : index
    %4 = vector.load %arg4[%c0_3, %c0_4, %c0_5, %c0_6] : memref<1x4x16x8xbf16, #tpu.memory_space<vmem>>, vector<1x4x16x8xbf16>
    %5 = vector.shape_cast %4 : vector<1x4x16x8xbf16> to vector<4x16x8xbf16>
    %c0_7 = arith.constant 0 : index
    %c0_8 = arith.constant 0 : index
    %c0_9 = arith.constant 0 : index
    %c0_10 = arith.constant 0 : index
    %6 = vector.load %arg5[%c0_7, %c0_8, %c0_9, %c0_10] : memref<1x4x16x8xbf16, #tpu.memory_space<vmem>>, vector<1x4x16x8xbf16>
    %7 = vector.shape_cast %6 : vector<1x4x16x8xbf16> to vector<4x16x8xbf16>
    %cst = arith.constant dense<0.000000e+00> : vector<4x16x16xf32>
    %8 = tpu.matmul %3, %5, %cst {dimension_numbers = #tpu.dot_dimension_numbers<[2], [2], [1], [1], [0, 0, 0, 1, 1, 1], [0], [0]>} : vector<4x16x8xbf16>, vector<4x16x8xbf16>, vector<4x16x16xf32> -> vector<4x16x16xf32>
    %cst_11 = arith.constant 0.353553385 : f32
    %9 = vector.broadcast %cst_11 : f32 to vector<4x16x16xf32>
    %10 = arith.mulf %8, %9 : vector<4x16x16xf32>
    %11 = tpu.iota {dimensions = array<i32: 2>} : vector<4x16x16xi32>
    %12 = vector.broadcast %1 : i32 to vector<4x16x16xi32>
    %13 = arith.cmpi slt, %11, %12 : vector<4x16x16xi32>
    %cst_12 = arith.constant -1.000000e+30 : f32
    %14 = vector.broadcast %cst_12 : f32 to vector<4x16x16xf32>
    %15 = arith.select %13, %10, %14 : vector<4x16x16xi1>, vector<4x16x16xf32>
    %cst_13 = arith.constant dense<0xFF800000> : vector<4x16xf32>
    %16 = vector.multi_reduction <maximumf>, %15, %cst_13 [2] : vector<4x16x16xf32> to vector<4x16xf32>
    %17 = vector.shape_cast %16 : vector<4x16xf32> to vector<4x16x1xf32>
    %18 = vector.broadcast %17 : vector<4x16x1xf32> to vector<4x16x16xf32>
    %19 = arith.subf %15, %18 : vector<4x16x16xf32>
    %20 = math.exp %19 : vector<4x16x16xf32>
    %cst_14 = arith.constant dense<0.000000e+00> : vector<4x16xf32>
    %21 = vector.multi_reduction <add>, %20, %cst_14 [2] : vector<4x16x16xf32> to vector<4x16xf32>
    %22 = vector.shape_cast %21 : vector<4x16xf32> to vector<4x16x1xf32>
    %cst_15 = arith.constant 1.000000e-30 : f32
    %23 = vector.broadcast %cst_15 : f32 to vector<4x16x1xf32>
    %24 = arith.maximumf %22, %23 : vector<4x16x1xf32>
    %25 = tpu.reciprocal %24 {approx = true} : vector<4x16x1xf32> -> vector<4x16x1xf32>
    %26 = vector.broadcast %25 : vector<4x16x1xf32> to vector<4x16x16xf32>
    %27 = arith.mulf %20, %26 : vector<4x16x16xf32>
    %28 = arith.truncf %27 : vector<4x16x16xf32> to vector<4x16x16xbf16>
    %cst_16 = arith.constant dense<0.000000e+00> : vector<4x16x8xf32>
    %29 = tpu.matmul %28, %7, %cst_16 {dimension_numbers = #tpu.dot_dimension_numbers<[2], [1], [1], [2], [0, 0, 0, 1, 1, 2], [0], [0]>} : vector<4x16x16xbf16>, vector<4x16x8xbf16>, vector<4x16x8xf32> -> vector<4x16x8xf32>
    %30 = arith.truncf %29 : vector<4x16x8xf32> to vector<4x16x8xbf16>
    %c0_17 = arith.constant 0 : index
    %c0_18 = arith.constant 0 : index
    %c0_19 = arith.constant 0 : index
    %31 = vector.load %arg6[%c0_17, %c0_18, %c0_19] : memref<4x8x32xbf16, #tpu.memory_space<vmem>>, vector<4x8x32xbf16>
    %cst_20 = arith.constant dense<0.000000e+00> : vector<4x16x32xf32>
    %32 = tpu.matmul %30, %31, %cst_20 {dimension_numbers = #tpu.dot_dimension_numbers<[2], [1], [1], [2], [0, 0, 0, 1, 1, 2], [0], [0]>} : vector<4x16x8xbf16>, vector<4x8x32xbf16>, vector<4x16x32xf32> -> vector<4x16x32xf32>
    %cst_21 = arith.constant dense<0.000000e+00> : vector<16x32xf32>
    %33 = vector.multi_reduction <add>, %32, %cst_21 [0] : vector<4x16x32xf32> to vector<16x32xf32>
    %c0_22 = arith.constant 0 : index
    %c0_23 = arith.constant 0 : index
    %34 = vector.load %arg7[%c0_22, %c0_23] : memref<1x32xf32, #tpu.memory_space<vmem>>, vector<1x32xf32>
    %35 = vector.broadcast %34 : vector<1x32xf32> to vector<16x32xf32>
    %36 = arith.addf %33, %35 : vector<16x32xf32>
    %c0_24 = arith.constant 0 : index
    %c0_25 = arith.constant 0 : index
    %c0_26 = arith.constant 0 : index
    %37 = vector.load %arg8[%c0_24, %c0_25, %c0_26] : memref<1x16x32xbf16, #tpu.memory_space<vmem>>, vector<1x16x32xbf16>
    %38 = vector.shape_cast %37 : vector<1x16x32xbf16> to vector<16x32xbf16>
    %39 = arith.extf %38 : vector<16x32xbf16> to vector<16x32xf32>
    %40 = arith.addf %39, %36 : vector<16x32xf32>
    %41 = arith.truncf %40 : vector<16x32xf32> to vector<16x32xbf16>
    %c0_27 = arith.constant 0 : index
    %c0_28 = arith.constant 0 : index
    %c0_29 = arith.constant 0 : index
    %42 = vector.load %arg9[%c0_27, %c0_28, %c0_29] : memref<1x16x32xbf16, #tpu.memory_space<vmem>>, vector<1x16x32xbf16>
    %43 = vector.shape_cast %42 : vector<1x16x32xbf16> to vector<16x32xbf16>
    %44 = vector.shape_cast %41 : vector<16x32xbf16> to vector<1x16x32xbf16>
    tpu.vector_store %arg9[%c0_27, %c0_28, %c0_29], %44 {strides = array<i32>} : memref<1x16x32xbf16, #tpu.memory_space<vmem>>, vector<1x16x32xbf16>,
    return
  }
  func.func @transform_0(%arg0: i32, %arg1: i32, %arg2: memref<2xi32, #tpu.memory_space<smem>>) -> (i32, i32, i32, i32) {
    %c0_i32 = arith.constant 0 : i32
    %c0_i32_0 = arith.constant 0 : i32
    %c0_i32_1 = arith.constant 0 : i32
    return %arg0, %c0_i32, %arg1, %c0_i32_0 : i32, i32, i32, i32
  }
  func.func @transform_1(%arg0: i32, %arg1: i32, %arg2: memref<2xi32, #tpu.memory_space<smem>>) -> (i32, i32, i32, i32) {
    %c0_i32 = arith.constant 0 : i32
    %c0_i32_0 = arith.constant 0 : i32
    %c0_i32_1 = arith.constant 0 : i32
    %c0_i32_2 = arith.constant 0 : i32
    return %arg0, %c0_i32, %c0_i32_0, %c0_i32_1 : i32, i32, i32, i32
  }
  func.func @transform_2(%arg0: i32, %arg1: i32, %arg2: memref<2xi32, #tpu.memory_space<smem>>) -> (i32, i32, i32, i32) {
    %c0_i32 = arith.constant 0 : i32
    %c0_i32_0 = arith.constant 0 : i32
    %c0_i32_1 = arith.constant 0 : i32
    %c0_i32_2 = arith.constant 0 : i32
    return %arg0, %c0_i32, %c0_i32_0, %c0_i32_1 : i32, i32, i32, i32
  }
  func.func @transform_3(%arg0: i32, %arg1: i32, %arg2: memref<2xi32, #tpu.memory_space<smem>>) -> (i32, i32, i32) {
    %c0_i32 = arith.constant 0 : i32
    %c0_i32_0 = arith.constant 0 : i32
    %c0_i32_1 = arith.constant 0 : i32
    %c0_i32_2 = arith.constant 0 : i32
    return %c0_i32, %c0_i32_0, %c0_i32_1 : i32, i32, i32
  }
  func.func @transform_4(%arg0: i32, %arg1: i32, %arg2: memref<2xi32, #tpu.memory_space<smem>>) -> (i32, i32) {
    %c0_i32 = arith.constant 0 : i32
    %c0_i32_0 = arith.constant 0 : i32
    %c0_i32_1 = arith.constant 0 : i32
    return %c0_i32, %c0_i32_0 : i32, i32
  }
  func.func @transform_5(%arg0: i32, %arg1: i32, %arg2: memref<2xi32, #tpu.memory_space<smem>>) -> (i32, i32, i32) {
    %c0_i32 = arith.constant 0 : i32
    %c0_i32_0 = arith.constant 0 : i32
    return %arg0, %arg1, %c0_i32 : i32, i32, i32
  }
  func.func @transform_6(%arg0: i32, %arg1: i32, %arg2: memref<2xi32, #tpu.memory_space<smem>>) -> (i32, i32, i32) {
    %c0_i32 = arith.constant 0 : i32
    %c0_i32_0 = arith.constant 0 : i32
    return %arg0, %arg1, %c0_i32 : i32, i32, i32
  }
}

module attributes {stable_mosaic.version = 11 : i64} {
  func.func @_ffn_block_kernel(%arg0: i32, %arg1: memref<32x32xbf16, #tpu.memory_space<vmem>>, %arg2: memref<1x32xf32, #tpu.memory_space<vmem>>, %arg3: memref<1x32xf32, #tpu.memory_space<vmem>>, %arg4: memref<32x64xbf16, #tpu.memory_space<vmem>>, %arg5: memref<1x64xf32, #tpu.memory_space<vmem>>, %arg6: memref<64x32xbf16, #tpu.memory_space<vmem>>, %arg7: memref<1x32xf32, #tpu.memory_space<vmem>>, %arg8: memref<1x32xf32, #tpu.memory_space<vmem>>, %arg9: memref<1x32xf32, #tpu.memory_space<vmem>>, %arg10: memref<32x32xbf16, #tpu.memory_space<vmem>>) attributes {dimension_semantics = [#tpu.dimension_semantics<parallel>], iteration_bounds = array<i64: 1>, scalar_prefetch = 0 : i64, scratch_operands = 0 : i64, tpu.core_type = #tpu.core_type<tc>, window_params = [{transform_indices = @transform_0, window_bounds = array<i64: 32, 32>}, {pipeline_mode = #tpu.pipeline_mode<synchronous>, transform_indices = @transform_1, window_bounds = array<i64: 1, 32>}, {pipeline_mode = #tpu.pipeline_mode<synchronous>, transform_indices = @transform_2, window_bounds = array<i64: 1, 32>}, {pipeline_mode = #tpu.pipeline_mode<synchronous>, transform_indices = @transform_3, window_bounds = array<i64: 32, 64>}, {pipeline_mode = #tpu.pipeline_mode<synchronous>, transform_indices = @transform_4, window_bounds = array<i64: 1, 64>}, {pipeline_mode = #tpu.pipeline_mode<synchronous>, transform_indices = @transform_5, window_bounds = array<i64: 64, 32>}, {pipeline_mode = #tpu.pipeline_mode<synchronous>, transform_indices = @transform_6, window_bounds = array<i64: 1, 32>}, {pipeline_mode = #tpu.pipeline_mode<synchronous>, transform_indices = @transform_7, window_bounds = array<i64: 1, 32>}, {pipeline_mode = #tpu.pipeline_mode<synchronous>, transform_indices = @transform_8, window_bounds = array<i64: 1, 32>}, {transform_indices = @transform_9, window_bounds = array<i64: 32, 32>}]} {
    %c0 = arith.constant 0 : index
    %c0_0 = arith.constant 0 : index
    %0 = vector.load %arg1[%c0, %c0_0] : memref<32x32xbf16, #tpu.memory_space<vmem>>, vector<32x32xbf16>
    %1 = arith.extf %0 : vector<32x32xbf16> to vector<32x32xf32>
    %c0_1 = arith.constant 0 : index
    %c0_2 = arith.constant 0 : index
    %2 = vector.load %arg2[%c0_1, %c0_2] : memref<1x32xf32, #tpu.memory_space<vmem>>, vector<1x32xf32>
    %c0_3 = arith.constant 0 : index
    %c0_4 = arith.constant 0 : index
    %3 = vector.load %arg3[%c0_3, %c0_4] : memref<1x32xf32, #tpu.memory_space<vmem>>, vector<1x32xf32>
    %cst = arith.constant dense<0.000000e+00> : vector<32xf32>
    %4 = vector.multi_reduction <add>, %1, %cst [1] : vector<32x32xf32> to vector<32xf32>
    %5 = vector.shape_cast %4 : vector<32xf32> to vector<32x1xf32>
    %cst_5 = arith.constant 3.200000e+01 : f32
    %6 = vector.broadcast %cst_5 : f32 to vector<32x1xf32>
    %7 = arith.divf %5, %6 : vector<32x1xf32>
    %8 = vector.broadcast %7 : vector<32x1xf32> to vector<32x32xf32>
    %9 = arith.subf %1, %8 : vector<32x32xf32>
    %10 = arith.mulf %9, %9 : vector<32x32xf32>
    %cst_6 = arith.constant dense<0.000000e+00> : vector<32xf32>
    %11 = vector.multi_reduction <add>, %10, %cst_6 [1] : vector<32x32xf32> to vector<32xf32>
    %12 = vector.shape_cast %11 : vector<32xf32> to vector<32x1xf32>
    %cst_7 = arith.constant 3.200000e+01 : f32
    %13 = vector.broadcast %cst_7 : f32 to vector<32x1xf32>
    %14 = arith.divf %12, %13 : vector<32x1xf32>
    %15 = vector.broadcast %7 : vector<32x1xf32> to vector<32x32xf32>
    %16 = arith.subf %1, %15 : vector<32x32xf32>
    %cst_8 = arith.constant 9.99999974E-6 : f32
    %17 = vector.broadcast %cst_8 : f32 to vector<32x1xf32>
    %18 = arith.addf %14, %17 : vector<32x1xf32>
    %19 = math.rsqrt %18 : vector<32x1xf32>
    %20 = vector.broadcast %19 : vector<32x1xf32> to vector<32x32xf32>
    %21 = arith.mulf %16, %20 : vector<32x32xf32>
    %22 = vector.broadcast %2 : vector<1x32xf32> to vector<32x32xf32>
    %23 = arith.mulf %21, %22 : vector<32x32xf32>
    %24 = vector.broadcast %3 : vector<1x32xf32> to vector<32x32xf32>
    %25 = arith.addf %23, %24 : vector<32x32xf32>
    %26 = arith.truncf %25 : vector<32x32xf32> to vector<32x32xbf16>
    %c0_9 = arith.constant 0 : index
    %c0_10 = arith.constant 0 : index
    %27 = vector.load %arg4[%c0_9, %c0_10] : memref<32x64xbf16, #tpu.memory_space<vmem>>, vector<32x64xbf16>
    %cst_11 = arith.constant dense<0.000000e+00> : vector<32x64xf32>
    %28 = tpu.matmul %26, %27, %cst_11 {dimension_numbers = #tpu.dot_dimension_numbers<[1], [0], [0], [1], [0, 0, 1, 1], [], []>} : vector<32x32xbf16>, vector<32x64xbf16>, vector<32x64xf32> -> vector<32x64xf32>
    %c0_12 = arith.constant 0 : index
    %c0_13 = arith.constant 0 : index
    %29 = vector.load %arg5[%c0_12, %c0_13] : memref<1x64xf32, #tpu.memory_space<vmem>>, vector<1x64xf32>
    %30 = vector.broadcast %29 : vector<1x64xf32> to vector<32x64xf32>
    %31 = arith.addf %28, %30 : vector<32x64xf32>
    %cst_14 = arith.constant 0.000000e+00 : f32
    %32 = vector.broadcast %cst_14 : f32 to vector<32x64xf32>
    %33 = arith.maximumf %31, %32 : vector<32x64xf32>
    %34 = arith.truncf %33 : vector<32x64xf32> to vector<32x64xbf16>
    %c0_15 = arith.constant 0 : index
    %c0_16 = arith.constant 0 : index
    %35 = vector.load %arg6[%c0_15, %c0_16] : memref<64x32xbf16, #tpu.memory_space<vmem>>, vector<64x32xbf16>
    %cst_17 = arith.constant dense<0.000000e+00> : vector<32x32xf32>
    %36 = tpu.matmul %34, %35, %cst_17 {dimension_numbers = #tpu.dot_dimension_numbers<[1], [0], [0], [1], [0, 0, 1, 1], [], []>} : vector<32x64xbf16>, vector<64x32xbf16>, vector<32x32xf32> -> vector<32x32xf32>
    %c0_18 = arith.constant 0 : index
    %c0_19 = arith.constant 0 : index
    %37 = vector.load %arg7[%c0_18, %c0_19] : memref<1x32xf32, #tpu.memory_space<vmem>>, vector<1x32xf32>
    %38 = vector.broadcast %37 : vector<1x32xf32> to vector<32x32xf32>
    %39 = arith.addf %36, %38 : vector<32x32xf32>
    %40 = arith.addf %1, %39 : vector<32x32xf32>
    %c0_20 = arith.constant 0 : index
    %c0_21 = arith.constant 0 : index
    %41 = vector.load %arg8[%c0_20, %c0_21] : memref<1x32xf32, #tpu.memory_space<vmem>>, vector<1x32xf32>
    %c0_22 = arith.constant 0 : index
    %c0_23 = arith.constant 0 : index
    %42 = vector.load %arg9[%c0_22, %c0_23] : memref<1x32xf32, #tpu.memory_space<vmem>>, vector<1x32xf32>
    %cst_24 = arith.constant dense<0.000000e+00> : vector<32xf32>
    %43 = vector.multi_reduction <add>, %40, %cst_24 [1] : vector<32x32xf32> to vector<32xf32>
    %44 = vector.shape_cast %43 : vector<32xf32> to vector<32x1xf32>
    %cst_25 = arith.constant 3.200000e+01 : f32
    %45 = vector.broadcast %cst_25 : f32 to vector<32x1xf32>
    %46 = arith.divf %44, %45 : vector<32x1xf32>
    %47 = vector.broadcast %46 : vector<32x1xf32> to vector<32x32xf32>
    %48 = arith.subf %40, %47 : vector<32x32xf32>
    %49 = arith.mulf %48, %48 : vector<32x32xf32>
    %cst_26 = arith.constant dense<0.000000e+00> : vector<32xf32>
    %50 = vector.multi_reduction <add>, %49, %cst_26 [1] : vector<32x32xf32> to vector<32xf32>
    %51 = vector.shape_cast %50 : vector<32xf32> to vector<32x1xf32>
    %cst_27 = arith.constant 3.200000e+01 : f32
    %52 = vector.broadcast %cst_27 : f32 to vector<32x1xf32>
    %53 = arith.divf %51, %52 : vector<32x1xf32>
    %54 = vector.broadcast %46 : vector<32x1xf32> to vector<32x32xf32>
    %55 = arith.subf %40, %54 : vector<32x32xf32>
    %cst_28 = arith.constant 9.99999974E-6 : f32
    %56 = vector.broadcast %cst_28 : f32 to vector<32x1xf32>
    %57 = arith.addf %53, %56 : vector<32x1xf32>
    %58 = math.rsqrt %57 : vector<32x1xf32>
    %59 = vector.broadcast %58 : vector<32x1xf32> to vector<32x32xf32>
    %60 = arith.mulf %55, %59 : vector<32x32xf32>
    %61 = vector.broadcast %41 : vector<1x32xf32> to vector<32x32xf32>
    %62 = arith.mulf %60, %61 : vector<32x32xf32>
    %63 = vector.broadcast %42 : vector<1x32xf32> to vector<32x32xf32>
    %64 = arith.addf %62, %63 : vector<32x32xf32>
    %65 = arith.truncf %64 : vector<32x32xf32> to vector<32x32xbf16>
    %c0_29 = arith.constant 0 : index
    %c0_30 = arith.constant 0 : index
    %66 = vector.load %arg10[%c0_29, %c0_30] : memref<32x32xbf16, #tpu.memory_space<vmem>>, vector<32x32xbf16>
    tpu.vector_store %arg10[%c0_29, %c0_30], %65 {strides = array<i32>} : memref<32x32xbf16, #tpu.memory_space<vmem>>, vector<32x32xbf16>,
    return
  }
  func.func @transform_0(%arg0: i32) -> (i32, i32) {
    %c0_i32 = arith.constant 0 : i32
    %c0_i32_0 = arith.constant 0 : i32
    return %arg0, %c0_i32 : i32, i32
  }
  func.func @transform_1(%arg0: i32) -> (i32, i32) {
    %c0_i32 = arith.constant 0 : i32
    %c0_i32_0 = arith.constant 0 : i32
    %c0_i32_1 = arith.constant 0 : i32
    return %c0_i32, %c0_i32_0 : i32, i32
  }
  func.func @transform_2(%arg0: i32) -> (i32, i32) {
    %c0_i32 = arith.constant 0 : i32
    %c0_i32_0 = arith.constant 0 : i32
    %c0_i32_1 = arith.constant 0 : i32
    return %c0_i32, %c0_i32_0 : i32, i32
  }
  func.func @transform_3(%arg0: i32) -> (i32, i32) {
    %c0_i32 = arith.constant 0 : i32
    %c0_i32_0 = arith.constant 0 : i32
    %c0_i32_1 = arith.constant 0 : i32
    return %c0_i32, %c0_i32_0 : i32, i32
  }
  func.func @transform_4(%arg0: i32) -> (i32, i32) {
    %c0_i32 = arith.constant 0 : i32
    %c0_i32_0 = arith.constant 0 : i32
    %c0_i32_1 = arith.constant 0 : i32
    return %c0_i32, %c0_i32_0 : i32, i32
  }
  func.func @transform_5(%arg0: i32) -> (i32, i32) {
    %c0_i32 = arith.constant 0 : i32
    %c0_i32_0 = arith.constant 0 : i32
    %c0_i32_1 = arith.constant 0 : i32
    return %c0_i32, %c0_i32_0 : i32, i32
  }
  func.func @transform_6(%arg0: i32) -> (i32, i32) {
    %c0_i32 = arith.constant 0 : i32
    %c0_i32_0 = arith.constant 0 : i32
    %c0_i32_1 = arith.constant 0 : i32
    return %c0_i32, %c0_i32_0 : i32, i32
  }
  func.func @transform_7(%arg0: i32) -> (i32, i32) {
    %c0_i32 = arith.constant 0 : i32
    %c0_i32_0 = arith.constant 0 : i32
    %c0_i32_1 = arith.constant 0 : i32
    return %c0_i32, %c0_i32_0 : i32, i32
  }
  func.func @transform_8(%arg0: i32) -> (i32, i32) {
    %c0_i32 = arith.constant 0 : i32
    %c0_i32_0 = arith.constant 0 : i32
    %c0_i32_1 = arith.constant 0 : i32
    return %c0_i32, %c0_i32_0 : i32, i32
  }
  func.func @transform_9(%arg0: i32) -> (i32, i32) {
    %c0_i32 = arith.constant 0 : i32
    %c0_i32_0 = arith.constant 0 : i32
    return %arg0, %c0_i32 : i32, i32
  }
}

module attributes {stable_mosaic.version = 11 : i64} {
  func.func @_ctc_emit_kernel(%arg0: i32, %arg1: i32, %arg2: memref<1x16x32xbf16, #tpu.memory_space<vmem>>, %arg3: memref<32x16xbf16, #tpu.memory_space<vmem>>, %arg4: memref<1x16xf32, #tpu.memory_space<vmem>>, %arg5: memref<1x1x13xi32, #tpu.memory_space<vmem>>, %arg6: memref<1x16x13xf32, #tpu.memory_space<vmem>>) attributes {dimension_semantics = [#tpu.dimension_semantics<parallel>, #tpu.dimension_semantics<parallel>], iteration_bounds = array<i64: 2, 1>, scalar_prefetch = 0 : i64, scratch_operands = 0 : i64, tpu.core_type = #tpu.core_type<tc>, window_params = [{transform_indices = @transform_0, window_bounds = array<i64: 1, 16, 32>}, {pipeline_mode = #tpu.pipeline_mode<synchronous>, transform_indices = @transform_1, window_bounds = array<i64: 32, 16>}, {pipeline_mode = #tpu.pipeline_mode<synchronous>, transform_indices = @transform_2, window_bounds = array<i64: 1, 16>}, {transform_indices = @transform_3, window_bounds = array<i64: 1, 1, 13>}, {transform_indices = @transform_4, window_bounds = array<i64: 1, 16, 13>}]} {
    %c0 = arith.constant 0 : index
    %c0_0 = arith.constant 0 : index
    %c0_1 = arith.constant 0 : index
    %0 = vector.load %arg2[%c0, %c0_0, %c0_1] : memref<1x16x32xbf16, #tpu.memory_space<vmem>>, vector<1x16x32xbf16>
    %1 = vector.shape_cast %0 : vector<1x16x32xbf16> to vector<16x32xbf16>
    %c0_2 = arith.constant 0 : index
    %c0_3 = arith.constant 0 : index
    %2 = vector.load %arg3[%c0_2, %c0_3] : memref<32x16xbf16, #tpu.memory_space<vmem>>, vector<32x16xbf16>
    %cst = arith.constant dense<0.000000e+00> : vector<16x16xf32>
    %3 = tpu.matmul %1, %2, %cst {dimension_numbers = #tpu.dot_dimension_numbers<[1], [0], [0], [1], [0, 0, 1, 1], [], []>} : vector<16x32xbf16>, vector<32x16xbf16>, vector<16x16xf32> -> vector<16x16xf32>
    %c0_4 = arith.constant 0 : index
    %c0_5 = arith.constant 0 : index
    %4 = vector.load %arg4[%c0_4, %c0_5] : memref<1x16xf32, #tpu.memory_space<vmem>>, vector<1x16xf32>
    %5 = vector.broadcast %4 : vector<1x16xf32> to vector<16x16xf32>
    %6 = arith.addf %3, %5 : vector<16x16xf32>
    %cst_6 = arith.constant dense<0xFF800000> : vector<16xf32>
    %7 = vector.multi_reduction <maximumf>, %6, %cst_6 [1] : vector<16x16xf32> to vector<16xf32>
    %8 = vector.shape_cast %7 : vector<16xf32> to vector<16x1xf32>
    %9 = vector.broadcast %8 : vector<16x1xf32> to vector<16x16xf32>
    %10 = arith.subf %6, %9 : vector<16x16xf32>
    %11 = math.exp %10 : vector<16x16xf32>
    %cst_7 = arith.constant dense<0.000000e+00> : vector<16xf32>
    %12 = vector.multi_reduction <add>, %11, %cst_7 [1] : vector<16x16xf32> to vector<16xf32>
    %13 = vector.shape_cast %12 : vector<16xf32> to vector<16x1xf32>
    %14 = math.log %13 : vector<16x1xf32>
    %15 = arith.addf %8, %14 : vector<16x1xf32>
    %16 = tpu.iota {dimensions = array<i32: 0>} : vector<16x13xi32>
    %c0_8 = arith.constant 0 : index
    %c0_9 = arith.constant 0 : index
    %c0_10 = arith.constant 0 : index
    %17 = vector.load %arg5[%c0_8, %c0_9, %c0_10] : memref<1x1x13xi32, #tpu.memory_space<vmem>>, vector<1x1x13xi32>
    %18 = vector.shape_cast %17 : vector<1x1x13xi32> to vector<1x13xi32>
    %19 = vector.broadcast %18 : vector<1x13xi32> to vector<16x13xi32>
    %20 = arith.cmpi eq, %16, %19 : vector<16x13xi32>
    %21 = arith.extui %20 : vector<16x13xi1> to vector<16x13xi32>
    %22 = arith.sitofp %21 : vector<16x13xi32> to vector<16x13xf32>
    %cst_11 = arith.constant dense<0.000000e+00> : vector<16x13xf32>
    %23 = tpu.matmul %6, %22, %cst_11 {dimension_numbers = #tpu.dot_dimension_numbers<[1], [0], [0], [1], [0, 0, 1, 1], [], []>} : vector<16x16xf32>, vector<16x13xf32>, vector<16x13xf32> -> vector<16x13xf32>
    %24 = vector.broadcast %15 : vector<16x1xf32> to vector<16x13xf32>
    %25 = arith.subf %23, %24 : vector<16x13xf32>
    %c0_12 = arith.constant 0 : index
    %c0_13 = arith.constant 0 : index
    %c0_14 = arith.constant 0 : index
    %26 = vector.load %arg6[%c0_12, %c0_13, %c0_14] : memref<1x16x13xf32, #tpu.memory_space<vmem>>, vector<1x16x13xf32>
    %27 = vector.shape_cast %26 : vector<1x16x13xf32> to vector<16x13xf32>
    %28 = vector.shape_cast %25 : vector<16x13xf32> to vector<1x16x13xf32>
    tpu.vector_store %arg6[%c0_12, %c0_13, %c0_14], %28 {strides = array<i32>} : memref<1x16x13xf32, #tpu.memory_space<vmem>>, vector<1x16x13xf32>,
    return
  }
  func.func @transform_0(%arg0: i32, %arg1: i32) -> (i32, i32, i32) {
    %c0_i32 = arith.constant 0 : i32
    %c0_i32_0 = arith.constant 0 : i32
    return %arg0, %arg1, %c0_i32 : i32, i32, i32
  }
  func.func @transform_1(%arg0: i32, %arg1: i32) -> (i32, i32) {
    %c0_i32 = arith.constant 0 : i32
    %c0_i32_0 = arith.constant 0 : i32
    %c0_i32_1 = arith.constant 0 : i32
    return %c0_i32, %c0_i32_0 : i32, i32
  }
  func.func @transform_2(%arg0: i32, %arg1: i32) -> (i32, i32) {
    %c0_i32 = arith.constant 0 : i32
    %c0_i32_0 = arith.constant 0 : i32
    %c0_i32_1 = arith.constant 0 : i32
    return %c0_i32, %c0_i32_0 : i32, i32
  }
  func.func @transform_3(%arg0: i32, %arg1: i32) -> (i32, i32, i32) {
    %c0_i32 = arith.constant 0 : i32
    %c0_i32_0 = arith.constant 0 : i32
    %c0_i32_1 = arith.constant 0 : i32
    return %arg0, %c0_i32, %c0_i32_0 : i32, i32, i32
  }
  func.func @transform_4(%arg0: i32, %arg1: i32) -> (i32, i32, i32) {
    %c0_i32 = arith.constant 0 : i32
    %c0_i32_0 = arith.constant 0 : i32
    return %arg0, %arg1, %c0_i32 : i32, i32, i32
  }
}

module attributes {stable_mosaic.version = 11 : i64} {
  func.func @_predictor_alpha_kernel(%arg0: i32, %arg1: memref<2xi32, #tpu.memory_space<smem>>, %arg2: memref<1x16x32xbf16, #tpu.memory_space<vmem>>, %arg3: memref<3x32xf32, #tpu.memory_space<vmem>>, %arg4: memref<1x32xf32, #tpu.memory_space<vmem>>, %arg5: memref<1x32xf32, #tpu.memory_space<vmem>>, %arg6: memref<1x1xf32, #tpu.memory_space<vmem>>, %arg7: memref<1x1x16xf32, #tpu.memory_space<vmem>>) attributes {dimension_semantics = [#tpu.dimension_semantics<parallel>], iteration_bounds = array<i64: 2>, scalar_prefetch = 1 : i64, scratch_operands = 0 : i64, tpu.core_type = #tpu.core_type<tc>, window_params = [{transform_indices = @transform_0, window_bounds = array<i64: 1, 16, 32>}, {pipeline_mode = #tpu.pipeline_mode<synchronous>, transform_indices = @transform_1, window_bounds = array<i64: 3, 32>}, {pipeline_mode = #tpu.pipeline_mode<synchronous>, transform_indices = @transform_2, window_bounds = array<i64: 1, 32>}, {pipeline_mode = #tpu.pipeline_mode<synchronous>, transform_indices = @transform_3, window_bounds = array<i64: 1, 32>}, {pipeline_mode = #tpu.pipeline_mode<synchronous>, transform_indices = @transform_4, window_bounds = array<i64: 1, 1>}, {transform_indices = @transform_5, window_bounds = array<i64: 1, 1, 16>}]} {
    %c0 = arith.constant 0 : index
    %c0_0 = arith.constant 0 : index
    %c0_1 = arith.constant 0 : index
    %0 = vector.load %arg2[%c0, %c0_0, %c0_1] : memref<1x16x32xbf16, #tpu.memory_space<vmem>>, vector<1x16x32xbf16>
    %1 = vector.shape_cast %0 : vector<1x16x32xbf16> to vector<16x32xbf16>
    %2 = arith.extf %1 : vector<16x32xbf16> to vector<16x32xf32>
    %3 = tpu.iota {dimensions = array<i32: 0>} : vector<16x32xi32>
    %c0_i32 = arith.constant 0 : i32
    %4 = vector.broadcast %c0_i32 : i32 to vector<16x32xi32>
    %5 = arith.cmpi eq, %3, %4 : vector<16x32xi32>
    %c1_i32 = arith.constant 1 : i32
    %6 = tpu.dynamic_rotate %2 by %c1_i32 dim 0 : vector<16x32xf32>, i32 -> vector<16x32xf32>
    %cst = arith.constant 0.000000e+00 : f32
    %7 = vector.broadcast %cst : f32 to vector<16x32xf32>
    %8 = arith.select %5, %7, %6 : vector<16x32xi1>, vector<16x32xf32>
    %c15_i32 = arith.constant 15 : i32
    %9 = vector.broadcast %c15_i32 : i32 to vector<16x32xi32>
    %10 = arith.cmpi eq, %3, %9 : vector<16x32xi32>
    %c15_i32_2 = arith.constant 15 : i32
    %11 = tpu.dynamic_rotate %2 by %c15_i32_2 dim 0 : vector<16x32xf32>, i32 -> vector<16x32xf32>
    %cst_3 = arith.constant 0.000000e+00 : f32
    %12 = vector.broadcast %cst_3 : f32 to vector<16x32xf32>
    %13 = arith.select %10, %12, %11 : vector<16x32xi1>, vector<16x32xf32>
    %c0_4 = arith.constant 0 : index
    %c0_5 = arith.constant 0 : index
    %14 = vector.load %arg4[%c0_4, %c0_5] : memref<1x32xf32, #tpu.memory_space<vmem>>, vector<1x32xf32>
    %c0_6 = arith.constant 0 : index
    %c0_7 = arith.constant 0 : index
    %15 = vector.load %arg3[%c0_6, %c0_7] : memref<3x32xf32, #tpu.memory_space<vmem>>, vector<1x32xf32>
    %16 = vector.broadcast %15 : vector<1x32xf32> to vector<16x32xf32>
    %17 = arith.mulf %16, %8 : vector<16x32xf32>
    %18 = vector.broadcast %14 : vector<1x32xf32> to vector<16x32xf32>
    %19 = arith.addf %18, %17 : vector<16x32xf32>
    %c1 = arith.constant 1 : index
    %c0_8 = arith.constant 0 : index
    %20 = vector.load %arg3[%c1, %c0_8] : memref<3x32xf32, #tpu.memory_space<vmem>>, vector<1x32xf32>
    %21 = vector.broadcast %20 : vector<1x32xf32> to vector<16x32xf32>
    %22 = arith.mulf %21, %2 : vector<16x32xf32>
    %23 = arith.addf %19, %22 : vector<16x32xf32>
    %c2 = arith.constant 2 : index
    %c0_9 = arith.constant 0 : index
    %24 = vector.load %arg3[%c2, %c0_9] : memref<3x32xf32, #tpu.memory_space<vmem>>, vector<1x32xf32>
    %25 = vector.broadcast %24 : vector<1x32xf32> to vector<16x32xf32>
    %26 = arith.mulf %25, %13 : vector<16x32xf32>
    %27 = arith.addf %23, %26 : vector<16x32xf32>
    %28 = arith.addf %2, %27 : vector<16x32xf32>
    %cst_10 = arith.constant 0.000000e+00 : f32
    %29 = vector.broadcast %cst_10 : f32 to vector<16x32xf32>
    %30 = arith.maximumf %28, %29 : vector<16x32xf32>
    %c0_11 = arith.constant 0 : index
    %c0_12 = arith.constant 0 : index
    %31 = vector.load %arg5[%c0_11, %c0_12] : memref<1x32xf32, #tpu.memory_space<vmem>>, vector<1x32xf32>
    %cst_13 = arith.constant dense<0.000000e+00> : vector<1x16xf32>
    %32 = tpu.matmul %31, %30, %cst_13 {dimension_numbers = #tpu.dot_dimension_numbers<[1], [1], [0], [0], [0, 0, 1, 0], [], []>} : vector<1x32xf32>, vector<16x32xf32>, vector<1x16xf32> -> vector<1x16xf32>
    %c0_14 = arith.constant 0 : index
    %c0_15 = arith.constant 0 : index
    %33 = vector.load %arg6[%c0_14, %c0_15] : memref<1x1xf32, #tpu.memory_space<vmem>>, vector<1x1xf32>
    %34 = vector.broadcast %33 : vector<1x1xf32> to vector<1x16xf32>
    %35 = arith.addf %32, %34 : vector<1x16xf32>
    %36 = arith.negf %35 : vector<1x16xf32>
    %37 = math.exp %36 : vector<1x16xf32>
    %cst_16 = arith.constant 1.000000e+00 : f32
    %38 = vector.broadcast %cst_16 : f32 to vector<1x16xf32>
    %39 = arith.addf %38, %37 : vector<1x16xf32>
    %40 = arith.divf %38, %39 : vector<1x16xf32>
    %cst_17 = arith.constant 1.000000e+00 : f32
    %41 = vector.broadcast %cst_17 : f32 to vector<1x16xf32>
    %42 = arith.mulf %40, %41 : vector<1x16xf32>
    %cst_18 = arith.constant 0.000000e+00 : f32
    %43 = vector.broadcast %cst_18 : f32 to vector<1x16xf32>
    %44 = arith.subf %42, %43 : vector<1x16xf32>
    %cst_19 = arith.constant 0.000000e+00 : f32
    %45 = vector.broadcast %cst_19 : f32 to vector<1x16xf32>
    %46 = arith.maximumf %44, %45 : vector<1x16xf32>
    %47 = tpu.iota {dimensions = array<i32: 1>} : vector<1x16xi32>
    %48 = arith.index_cast %arg0 : i32 to index
    %49 = memref.load %arg1[%48] : memref<2xi32, #tpu.memory_space<smem>>
    %50 = vector.broadcast %49 : i32 to vector<1x16xi32>
    %51 = arith.cmpi slt, %47, %50 : vector<1x16xi32>
    %cst_20 = arith.constant 0.000000e+00 : f32
    %52 = vector.broadcast %cst_20 : f32 to vector<1x16xf32>
    %53 = arith.select %51, %46, %52 : vector<1x16xi1>, vector<1x16xf32>
    %c0_21 = arith.constant 0 : index
    %c0_22 = arith.constant 0 : index
    %c0_23 = arith.constant 0 : index
    %54 = vector.load %arg7[%c0_21, %c0_22, %c0_23] : memref<1x1x16xf32, #tpu.memory_space<vmem>>, vector<1x1x16xf32>
    %55 = vector.shape_cast %54 : vector<1x1x16xf32> to vector<1x16xf32>
    %56 = vector.shape_cast %53 : vector<1x16xf32> to vector<1x1x16xf32>
    tpu.vector_store %arg7[%c0_21, %c0_22, %c0_23], %56 {strides = array<i32>} : memref<1x1x16xf32, #tpu.memory_space<vmem>>, vector<1x1x16xf32>,
    return
  }
  func.func @transform_0(%arg0: i32, %arg1: memref<2xi32, #tpu.memory_space<smem>>) -> (i32, i32, i32) {
    %c0_i32 = arith.constant 0 : i32
    %c0_i32_0 = arith.constant 0 : i32
    %c0_i32_1 = arith.constant 0 : i32
    return %arg0, %c0_i32, %c0_i32_0 : i32, i32, i32
  }
  func.func @transform_1(%arg0: i32, %arg1: memref<2xi32, #tpu.memory_space<smem>>) -> (i32, i32) {
    %c0_i32 = arith.constant 0 : i32
    %c0_i32_0 = arith.constant 0 : i32
    %c0_i32_1 = arith.constant 0 : i32
    return %c0_i32, %c0_i32_0 : i32, i32
  }
  func.func @transform_2(%arg0: i32, %arg1: memref<2xi32, #tpu.memory_space<smem>>) -> (i32, i32) {
    %c0_i32 = arith.constant 0 : i32
    %c0_i32_0 = arith.constant 0 : i32
    %c0_i32_1 = arith.constant 0 : i32
    return %c0_i32, %c0_i32_0 : i32, i32
  }
  func.func @transform_3(%arg0: i32, %arg1: memref<2xi32, #tpu.memory_space<smem>>) -> (i32, i32) {
    %c0_i32 = arith.constant 0 : i32
    %c0_i32_0 = arith.constant 0 : i32
    %c0_i32_1 = arith.constant 0 : i32
    return %c0_i32, %c0_i32_0 : i32, i32
  }
  func.func @transform_4(%arg0: i32, %arg1: memref<2xi32, #tpu.memory_space<smem>>) -> (i32, i32) {
    %c0_i32 = arith.constant 0 : i32
    %c0_i32_0 = arith.constant 0 : i32
    %c0_i32_1 = arith.constant 0 : i32
    return %c0_i32, %c0_i32_0 : i32, i32
  }
  func.func @transform_5(%arg0: i32, %arg1: memref<2xi32, #tpu.memory_space<smem>>) -> (i32, i32, i32) {
    %c0_i32 = arith.constant 0 : i32
    %c0_i32_0 = arith.constant 0 : i32
    %c0_i32_1 = arith.constant 0 : i32
    return %arg0, %c0_i32, %c0_i32_0 : i32, i32, i32
  }
}

module attributes {stable_mosaic.version = 11 : i64} {
  func.func @_ln_linear_kernel(%arg0: i32, %arg1: memref<12x32xbf16, #tpu.memory_space<vmem>>, %arg2: memref<1x32xf32, #tpu.memory_space<vmem>>, %arg3: memref<1x32xf32, #tpu.memory_space<vmem>>, %arg4: memref<32x96xbf16, #tpu.memory_space<vmem>>, %arg5: memref<1x96xf32, #tpu.memory_space<vmem>>, %arg6: memref<12x96xbf16, #tpu.memory_space<vmem>>) attributes {dimension_semantics = [#tpu.dimension_semantics<parallel>], iteration_bounds = array<i64: 1>, scalar_prefetch = 0 : i64, scratch_operands = 0 : i64, tpu.core_type = #tpu.core_type<tc>, window_params = [{transform_indices = @transform_0, window_bounds = array<i64: 12, 32>}, {pipeline_mode = #tpu.pipeline_mode<synchronous>, transform_indices = @transform_1, window_bounds = array<i64: 1, 32>}, {pipeline_mode = #tpu.pipeline_mode<synchronous>, transform_indices = @transform_2, window_bounds = array<i64: 1, 32>}, {pipeline_mode = #tpu.pipeline_mode<synchronous>, transform_indices = @transform_3, window_bounds = array<i64: 32, 96>}, {pipeline_mode = #tpu.pipeline_mode<synchronous>, transform_indices = @transform_4, window_bounds = array<i64: 1, 96>}, {transform_indices = @transform_5, window_bounds = array<i64: 12, 96>}]} {
    %c0 = arith.constant 0 : index
    %c0_0 = arith.constant 0 : index
    %0 = vector.load %arg1[%c0, %c0_0] : memref<12x32xbf16, #tpu.memory_space<vmem>>, vector<12x32xbf16>
    %1 = arith.extf %0 : vector<12x32xbf16> to vector<12x32xf32>
    %c0_1 = arith.constant 0 : index
    %c0_2 = arith.constant 0 : index
    %2 = vector.load %arg2[%c0_1, %c0_2] : memref<1x32xf32, #tpu.memory_space<vmem>>, vector<1x32xf32>
    %c0_3 = arith.constant 0 : index
    %c0_4 = arith.constant 0 : index
    %3 = vector.load %arg3[%c0_3, %c0_4] : memref<1x32xf32, #tpu.memory_space<vmem>>, vector<1x32xf32>
    %cst = arith.constant dense<0.000000e+00> : vector<12xf32>
    %4 = vector.multi_reduction <add>, %1, %cst [1] : vector<12x32xf32> to vector<12xf32>
    %5 = vector.shape_cast %4 : vector<12xf32> to vector<12x1xf32>
    %cst_5 = arith.constant 3.200000e+01 : f32
    %6 = vector.broadcast %cst_5 : f32 to vector<12x1xf32>
    %7 = arith.divf %5, %6 : vector<12x1xf32>
    %8 = vector.broadcast %7 : vector<12x1xf32> to vector<12x32xf32>
    %9 = arith.subf %1, %8 : vector<12x32xf32>
    %10 = arith.mulf %9, %9 : vector<12x32xf32>
    %cst_6 = arith.constant dense<0.000000e+00> : vector<12xf32>
    %11 = vector.multi_reduction <add>, %10, %cst_6 [1] : vector<12x32xf32> to vector<12xf32>
    %12 = vector.shape_cast %11 : vector<12xf32> to vector<12x1xf32>
    %cst_7 = arith.constant 3.200000e+01 : f32
    %13 = vector.broadcast %cst_7 : f32 to vector<12x1xf32>
    %14 = arith.divf %12, %13 : vector<12x1xf32>
    %15 = vector.broadcast %7 : vector<12x1xf32> to vector<12x32xf32>
    %16 = arith.subf %1, %15 : vector<12x32xf32>
    %cst_8 = arith.constant 9.99999974E-6 : f32
    %17 = vector.broadcast %cst_8 : f32 to vector<12x1xf32>
    %18 = arith.addf %14, %17 : vector<12x1xf32>
    %19 = math.rsqrt %18 : vector<12x1xf32>
    %20 = vector.broadcast %19 : vector<12x1xf32> to vector<12x32xf32>
    %21 = arith.mulf %16, %20 : vector<12x32xf32>
    %22 = vector.broadcast %2 : vector<1x32xf32> to vector<12x32xf32>
    %23 = arith.mulf %21, %22 : vector<12x32xf32>
    %24 = vector.broadcast %3 : vector<1x32xf32> to vector<12x32xf32>
    %25 = arith.addf %23, %24 : vector<12x32xf32>
    %26 = arith.truncf %25 : vector<12x32xf32> to vector<12x32xbf16>
    %c0_9 = arith.constant 0 : index
    %c0_10 = arith.constant 0 : index
    %27 = vector.load %arg4[%c0_9, %c0_10] : memref<32x96xbf16, #tpu.memory_space<vmem>>, vector<32x96xbf16>
    %cst_11 = arith.constant dense<0.000000e+00> : vector<12x96xf32>
    %28 = tpu.matmul %26, %27, %cst_11 {dimension_numbers = #tpu.dot_dimension_numbers<[1], [0], [0], [1], [0, 0, 1, 1], [], []>} : vector<12x32xbf16>, vector<32x96xbf16>, vector<12x96xf32> -> vector<12x96xf32>
    %c0_12 = arith.constant 0 : index
    %c0_13 = arith.constant 0 : index
    %29 = vector.load %arg5[%c0_12, %c0_13] : memref<1x96xf32, #tpu.memory_space<vmem>>, vector<1x96xf32>
    %30 = vector.broadcast %29 : vector<1x96xf32> to vector<12x96xf32>
    %31 = arith.addf %28, %30 : vector<12x96xf32>
    %32 = arith.truncf %31 : vector<12x96xf32> to vector<12x96xbf16>
    %c0_14 = arith.constant 0 : index
    %c0_15 = arith.constant 0 : index
    %33 = vector.load %arg6[%c0_14, %c0_15] : memref<12x96xbf16, #tpu.memory_space<vmem>>, vector<12x96xbf16>
    tpu.vector_store %arg6[%c0_14, %c0_15], %32 {strides = array<i32>} : memref<12x96xbf16, #tpu.memory_space<vmem>>, vector<12x96xbf16>,
    return
  }
  func.func @transform_0(%arg0: i32) -> (i32, i32) {
    %c0_i32 = arith.constant 0 : i32
    %c0_i32_0 = arith.constant 0 : i32
    return %arg0, %c0_i32 : i32, i32
  }
  func.func @transform_1(%arg0: i32) -> (i32, i32) {
    %c0_i32 = arith.constant 0 : i32
    %c0_i32_0 = arith.constant 0 : i32
    %c0_i32_1 = arith.constant 0 : i32
    return %c0_i32, %c0_i32_0 : i32, i32
  }
  func.func @transform_2(%arg0: i32) -> (i32, i32) {
    %c0_i32 = arith.constant 0 : i32
    %c0_i32_0 = arith.constant 0 : i32
    %c0_i32_1 = arith.constant 0 : i32
    return %c0_i32, %c0_i32_0 : i32, i32
  }
  func.func @transform_3(%arg0: i32) -> (i32, i32) {
    %c0_i32 = arith.constant 0 : i32
    %c0_i32_0 = arith.constant 0 : i32
    %c0_i32_1 = arith.constant 0 : i32
    return %c0_i32, %c0_i32_0 : i32, i32
  }
  func.func @transform_4(%arg0: i32) -> (i32, i32) {
    %c0_i32 = arith.constant 0 : i32
    %c0_i32_0 = arith.constant 0 : i32
    %c0_i32_1 = arith.constant 0 : i32
    return %c0_i32, %c0_i32_0 : i32, i32
  }
  func.func @transform_5(%arg0: i32) -> (i32, i32) {
    %c0_i32 = arith.constant 0 : i32
    %c0_i32_0 = arith.constant 0 : i32
    return %arg0, %c0_i32 : i32, i32
  }
}

module attributes {stable_mosaic.version = 11 : i64} {
  func.func @_cif_gather_kernel(%arg0: i32, %arg1: memref<1x1x16xi32, #tpu.memory_space<vmem>>, %arg2: memref<1x1x16xf32, #tpu.memory_space<vmem>>, %arg3: memref<1x16x32xf32, #tpu.memory_space<vmem>>, %arg4: memref<1x6x32xf32, #tpu.memory_space<vmem>>) attributes {dimension_semantics = [#tpu.dimension_semantics<parallel>], iteration_bounds = array<i64: 2>, scalar_prefetch = 0 : i64, scratch_operands = 0 : i64, tpu.core_type = #tpu.core_type<tc>, window_params = [{transform_indices = @transform_0, window_bounds = array<i64: 1, 1, 16>}, {transform_indices = @transform_1, window_bounds = array<i64: 1, 1, 16>}, {transform_indices = @transform_2, window_bounds = array<i64: 1, 16, 32>}, {transform_indices = @transform_3, window_bounds = array<i64: 1, 6, 32>}]} {
    %c0 = arith.constant 0 : index
    %c0_0 = arith.constant 0 : index
    %c0_1 = arith.constant 0 : index
    %0 = vector.load %arg1[%c0, %c0_0, %c0_1] : memref<1x1x16xi32, #tpu.memory_space<vmem>>, vector<1x1x16xi32>
    %1 = vector.shape_cast %0 : vector<1x1x16xi32> to vector<1x16xi32>
    %c0_2 = arith.constant 0 : index
    %c0_3 = arith.constant 0 : index
    %c0_4 = arith.constant 0 : index
    %2 = vector.load %arg2[%c0_2, %c0_3, %c0_4] : memref<1x1x16xf32, #tpu.memory_space<vmem>>, vector<1x1x16xf32>
    %3 = vector.shape_cast %2 : vector<1x1x16xf32> to vector<1x16xf32>
    %4 = tpu.iota {dimensions = array<i32: 0>} : vector<6x16xi32>
    %5 = vector.broadcast %1 : vector<1x16xi32> to vector<6x16xi32>
    %6 = arith.cmpi eq, %4, %5 : vector<6x16xi32>
    %cst = arith.constant 5.000000e-01 : f32
    %7 = vector.broadcast %cst : f32 to vector<1x16xf32>
    %8 = arith.cmpf ogt, %3, %7 : vector<1x16xf32>
    %9 = vector.broadcast %8 : vector<1x16xi1> to vector<6x16xi1>
    %10 = arith.andi %6, %9 : vector<6x16xi1>
    %cst_5 = arith.constant 1.000000e+00 : f32
    %cst_6 = arith.constant 0.000000e+00 : f32
    %11 = vector.broadcast %cst_5 : f32 to vector<6x16xf32>
    %12 = vector.broadcast %cst_6 : f32 to vector<6x16xf32>
    %13 = arith.select %10, %11, %12 : vector<6x16xi1>, vector<6x16xf32>
    %c0_7 = arith.constant 0 : index
    %c0_8 = arith.constant 0 : index
    %c0_9 = arith.constant 0 : index
    %14 = vector.load %arg3[%c0_7, %c0_8, %c0_9] : memref<1x16x32xf32, #tpu.memory_space<vmem>>, vector<1x16x32xf32>
    %15 = vector.shape_cast %14 : vector<1x16x32xf32> to vector<16x32xf32>
    %cst_10 = arith.constant dense<0.000000e+00> : vector<6x32xf32>
    %16 = tpu.matmul %13, %15, %cst_10 {dimension_numbers = #tpu.dot_dimension_numbers<[1], [0], [0], [1], [0, 0, 1, 1], [], []>} : vector<6x16xf32>, vector<16x32xf32>, vector<6x32xf32> -> vector<6x32xf32>
    %c0_11 = arith.constant 0 : index
    %c0_12 = arith.constant 0 : index
    %c0_13 = arith.constant 0 : index
    %17 = vector.load %arg4[%c0_11, %c0_12, %c0_13] : memref<1x6x32xf32, #tpu.memory_space<vmem>>, vector<1x6x32xf32>
    %18 = vector.shape_cast %17 : vector<1x6x32xf32> to vector<6x32xf32>
    %19 = vector.shape_cast %16 : vector<6x32xf32> to vector<1x6x32xf32>
    tpu.vector_store %arg4[%c0_11, %c0_12, %c0_13], %19 {strides = array<i32>} : memref<1x6x32xf32, #tpu.memory_space<vmem>>, vector<1x6x32xf32>,
    return
  }
  func.func @transform_0(%arg0: i32) -> (i32, i32, i32) {
    %c0_i32 = arith.constant 0 : i32
    %c0_i32_0 = arith.constant 0 : i32
    %c0_i32_1 = arith.constant 0 : i32
    return %arg0, %c0_i32, %c0_i32_0 : i32, i32, i32
  }
  func.func @transform_1(%arg0: i32) -> (i32, i32, i32) {
    %c0_i32 = arith.constant 0 : i32
    %c0_i32_0 = arith.constant 0 : i32
    %c0_i32_1 = arith.constant 0 : i32
    return %arg0, %c0_i32, %c0_i32_0 : i32, i32, i32
  }
  func.func @transform_2(%arg0: i32) -> (i32, i32, i32) {
    %c0_i32 = arith.constant 0 : i32
    %c0_i32_0 = arith.constant 0 : i32
    %c0_i32_1 = arith.constant 0 : i32
    return %arg0, %c0_i32, %c0_i32_0 : i32, i32, i32
  }
  func.func @transform_3(%arg0: i32) -> (i32, i32, i32) {
    %c0_i32 = arith.constant 0 : i32
    %c0_i32_0 = arith.constant 0 : i32
    %c0_i32_1 = arith.constant 0 : i32
    return %arg0, %c0_i32, %c0_i32_0 : i32, i32, i32
  }
}

module attributes {stable_mosaic.version = 11 : i64} {
  func.func @_mha_kernel(%arg0: i32, %arg1: i32, %arg2: memref<2xi32, #tpu.memory_space<smem>>, %arg3: memref<1x4x6x8xbf16, #tpu.memory_space<vmem>>, %arg4: memref<1x4x6x8xbf16, #tpu.memory_space<vmem>>, %arg5: memref<1x4x6x8xbf16, #tpu.memory_space<vmem>>, %arg6: memref<4x8x32xbf16, #tpu.memory_space<vmem>>, %arg7: memref<1x32xf32, #tpu.memory_space<vmem>>, %arg8: memref<1x6x32xbf16, #tpu.memory_space<vmem>>, %arg9: memref<1x6x32xbf16, #tpu.memory_space<vmem>>) attributes {dimension_semantics = [#tpu.dimension_semantics<parallel>, #tpu.dimension_semantics<parallel>], iteration_bounds = array<i64: 2, 1>, scalar_prefetch = 1 : i64, scratch_operands = 0 : i64, tpu.core_type = #tpu.core_type<tc>, window_params = [{transform_indices = @transform_0, window_bounds = array<i64: 1, 4, 6, 8>}, {transform_indices = @transform_1, window_bounds = array<i64: 1, 4, 6, 8>}, {transform_indices = @transform_2, window_bounds = array<i64: 1, 4, 6, 8>}, {pipeline_mode = #tpu.pipeline_mode<synchronous>, transform_indices = @transform_3, window_bounds = array<i64: 4, 8, 32>}, {pipeline_mode = #tpu.pipeline_mode<synchronous>, transform_indices = @transform_4, window_bounds = array<i64: 1, 32>}, {transform_indices = @transform_5, window_bounds = array<i64: 1, 6, 32>}, {transform_indices = @transform_6, window_bounds = array<i64: 1, 6, 32>}]} {
    %0 = arith.index_cast %arg0 : i32 to index
    %1 = memref.load %arg2[%0] : memref<2xi32, #tpu.memory_space<smem>>
    %c0 = arith.constant 0 : index
    %c0_0 = arith.constant 0 : index
    %c0_1 = arith.constant 0 : index
    %c0_2 = arith.constant 0 : index
    %2 = vector.load %arg3[%c0, %c0_0, %c0_1, %c0_2] : memref<1x4x6x8xbf16, #tpu.memory_space<vmem>>, vector<1x4x6x8xbf16>
    %3 = vector.shape_cast %2 : vector<1x4x6x8xbf16> to vector<4x6x8xbf16>
    %c0_3 = arith.constant 0 : index
    %c0_4 = arith.constant 0 : index
    %c0_5 = arith.constant 0 : index
    %c0_6 = arith.constant 0 : index
    %4 = vector.load %arg4[%c0_3, %c0_4, %c0_5, %c0_6] : memref<1x4x6x8xbf16, #tpu.memory_space<vmem>>, vector<1x4x6x8xbf16>
    %5 = vector.shape_cast %4 : vector<1x4x6x8xbf16> to vector<4x6x8xbf16>
    %c0_7 = arith.constant 0 : index
    %c0_8 = arith.constant 0 : index
    %c0_9 = arith.constant 0 : index
    %c0_10 = arith.constant 0 : index
    %6 = vector.load %arg5[%c0_7, %c0_8, %c0_9, %c0_10] : memref<1x4x6x8xbf16, #tpu.memory_space<vmem>>, vector<1x4x6x8xbf16>
    %7 = vector.shape_cast %6 : vector<1x4x6x8xbf16> to vector<4x6x8xbf16>
    %cst = arith.constant dense<0.000000e+00> : vector<4x6x6xf32>
    %8 = tpu.matmul %3, %5, %cst {dimension_numbers = #tpu.dot_dimension_numbers<[2], [2], [1], [1], [0, 0, 0, 1, 1, 1], [0], [0]>} : vector<4x6x8xbf16>, vector<4x6x8xbf16>, vector<4x6x6xf32> -> vector<4x6x6xf32>
    %cst_11 = arith.constant 0.353553385 : f32
    %9 = vector.broadcast %cst_11 : f32 to vector<4x6x6xf32>
    %10 = arith.mulf %8, %9 : vector<4x6x6xf32>
    %11 = tpu.iota {dimensions = array<i32: 2>} : vector<4x6x6xi32>
    %12 = vector.broadcast %1 : i32 to vector<4x6x6xi32>
    %13 = arith.cmpi slt, %11, %12 : vector<4x6x6xi32>
    %cst_12 = arith.constant -1.000000e+30 : f32
    %14 = vector.broadcast %cst_12 : f32 to vector<4x6x6xf32>
    %15 = arith.select %13, %10, %14 : vector<4x6x6xi1>, vector<4x6x6xf32>
    %cst_13 = arith.constant dense<0xFF800000> : vector<4x6xf32>
    %16 = vector.multi_reduction <maximumf>, %15, %cst_13 [2] : vector<4x6x6xf32> to vector<4x6xf32>
    %17 = vector.shape_cast %16 : vector<4x6xf32> to vector<4x6x1xf32>
    %18 = vector.broadcast %17 : vector<4x6x1xf32> to vector<4x6x6xf32>
    %19 = arith.subf %15, %18 : vector<4x6x6xf32>
    %20 = math.exp %19 : vector<4x6x6xf32>
    %cst_14 = arith.constant dense<0.000000e+00> : vector<4x6xf32>
    %21 = vector.multi_reduction <add>, %20, %cst_14 [2] : vector<4x6x6xf32> to vector<4x6xf32>
    %22 = vector.shape_cast %21 : vector<4x6xf32> to vector<4x6x1xf32>
    %cst_15 = arith.constant 1.000000e-30 : f32
    %23 = vector.broadcast %cst_15 : f32 to vector<4x6x1xf32>
    %24 = arith.maximumf %22, %23 : vector<4x6x1xf32>
    %25 = tpu.reciprocal %24 {approx = true} : vector<4x6x1xf32> -> vector<4x6x1xf32>
    %26 = vector.broadcast %25 : vector<4x6x1xf32> to vector<4x6x6xf32>
    %27 = arith.mulf %20, %26 : vector<4x6x6xf32>
    %28 = arith.truncf %27 : vector<4x6x6xf32> to vector<4x6x6xbf16>
    %cst_16 = arith.constant dense<0.000000e+00> : vector<4x6x8xf32>
    %29 = tpu.matmul %28, %7, %cst_16 {dimension_numbers = #tpu.dot_dimension_numbers<[2], [1], [1], [2], [0, 0, 0, 1, 1, 2], [0], [0]>} : vector<4x6x6xbf16>, vector<4x6x8xbf16>, vector<4x6x8xf32> -> vector<4x6x8xf32>
    %30 = arith.truncf %29 : vector<4x6x8xf32> to vector<4x6x8xbf16>
    %c0_17 = arith.constant 0 : index
    %c0_18 = arith.constant 0 : index
    %c0_19 = arith.constant 0 : index
    %31 = vector.load %arg6[%c0_17, %c0_18, %c0_19] : memref<4x8x32xbf16, #tpu.memory_space<vmem>>, vector<4x8x32xbf16>
    %cst_20 = arith.constant dense<0.000000e+00> : vector<4x6x32xf32>
    %32 = tpu.matmul %30, %31, %cst_20 {dimension_numbers = #tpu.dot_dimension_numbers<[2], [1], [1], [2], [0, 0, 0, 1, 1, 2], [0], [0]>} : vector<4x6x8xbf16>, vector<4x8x32xbf16>, vector<4x6x32xf32> -> vector<4x6x32xf32>
    %cst_21 = arith.constant dense<0.000000e+00> : vector<6x32xf32>
    %33 = vector.multi_reduction <add>, %32, %cst_21 [0] : vector<4x6x32xf32> to vector<6x32xf32>
    %c0_22 = arith.constant 0 : index
    %c0_23 = arith.constant 0 : index
    %34 = vector.load %arg7[%c0_22, %c0_23] : memref<1x32xf32, #tpu.memory_space<vmem>>, vector<1x32xf32>
    %35 = vector.broadcast %34 : vector<1x32xf32> to vector<6x32xf32>
    %36 = arith.addf %33, %35 : vector<6x32xf32>
    %c0_24 = arith.constant 0 : index
    %c0_25 = arith.constant 0 : index
    %c0_26 = arith.constant 0 : index
    %37 = vector.load %arg8[%c0_24, %c0_25, %c0_26] : memref<1x6x32xbf16, #tpu.memory_space<vmem>>, vector<1x6x32xbf16>
    %38 = vector.shape_cast %37 : vector<1x6x32xbf16> to vector<6x32xbf16>
    %39 = arith.extf %38 : vector<6x32xbf16> to vector<6x32xf32>
    %40 = arith.addf %39, %36 : vector<6x32xf32>
    %41 = arith.truncf %40 : vector<6x32xf32> to vector<6x32xbf16>
    %c0_27 = arith.constant 0 : index
    %c0_28 = arith.constant 0 : index
    %c0_29 = arith.constant 0 : index
    %42 = vector.load %arg9[%c0_27, %c0_28, %c0_29] : memref<1x6x32xbf16, #tpu.memory_space<vmem>>, vector<1x6x32xbf16>
    %43 = vector.shape_cast %42 : vector<1x6x32xbf16> to vector<6x32xbf16>
    %44 = vector.shape_cast %41 : vector<6x32xbf16> to vector<1x6x32xbf16>
    tpu.vector_store %arg9[%c0_27, %c0_28, %c0_29], %44 {strides = array<i32>} : memref<1x6x32xbf16, #tpu.memory_space<vmem>>, vector<1x6x32xbf16>,
    return
  }
  func.func @transform_0(%arg0: i32, %arg1: i32, %arg2: memref<2xi32, #tpu.memory_space<smem>>) -> (i32, i32, i32, i32) {
    %c0_i32 = arith.constant 0 : i32
    %c0_i32_0 = arith.constant 0 : i32
    %c0_i32_1 = arith.constant 0 : i32
    return %arg0, %c0_i32, %arg1, %c0_i32_0 : i32, i32, i32, i32
  }
  func.func @transform_1(%arg0: i32, %arg1: i32, %arg2: memref<2xi32, #tpu.memory_space<smem>>) -> (i32, i32, i32, i32) {
    %c0_i32 = arith.constant 0 : i32
    %c0_i32_0 = arith.constant 0 : i32
    %c0_i32_1 = arith.constant 0 : i32
    %c0_i32_2 = arith.constant 0 : i32
    return %arg0, %c0_i32, %c0_i32_0, %c0_i32_1 : i32, i32, i32, i32
  }
  func.func @transform_2(%arg0: i32, %arg1: i32, %arg2: memref<2xi32, #tpu.memory_space<smem>>) -> (i32, i32, i32, i32) {
    %c0_i32 = arith.constant 0 : i32
    %c0_i32_0 = arith.constant 0 : i32
    %c0_i32_1 = arith.constant 0 : i32
    %c0_i32_2 = arith.constant 0 : i32
    return %arg0, %c0_i32, %c0_i32_0, %c0_i32_1 : i32, i32, i32, i32
  }
  func.func @transform_3(%arg0: i32, %arg1: i32, %arg2: memref<2xi32, #tpu.memory_space<smem>>) -> (i32, i32, i32) {
    %c0_i32 = arith.constant 0 : i32
    %c0_i32_0 = arith.constant 0 : i32
    %c0_i32_1 = arith.constant 0 : i32
    %c0_i32_2 = arith.constant 0 : i32
    return %c0_i32, %c0_i32_0, %c0_i32_1 : i32, i32, i32
  }
  func.func @transform_4(%arg0: i32, %arg1: i32, %arg2: memref<2xi32, #tpu.memory_space<smem>>) -> (i32, i32) {
    %c0_i32 = arith.constant 0 : i32
    %c0_i32_0 = arith.constant 0 : i32
    %c0_i32_1 = arith.constant 0 : i32
    return %c0_i32, %c0_i32_0 : i32, i32
  }
  func.func @transform_5(%arg0: i32, %arg1: i32, %arg2: memref<2xi32, #tpu.memory_space<smem>>) -> (i32, i32, i32) {
    %c0_i32 = arith.constant 0 : i32
    %c0_i32_0 = arith.constant 0 : i32
    return %arg0, %arg1, %c0_i32 : i32, i32, i32
  }
  func.func @transform_6(%arg0: i32, %arg1: i32, %arg2: memref<2xi32, #tpu.memory_space<smem>>) -> (i32, i32, i32) {
    %c0_i32 = arith.constant 0 : i32
    %c0_i32_0 = arith.constant 0 : i32
    return %arg0, %arg1, %c0_i32 : i32, i32, i32
  }
}

module attributes {stable_mosaic.version = 11 : i64} {
  func.func @_ln_linear_kernel(%arg0: i32, %arg1: memref<12x32xbf16, #tpu.memory_space<vmem>>, %arg2: memref<1x32xf32, #tpu.memory_space<vmem>>, %arg3: memref<1x32xf32, #tpu.memory_space<vmem>>, %arg4: memref<32x32xbf16, #tpu.memory_space<vmem>>, %arg5: memref<1x32xf32, #tpu.memory_space<vmem>>, %arg6: memref<12x32xbf16, #tpu.memory_space<vmem>>) attributes {dimension_semantics = [#tpu.dimension_semantics<parallel>], iteration_bounds = array<i64: 1>, scalar_prefetch = 0 : i64, scratch_operands = 0 : i64, tpu.core_type = #tpu.core_type<tc>, window_params = [{transform_indices = @transform_0, window_bounds = array<i64: 12, 32>}, {pipeline_mode = #tpu.pipeline_mode<synchronous>, transform_indices = @transform_1, window_bounds = array<i64: 1, 32>}, {pipeline_mode = #tpu.pipeline_mode<synchronous>, transform_indices = @transform_2, window_bounds = array<i64: 1, 32>}, {pipeline_mode = #tpu.pipeline_mode<synchronous>, transform_indices = @transform_3, window_bounds = array<i64: 32, 32>}, {pipeline_mode = #tpu.pipeline_mode<synchronous>, transform_indices = @transform_4, window_bounds = array<i64: 1, 32>}, {transform_indices = @transform_5, window_bounds = array<i64: 12, 32>}]} {
    %c0 = arith.constant 0 : index
    %c0_0 = arith.constant 0 : index
    %0 = vector.load %arg1[%c0, %c0_0] : memref<12x32xbf16, #tpu.memory_space<vmem>>, vector<12x32xbf16>
    %1 = arith.extf %0 : vector<12x32xbf16> to vector<12x32xf32>
    %c0_1 = arith.constant 0 : index
    %c0_2 = arith.constant 0 : index
    %2 = vector.load %arg2[%c0_1, %c0_2] : memref<1x32xf32, #tpu.memory_space<vmem>>, vector<1x32xf32>
    %c0_3 = arith.constant 0 : index
    %c0_4 = arith.constant 0 : index
    %3 = vector.load %arg3[%c0_3, %c0_4] : memref<1x32xf32, #tpu.memory_space<vmem>>, vector<1x32xf32>
    %cst = arith.constant dense<0.000000e+00> : vector<12xf32>
    %4 = vector.multi_reduction <add>, %1, %cst [1] : vector<12x32xf32> to vector<12xf32>
    %5 = vector.shape_cast %4 : vector<12xf32> to vector<12x1xf32>
    %cst_5 = arith.constant 3.200000e+01 : f32
    %6 = vector.broadcast %cst_5 : f32 to vector<12x1xf32>
    %7 = arith.divf %5, %6 : vector<12x1xf32>
    %8 = vector.broadcast %7 : vector<12x1xf32> to vector<12x32xf32>
    %9 = arith.subf %1, %8 : vector<12x32xf32>
    %10 = arith.mulf %9, %9 : vector<12x32xf32>
    %cst_6 = arith.constant dense<0.000000e+00> : vector<12xf32>
    %11 = vector.multi_reduction <add>, %10, %cst_6 [1] : vector<12x32xf32> to vector<12xf32>
    %12 = vector.shape_cast %11 : vector<12xf32> to vector<12x1xf32>
    %cst_7 = arith.constant 3.200000e+01 : f32
    %13 = vector.broadcast %cst_7 : f32 to vector<12x1xf32>
    %14 = arith.divf %12, %13 : vector<12x1xf32>
    %15 = vector.broadcast %7 : vector<12x1xf32> to vector<12x32xf32>
    %16 = arith.subf %1, %15 : vector<12x32xf32>
    %cst_8 = arith.constant 9.99999974E-6 : f32
    %17 = vector.broadcast %cst_8 : f32 to vector<12x1xf32>
    %18 = arith.addf %14, %17 : vector<12x1xf32>
    %19 = math.rsqrt %18 : vector<12x1xf32>
    %20 = vector.broadcast %19 : vector<12x1xf32> to vector<12x32xf32>
    %21 = arith.mulf %16, %20 : vector<12x32xf32>
    %22 = vector.broadcast %2 : vector<1x32xf32> to vector<12x32xf32>
    %23 = arith.mulf %21, %22 : vector<12x32xf32>
    %24 = vector.broadcast %3 : vector<1x32xf32> to vector<12x32xf32>
    %25 = arith.addf %23, %24 : vector<12x32xf32>
    %26 = arith.truncf %25 : vector<12x32xf32> to vector<12x32xbf16>
    %c0_9 = arith.constant 0 : index
    %c0_10 = arith.constant 0 : index
    %27 = vector.load %arg4[%c0_9, %c0_10] : memref<32x32xbf16, #tpu.memory_space<vmem>>, vector<32x32xbf16>
    %cst_11 = arith.constant dense<0.000000e+00> : vector<12x32xf32>
    %28 = tpu.matmul %26, %27, %cst_11 {dimension_numbers = #tpu.dot_dimension_numbers<[1], [0], [0], [1], [0, 0, 1, 1], [], []>} : vector<12x32xbf16>, vector<32x32xbf16>, vector<12x32xf32> -> vector<12x32xf32>
    %c0_12 = arith.constant 0 : index
    %c0_13 = arith.constant 0 : index
    %29 = vector.load %arg5[%c0_12, %c0_13] : memref<1x32xf32, #tpu.memory_space<vmem>>, vector<1x32xf32>
    %30 = vector.broadcast %29 : vector<1x32xf32> to vector<12x32xf32>
    %31 = arith.addf %28, %30 : vector<12x32xf32>
    %32 = arith.truncf %31 : vector<12x32xf32> to vector<12x32xbf16>
    %c0_14 = arith.constant 0 : index
    %c0_15 = arith.constant 0 : index
    %33 = vector.load %arg6[%c0_14, %c0_15] : memref<12x32xbf16, #tpu.memory_space<vmem>>, vector<12x32xbf16>
    tpu.vector_store %arg6[%c0_14, %c0_15], %32 {strides = array<i32>} : memref<12x32xbf16, #tpu.memory_space<vmem>>, vector<12x32xbf16>,
    return
  }
  func.func @transform_0(%arg0: i32) -> (i32, i32) {
    %c0_i32 = arith.constant 0 : i32
    %c0_i32_0 = arith.constant 0 : i32
    return %arg0, %c0_i32 : i32, i32
  }
  func.func @transform_1(%arg0: i32) -> (i32, i32) {
    %c0_i32 = arith.constant 0 : i32
    %c0_i32_0 = arith.constant 0 : i32
    %c0_i32_1 = arith.constant 0 : i32
    return %c0_i32, %c0_i32_0 : i32, i32
  }
  func.func @transform_2(%arg0: i32) -> (i32, i32) {
    %c0_i32 = arith.constant 0 : i32
    %c0_i32_0 = arith.constant 0 : i32
    %c0_i32_1 = arith.constant 0 : i32
    return %c0_i32, %c0_i32_0 : i32, i32
  }
  func.func @transform_3(%arg0: i32) -> (i32, i32) {
    %c0_i32 = arith.constant 0 : i32
    %c0_i32_0 = arith.constant 0 : i32
    %c0_i32_1 = arith.constant 0 : i32
    return %c0_i32, %c0_i32_0 : i32, i32
  }
  func.func @transform_4(%arg0: i32) -> (i32, i32) {
    %c0_i32 = arith.constant 0 : i32
    %c0_i32_0 = arith.constant 0 : i32
    %c0_i32_1 = arith.constant 0 : i32
    return %c0_i32, %c0_i32_0 : i32, i32
  }
  func.func @transform_5(%arg0: i32) -> (i32, i32) {
    %c0_i32 = arith.constant 0 : i32
    %c0_i32_0 = arith.constant 0 : i32
    return %arg0, %c0_i32 : i32, i32
  }
}

module attributes {stable_mosaic.version = 11 : i64} {
  func.func @_linear_kernel(%arg0: i32, %arg1: memref<32x32xbf16, #tpu.memory_space<vmem>>, %arg2: memref<32x64xbf16, #tpu.memory_space<vmem>>, %arg3: memref<1x64xf32, #tpu.memory_space<vmem>>, %arg4: memref<32x64xbf16, #tpu.memory_space<vmem>>) attributes {dimension_semantics = [#tpu.dimension_semantics<parallel>], iteration_bounds = array<i64: 1>, scalar_prefetch = 0 : i64, scratch_operands = 0 : i64, tpu.core_type = #tpu.core_type<tc>, window_params = [{transform_indices = @transform_0, window_bounds = array<i64: 32, 32>}, {pipeline_mode = #tpu.pipeline_mode<synchronous>, transform_indices = @transform_1, window_bounds = array<i64: 32, 64>}, {pipeline_mode = #tpu.pipeline_mode<synchronous>, transform_indices = @transform_2, window_bounds = array<i64: 1, 64>}, {transform_indices = @transform_3, window_bounds = array<i64: 32, 64>}]} {
    %c0 = arith.constant 0 : index
    %c0_0 = arith.constant 0 : index
    %0 = vector.load %arg1[%c0, %c0_0] : memref<32x32xbf16, #tpu.memory_space<vmem>>, vector<32x32xbf16>
    %c0_1 = arith.constant 0 : index
    %c0_2 = arith.constant 0 : index
    %1 = vector.load %arg2[%c0_1, %c0_2] : memref<32x64xbf16, #tpu.memory_space<vmem>>, vector<32x64xbf16>
    %cst = arith.constant dense<0.000000e+00> : vector<32x64xf32>
    %2 = tpu.matmul %0, %1, %cst {dimension_numbers = #tpu.dot_dimension_numbers<[1], [0], [0], [1], [0, 0, 1, 1], [], []>} : vector<32x32xbf16>, vector<32x64xbf16>, vector<32x64xf32> -> vector<32x64xf32>
    %c0_3 = arith.constant 0 : index
    %c0_4 = arith.constant 0 : index
    %3 = vector.load %arg3[%c0_3, %c0_4] : memref<1x64xf32, #tpu.memory_space<vmem>>, vector<1x64xf32>
    %4 = vector.broadcast %3 : vector<1x64xf32> to vector<32x64xf32>
    %5 = arith.addf %2, %4 : vector<32x64xf32>
    %6 = arith.truncf %5 : vector<32x64xf32> to vector<32x64xbf16>
    %c0_5 = arith.constant 0 : index
    %c0_6 = arith.constant 0 : index
    %7 = vector.load %arg4[%c0_5, %c0_6] : memref<32x64xbf16, #tpu.memory_space<vmem>>, vector<32x64xbf16>
    tpu.vector_store %arg4[%c0_5, %c0_6], %6 {strides = array<i32>} : memref<32x64xbf16, #tpu.memory_space<vmem>>, vector<32x64xbf16>,
    return
  }
  func.func @transform_0(%arg0: i32) -> (i32, i32) {
    %c0_i32 = arith.constant 0 : i32
    %c0_i32_0 = arith.constant 0 : i32
    return %arg0, %c0_i32 : i32, i32
  }
  func.func @transform_1(%arg0: i32) -> (i32, i32) {
    %c0_i32 = arith.constant 0 : i32
    %c0_i32_0 = arith.constant 0 : i32
    %c0_i32_1 = arith.constant 0 : i32
    return %c0_i32, %c0_i32_0 : i32, i32
  }
  func.func @transform_2(%arg0: i32) -> (i32, i32) {
    %c0_i32 = arith.constant 0 : i32
    %c0_i32_0 = arith.constant 0 : i32
    %c0_i32_1 = arith.constant 0 : i32
    return %c0_i32, %c0_i32_0 : i32, i32
  }
  func.func @transform_3(%arg0: i32) -> (i32, i32) {
    %c0_i32 = arith.constant 0 : i32
    %c0_i32_0 = arith.constant 0 : i32
    return %arg0, %c0_i32 : i32, i32
  }
}

module attributes {stable_mosaic.version = 11 : i64} {
  func.func @_mha_kernel(%arg0: i32, %arg1: i32, %arg2: memref<2xi32, #tpu.memory_space<smem>>, %arg3: memref<1x4x6x8xbf16, #tpu.memory_space<vmem>>, %arg4: memref<1x4x16x8xbf16, #tpu.memory_space<vmem>>, %arg5: memref<1x4x16x8xbf16, #tpu.memory_space<vmem>>, %arg6: memref<4x8x32xbf16, #tpu.memory_space<vmem>>, %arg7: memref<1x32xf32, #tpu.memory_space<vmem>>, %arg8: memref<1x6x32xbf16, #tpu.memory_space<vmem>>, %arg9: memref<1x6x32xbf16, #tpu.memory_space<vmem>>) attributes {dimension_semantics = [#tpu.dimension_semantics<parallel>, #tpu.dimension_semantics<parallel>], iteration_bounds = array<i64: 2, 1>, scalar_prefetch = 1 : i64, scratch_operands = 0 : i64, tpu.core_type = #tpu.core_type<tc>, window_params = [{transform_indices = @transform_0, window_bounds = array<i64: 1, 4, 6, 8>}, {transform_indices = @transform_1, window_bounds = array<i64: 1, 4, 16, 8>}, {transform_indices = @transform_2, window_bounds = array<i64: 1, 4, 16, 8>}, {pipeline_mode = #tpu.pipeline_mode<synchronous>, transform_indices = @transform_3, window_bounds = array<i64: 4, 8, 32>}, {pipeline_mode = #tpu.pipeline_mode<synchronous>, transform_indices = @transform_4, window_bounds = array<i64: 1, 32>}, {transform_indices = @transform_5, window_bounds = array<i64: 1, 6, 32>}, {transform_indices = @transform_6, window_bounds = array<i64: 1, 6, 32>}]} {
    %0 = arith.index_cast %arg0 : i32 to index
    %1 = memref.load %arg2[%0] : memref<2xi32, #tpu.memory_space<smem>>
    %c0 = arith.constant 0 : index
    %c0_0 = arith.constant 0 : index
    %c0_1 = arith.constant 0 : index
    %c0_2 = arith.constant 0 : index
    %2 = vector.load %arg3[%c0, %c0_0, %c0_1, %c0_2] : memref<1x4x6x8xbf16, #tpu.memory_space<vmem>>, vector<1x4x6x8xbf16>
    %3 = vector.shape_cast %2 : vector<1x4x6x8xbf16> to vector<4x6x8xbf16>
    %c0_3 = arith.constant 0 : index
    %c0_4 = arith.constant 0 : index
    %c0_5 = arith.constant 0 : index
    %c0_6 = arith.constant 0 : index
    %4 = vector.load %arg4[%c0_3, %c0_4, %c0_5, %c0_6] : memref<1x4x16x8xbf16, #tpu.memory_space<vmem>>, vector<1x4x16x8xbf16>
    %5 = vector.shape_cast %4 : vector<1x4x16x8xbf16> to vector<4x16x8xbf16>
    %c0_7 = arith.constant 0 : index
    %c0_8 = arith.constant 0 : index
    %c0_9 = arith.constant 0 : index
    %c0_10 = arith.constant 0 : index
    %6 = vector.load %arg5[%c0_7, %c0_8, %c0_9, %c0_10] : memref<1x4x16x8xbf16, #tpu.memory_space<vmem>>, vector<1x4x16x8xbf16>
    %7 = vector.shape_cast %6 : vector<1x4x16x8xbf16> to vector<4x16x8xbf16>
    %cst = arith.constant dense<0.000000e+00> : vector<4x6x16xf32>
    %8 = tpu.matmul %3, %5, %cst {dimension_numbers = #tpu.dot_dimension_numbers<[2], [2], [1], [1], [0, 0, 0, 1, 1, 1], [0], [0]>} : vector<4x6x8xbf16>, vector<4x16x8xbf16>, vector<4x6x16xf32> -> vector<4x6x16xf32>
    %cst_11 = arith.constant 0.353553385 : f32
    %9 = vector.broadcast %cst_11 : f32 to vector<4x6x16xf32>
    %10 = arith.mulf %8, %9 : vector<4x6x16xf32>
    %11 = tpu.iota {dimensions = array<i32: 2>} : vector<4x6x16xi32>
    %12 = vector.broadcast %1 : i32 to vector<4x6x16xi32>
    %13 = arith.cmpi slt, %11, %12 : vector<4x6x16xi32>
    %cst_12 = arith.constant -1.000000e+30 : f32
    %14 = vector.broadcast %cst_12 : f32 to vector<4x6x16xf32>
    %15 = arith.select %13, %10, %14 : vector<4x6x16xi1>, vector<4x6x16xf32>
    %cst_13 = arith.constant dense<0xFF800000> : vector<4x6xf32>
    %16 = vector.multi_reduction <maximumf>, %15, %cst_13 [2] : vector<4x6x16xf32> to vector<4x6xf32>
    %17 = vector.shape_cast %16 : vector<4x6xf32> to vector<4x6x1xf32>
    %18 = vector.broadcast %17 : vector<4x6x1xf32> to vector<4x6x16xf32>
    %19 = arith.subf %15, %18 : vector<4x6x16xf32>
    %20 = math.exp %19 : vector<4x6x16xf32>
    %cst_14 = arith.constant dense<0.000000e+00> : vector<4x6xf32>
    %21 = vector.multi_reduction <add>, %20, %cst_14 [2] : vector<4x6x16xf32> to vector<4x6xf32>
    %22 = vector.shape_cast %21 : vector<4x6xf32> to vector<4x6x1xf32>
    %cst_15 = arith.constant 1.000000e-30 : f32
    %23 = vector.broadcast %cst_15 : f32 to vector<4x6x1xf32>
    %24 = arith.maximumf %22, %23 : vector<4x6x1xf32>
    %25 = tpu.reciprocal %24 {approx = true} : vector<4x6x1xf32> -> vector<4x6x1xf32>
    %26 = vector.broadcast %25 : vector<4x6x1xf32> to vector<4x6x16xf32>
    %27 = arith.mulf %20, %26 : vector<4x6x16xf32>
    %28 = arith.truncf %27 : vector<4x6x16xf32> to vector<4x6x16xbf16>
    %cst_16 = arith.constant dense<0.000000e+00> : vector<4x6x8xf32>
    %29 = tpu.matmul %28, %7, %cst_16 {dimension_numbers = #tpu.dot_dimension_numbers<[2], [1], [1], [2], [0, 0, 0, 1, 1, 2], [0], [0]>} : vector<4x6x16xbf16>, vector<4x16x8xbf16>, vector<4x6x8xf32> -> vector<4x6x8xf32>
    %30 = arith.truncf %29 : vector<4x6x8xf32> to vector<4x6x8xbf16>
    %c0_17 = arith.constant 0 : index
    %c0_18 = arith.constant 0 : index
    %c0_19 = arith.constant 0 : index
    %31 = vector.load %arg6[%c0_17, %c0_18, %c0_19] : memref<4x8x32xbf16, #tpu.memory_space<vmem>>, vector<4x8x32xbf16>
    %cst_20 = arith.constant dense<0.000000e+00> : vector<4x6x32xf32>
    %32 = tpu.matmul %30, %31, %cst_20 {dimension_numbers = #tpu.dot_dimension_numbers<[2], [1], [1], [2], [0, 0, 0, 1, 1, 2], [0], [0]>} : vector<4x6x8xbf16>, vector<4x8x32xbf16>, vector<4x6x32xf32> -> vector<4x6x32xf32>
    %cst_21 = arith.constant dense<0.000000e+00> : vector<6x32xf32>
    %33 = vector.multi_reduction <add>, %32, %cst_21 [0] : vector<4x6x32xf32> to vector<6x32xf32>
    %c0_22 = arith.constant 0 : index
    %c0_23 = arith.constant 0 : index
    %34 = vector.load %arg7[%c0_22, %c0_23] : memref<1x32xf32, #tpu.memory_space<vmem>>, vector<1x32xf32>
    %35 = vector.broadcast %34 : vector<1x32xf32> to vector<6x32xf32>
    %36 = arith.addf %33, %35 : vector<6x32xf32>
    %c0_24 = arith.constant 0 : index
    %c0_25 = arith.constant 0 : index
    %c0_26 = arith.constant 0 : index
    %37 = vector.load %arg8[%c0_24, %c0_25, %c0_26] : memref<1x6x32xbf16, #tpu.memory_space<vmem>>, vector<1x6x32xbf16>
    %38 = vector.shape_cast %37 : vector<1x6x32xbf16> to vector<6x32xbf16>
    %39 = arith.extf %38 : vector<6x32xbf16> to vector<6x32xf32>
    %40 = arith.addf %39, %36 : vector<6x32xf32>
    %41 = arith.truncf %40 : vector<6x32xf32> to vector<6x32xbf16>
    %c0_27 = arith.constant 0 : index
    %c0_28 = arith.constant 0 : index
    %c0_29 = arith.constant 0 : index
    %42 = vector.load %arg9[%c0_27, %c0_28, %c0_29] : memref<1x6x32xbf16, #tpu.memory_space<vmem>>, vector<1x6x32xbf16>
    %43 = vector.shape_cast %42 : vector<1x6x32xbf16> to vector<6x32xbf16>
    %44 = vector.shape_cast %41 : vector<6x32xbf16> to vector<1x6x32xbf16>
    tpu.vector_store %arg9[%c0_27, %c0_28, %c0_29], %44 {strides = array<i32>} : memref<1x6x32xbf16, #tpu.memory_space<vmem>>, vector<1x6x32xbf16>,
    return
  }
  func.func @transform_0(%arg0: i32, %arg1: i32, %arg2: memref<2xi32, #tpu.memory_space<smem>>) -> (i32, i32, i32, i32) {
    %c0_i32 = arith.constant 0 : i32
    %c0_i32_0 = arith.constant 0 : i32
    %c0_i32_1 = arith.constant 0 : i32
    return %arg0, %c0_i32, %arg1, %c0_i32_0 : i32, i32, i32, i32
  }
  func.func @transform_1(%arg0: i32, %arg1: i32, %arg2: memref<2xi32, #tpu.memory_space<smem>>) -> (i32, i32, i32, i32) {
    %c0_i32 = arith.constant 0 : i32
    %c0_i32_0 = arith.constant 0 : i32
    %c0_i32_1 = arith.constant 0 : i32
    %c0_i32_2 = arith.constant 0 : i32
    return %arg0, %c0_i32, %c0_i32_0, %c0_i32_1 : i32, i32, i32, i32
  }
  func.func @transform_2(%arg0: i32, %arg1: i32, %arg2: memref<2xi32, #tpu.memory_space<smem>>) -> (i32, i32, i32, i32) {
    %c0_i32 = arith.constant 0 : i32
    %c0_i32_0 = arith.constant 0 : i32
    %c0_i32_1 = arith.constant 0 : i32
    %c0_i32_2 = arith.constant 0 : i32
    return %arg0, %c0_i32, %c0_i32_0, %c0_i32_1 : i32, i32, i32, i32
  }
  func.func @transform_3(%arg0: i32, %arg1: i32, %arg2: memref<2xi32, #tpu.memory_space<smem>>) -> (i32, i32, i32) {
    %c0_i32 = arith.constant 0 : i32
    %c0_i32_0 = arith.constant 0 : i32
    %c0_i32_1 = arith.constant 0 : i32
    %c0_i32_2 = arith.constant 0 : i32
    return %c0_i32, %c0_i32_0, %c0_i32_1 : i32, i32, i32
  }
  func.func @transform_4(%arg0: i32, %arg1: i32, %arg2: memref<2xi32, #tpu.memory_space<smem>>) -> (i32, i32) {
    %c0_i32 = arith.constant 0 : i32
    %c0_i32_0 = arith.constant 0 : i32
    %c0_i32_1 = arith.constant 0 : i32
    return %c0_i32, %c0_i32_0 : i32, i32
  }
  func.func @transform_5(%arg0: i32, %arg1: i32, %arg2: memref<2xi32, #tpu.memory_space<smem>>) -> (i32, i32, i32) {
    %c0_i32 = arith.constant 0 : i32
    %c0_i32_0 = arith.constant 0 : i32
    return %arg0, %arg1, %c0_i32 : i32, i32, i32
  }
  func.func @transform_6(%arg0: i32, %arg1: i32, %arg2: memref<2xi32, #tpu.memory_space<smem>>) -> (i32, i32, i32) {
    %c0_i32 = arith.constant 0 : i32
    %c0_i32_0 = arith.constant 0 : i32
    return %arg0, %arg1, %c0_i32 : i32, i32, i32
  }
}

module attributes {stable_mosaic.version = 11 : i64} {
  func.func @_head_nll_kernel(%arg0: i32, %arg1: memref<12x32xbf16, #tpu.memory_space<vmem>>, %arg2: memref<1x32xf32, #tpu.memory_space<vmem>>, %arg3: memref<1x32xf32, #tpu.memory_space<vmem>>, %arg4: memref<32x16xbf16, #tpu.memory_space<vmem>>, %arg5: memref<1x16xf32, #tpu.memory_space<vmem>>, %arg6: memref<12x1xi32, #tpu.memory_space<vmem>>, %arg7: memref<12x1xf32, #tpu.memory_space<vmem>>, %arg8: memref<12x1xf32, #tpu.memory_space<vmem>>) attributes {dimension_semantics = [#tpu.dimension_semantics<parallel>], iteration_bounds = array<i64: 1>, scalar_prefetch = 0 : i64, scratch_operands = 0 : i64, tpu.core_type = #tpu.core_type<tc>, window_params = [{transform_indices = @transform_0, window_bounds = array<i64: 12, 32>}, {pipeline_mode = #tpu.pipeline_mode<synchronous>, transform_indices = @transform_1, window_bounds = array<i64: 1, 32>}, {pipeline_mode = #tpu.pipeline_mode<synchronous>, transform_indices = @transform_2, window_bounds = array<i64: 1, 32>}, {pipeline_mode = #tpu.pipeline_mode<synchronous>, transform_indices = @transform_3, window_bounds = array<i64: 32, 16>}, {pipeline_mode = #tpu.pipeline_mode<synchronous>, transform_indices = @transform_4, window_bounds = array<i64: 1, 16>}, {transform_indices = @transform_5, window_bounds = array<i64: 12, 1>}, {transform_indices = @transform_6, window_bounds = array<i64: 12, 1>}, {transform_indices = @transform_7, window_bounds = array<i64: 12, 1>}]} {
    %c0 = arith.constant 0 : index
    %c0_0 = arith.constant 0 : index
    %0 = vector.load %arg1[%c0, %c0_0] : memref<12x32xbf16, #tpu.memory_space<vmem>>, vector<12x32xbf16>
    %1 = arith.extf %0 : vector<12x32xbf16> to vector<12x32xf32>
    %c0_1 = arith.constant 0 : index
    %c0_2 = arith.constant 0 : index
    %2 = vector.load %arg2[%c0_1, %c0_2] : memref<1x32xf32, #tpu.memory_space<vmem>>, vector<1x32xf32>
    %c0_3 = arith.constant 0 : index
    %c0_4 = arith.constant 0 : index
    %3 = vector.load %arg3[%c0_3, %c0_4] : memref<1x32xf32, #tpu.memory_space<vmem>>, vector<1x32xf32>
    %cst = arith.constant dense<0.000000e+00> : vector<12xf32>
    %4 = vector.multi_reduction <add>, %1, %cst [1] : vector<12x32xf32> to vector<12xf32>
    %5 = vector.shape_cast %4 : vector<12xf32> to vector<12x1xf32>
    %cst_5 = arith.constant 3.200000e+01 : f32
    %6 = vector.broadcast %cst_5 : f32 to vector<12x1xf32>
    %7 = arith.divf %5, %6 : vector<12x1xf32>
    %8 = vector.broadcast %7 : vector<12x1xf32> to vector<12x32xf32>
    %9 = arith.subf %1, %8 : vector<12x32xf32>
    %10 = arith.mulf %9, %9 : vector<12x32xf32>
    %cst_6 = arith.constant dense<0.000000e+00> : vector<12xf32>
    %11 = vector.multi_reduction <add>, %10, %cst_6 [1] : vector<12x32xf32> to vector<12xf32>
    %12 = vector.shape_cast %11 : vector<12xf32> to vector<12x1xf32>
    %cst_7 = arith.constant 3.200000e+01 : f32
    %13 = vector.broadcast %cst_7 : f32 to vector<12x1xf32>
    %14 = arith.divf %12, %13 : vector<12x1xf32>
    %15 = vector.broadcast %7 : vector<12x1xf32> to vector<12x32xf32>
    %16 = arith.subf %1, %15 : vector<12x32xf32>
    %cst_8 = arith.constant 9.99999974E-6 : f32
    %17 = vector.broadcast %cst_8 : f32 to vector<12x1xf32>
    %18 = arith.addf %14, %17 : vector<12x1xf32>
    %19 = math.rsqrt %18 : vector<12x1xf32>
    %20 = vector.broadcast %19 : vector<12x1xf32> to vector<12x32xf32>
    %21 = arith.mulf %16, %20 : vector<12x32xf32>
    %22 = vector.broadcast %2 : vector<1x32xf32> to vector<12x32xf32>
    %23 = arith.mulf %21, %22 : vector<12x32xf32>
    %24 = vector.broadcast %3 : vector<1x32xf32> to vector<12x32xf32>
    %25 = arith.addf %23, %24 : vector<12x32xf32>
    %26 = arith.truncf %25 : vector<12x32xf32> to vector<12x32xbf16>
    %c0_9 = arith.constant 0 : index
    %c0_10 = arith.constant 0 : index
    %27 = vector.load %arg4[%c0_9, %c0_10] : memref<32x16xbf16, #tpu.memory_space<vmem>>, vector<32x16xbf16>
    %cst_11 = arith.constant dense<0.000000e+00> : vector<12x16xf32>
    %28 = tpu.matmul %26, %27, %cst_11 {dimension_numbers = #tpu.dot_dimension_numbers<[1], [0], [0], [1], [0, 0, 1, 1], [], []>} : vector<12x32xbf16>, vector<32x16xbf16>, vector<12x16xf32> -> vector<12x16xf32>
    %c0_12 = arith.constant 0 : index
    %c0_13 = arith.constant 0 : index
    %29 = vector.load %arg5[%c0_12, %c0_13] : memref<1x16xf32, #tpu.memory_space<vmem>>, vector<1x16xf32>
    %30 = vector.broadcast %29 : vector<1x16xf32> to vector<12x16xf32>
    %31 = arith.addf %28, %30 : vector<12x16xf32>
    %cst_14 = arith.constant dense<0xFF800000> : vector<12xf32>
    %32 = vector.multi_reduction <maximumf>, %31, %cst_14 [1] : vector<12x16xf32> to vector<12xf32>
    %33 = vector.shape_cast %32 : vector<12xf32> to vector<12x1xf32>
    %34 = vector.broadcast %33 : vector<12x1xf32> to vector<12x16xf32>
    %35 = arith.subf %31, %34 : vector<12x16xf32>
    %36 = math.exp %35 : vector<12x16xf32>
    %cst_15 = arith.constant dense<0.000000e+00> : vector<12xf32>
    %37 = vector.multi_reduction <add>, %36, %cst_15 [1] : vector<12x16xf32> to vector<12xf32>
    %38 = vector.shape_cast %37 : vector<12xf32> to vector<12x1xf32>
    %39 = math.log %38 : vector<12x1xf32>
    %40 = arith.addf %33, %39 : vector<12x1xf32>
    %41 = tpu.iota {dimensions = array<i32: 1>} : vector<12x16xi32>
    %c0_16 = arith.constant 0 : index
    %c0_17 = arith.constant 0 : index
    %42 = vector.load %arg6[%c0_16, %c0_17] : memref<12x1xi32, #tpu.memory_space<vmem>>, vector<12x1xi32>
    %43 = vector.broadcast %42 : vector<12x1xi32> to vector<12x16xi32>
    %44 = arith.cmpi eq, %41, %43 : vector<12x16xi32>
    %45 = arith.extui %44 : vector<12x16xi1> to vector<12x16xi32>
    %46 = arith.sitofp %45 : vector<12x16xi32> to vector<12x16xf32>
    %47 = arith.mulf %31, %46 : vector<12x16xf32>
    %cst_18 = arith.constant dense<0.000000e+00> : vector<12xf32>
    %48 = vector.multi_reduction <add>, %47, %cst_18 [1] : vector<12x16xf32> to vector<12xf32>
    %49 = vector.shape_cast %48 : vector<12xf32> to vector<12x1xf32>
    %50 = arith.subf %49, %40 : vector<12x1xf32>
    %c0_19 = arith.constant 0 : index
    %c0_20 = arith.constant 0 : index
    %51 = vector.load %arg7[%c0_19, %c0_20] : memref<12x1xf32, #tpu.memory_space<vmem>>, vector<12x1xf32>
    tpu.vector_store %arg7[%c0_19, %c0_20], %50 {strides = array<i32>} : memref<12x1xf32, #tpu.memory_space<vmem>>, vector<12x1xf32>,
    %cst_21 = arith.constant dense<0.000000e+00> : vector<12xf32>
    %52 = vector.multi_reduction <add>, %31, %cst_21 [1] : vector<12x16xf32> to vector<12xf32>
    %53 = vector.shape_cast %52 : vector<12xf32> to vector<12x1xf32>
    %cst_22 = arith.constant 1.600000e+01 : f32
    %54 = vector.broadcast %cst_22 : f32 to vector<12x1xf32>
    %55 = arith.mulf %54, %40 : vector<12x1xf32>
    %56 = arith.subf %53, %55 : vector<12x1xf32>
    %c0_23 = arith.constant 0 : index
    %c0_24 = arith.constant 0 : index
    %57 = vector.load %arg8[%c0_23, %c0_24] : memref<12x1xf32, #tpu.memory_space<vmem>>, vector<12x1xf32>
    tpu.vector_store %arg8[%c0_23, %c0_24], %56 {strides = array<i32>} : memref<12x1xf32, #tpu.memory_space<vmem>>, vector<12x1xf32>,
    return
  }
  func.func @transform_0(%arg0: i32) -> (i32, i32) {
    %c0_i32 = arith.constant 0 : i32
    %c0_i32_0 = arith.constant 0 : i32
    return %arg0, %c0_i32 : i32, i32
  }
  func.func @transform_1(%arg0: i32) -> (i32, i32) {
    %c0_i32 = arith.constant 0 : i32
    %c0_i32_0 = arith.constant 0 : i32
    %c0_i32_1 = arith.constant 0 : i32
    return %c0_i32, %c0_i32_0 : i32, i32
  }
  func.func @transform_2(%arg0: i32) -> (i32, i32) {
    %c0_i32 = arith.constant 0 : i32
    %c0_i32_0 = arith.constant 0 : i32
    %c0_i32_1 = arith.constant 0 : i32
    return %c0_i32, %c0_i32_0 : i32, i32
  }
  func.func @transform_3(%arg0: i32) -> (i32, i32) {
    %c0_i32 = arith.constant 0 : i32
    %c0_i32_0 = arith.constant 0 : i32
    %c0_i32_1 = arith.constant 0 : i32
    return %c0_i32, %c0_i32_0 : i32, i32
  }
  func.func @transform_4(%arg0: i32) -> (i32, i32) {
    %c0_i32 = arith.constant 0 : i32
    %c0_i32_0 = arith.constant 0 : i32
    %c0_i32_1 = arith.constant 0 : i32
    return %c0_i32, %c0_i32_0 : i32, i32
  }
  func.func @transform_5(%arg0: i32) -> (i32, i32) {
    %c0_i32 = arith.constant 0 : i32
    %c0_i32_0 = arith.constant 0 : i32
    return %arg0, %c0_i32 : i32, i32
  }
  func.func @transform_6(%arg0: i32) -> (i32, i32) {
    %c0_i32 = arith.constant 0 : i32
    %c0_i32_0 = arith.constant 0 : i32
    return %arg0, %c0_i32 : i32, i32
  }
  func.func @transform_7(%arg0: i32) -> (i32, i32) {
    %c0_i32 = arith.constant 0 : i32
    %c0_i32_0 = arith.constant 0 : i32
    return %arg0, %c0_i32 : i32, i32
  }
}

module attributes {stable_mosaic.version = 11 : i64} {
  func.func @_ffn_block_kernel(%arg0: i32, %arg1: memref<12x32xbf16, #tpu.memory_space<vmem>>, %arg2: memref<1x32xf32, #tpu.memory_space<vmem>>, %arg3: memref<1x32xf32, #tpu.memory_space<vmem>>, %arg4: memref<32x64xbf16, #tpu.memory_space<vmem>>, %arg5: memref<1x64xf32, #tpu.memory_space<vmem>>, %arg6: memref<64x32xbf16, #tpu.memory_space<vmem>>, %arg7: memref<1x32xf32, #tpu.memory_space<vmem>>, %arg8: memref<12x32xbf16, #tpu.memory_space<vmem>>) attributes {dimension_semantics = [#tpu.dimension_semantics<parallel>], iteration_bounds = array<i64: 1>, scalar_prefetch = 0 : i64, scratch_operands = 0 : i64, tpu.core_type = #tpu.core_type<tc>, window_params = [{transform_indices = @transform_0, window_bounds = array<i64: 12, 32>}, {pipeline_mode = #tpu.pipeline_mode<synchronous>, transform_indices = @transform_1, window_bounds = array<i64: 1, 32>}, {pipeline_mode = #tpu.pipeline_mode<synchronous>, transform_indices = @transform_2, window_bounds = array<i64: 1, 32>}, {pipeline_mode = #tpu.pipeline_mode<synchronous>, transform_indices = @transform_3, window_bounds = array<i64: 32, 64>}, {pipeline_mode = #tpu.pipeline_mode<synchronous>, transform_indices = @transform_4, window_bounds = array<i64: 1, 64>}, {pipeline_mode = #tpu.pipeline_mode<synchronous>, transform_indices = @transform_5, window_bounds = array<i64: 64, 32>}, {pipeline_mode = #tpu.pipeline_mode<synchronous>, transform_indices = @transform_6, window_bounds = array<i64: 1, 32>}, {transform_indices = @transform_7, window_bounds = array<i64: 12, 32>}]} {
    %c0 = arith.constant 0 : index
    %c0_0 = arith.constant 0 : index
    %0 = vector.load %arg1[%c0, %c0_0] : memref<12x32xbf16, #tpu.memory_space<vmem>>, vector<12x32xbf16>
    %1 = arith.extf %0 : vector<12x32xbf16> to vector<12x32xf32>
    %c0_1 = arith.constant 0 : index
    %c0_2 = arith.constant 0 : index
    %2 = vector.load %arg2[%c0_1, %c0_2] : memref<1x32xf32, #tpu.memory_space<vmem>>, vector<1x32xf32>
    %c0_3 = arith.constant 0 : index
    %c0_4 = arith.constant 0 : index
    %3 = vector.load %arg3[%c0_3, %c0_4] : memref<1x32xf32, #tpu.memory_space<vmem>>, vector<1x32xf32>
    %cst = arith.constant dense<0.000000e+00> : vector<12xf32>
    %4 = vector.multi_reduction <add>, %1, %cst [1] : vector<12x32xf32> to vector<12xf32>
    %5 = vector.shape_cast %4 : vector<12xf32> to vector<12x1xf32>
    %cst_5 = arith.constant 3.200000e+01 : f32
    %6 = vector.broadcast %cst_5 : f32 to vector<12x1xf32>
    %7 = arith.divf %5, %6 : vector<12x1xf32>
    %8 = vector.broadcast %7 : vector<12x1xf32> to vector<12x32xf32>
    %9 = arith.subf %1, %8 : vector<12x32xf32>
    %10 = arith.mulf %9, %9 : vector<12x32xf32>
    %cst_6 = arith.constant dense<0.000000e+00> : vector<12xf32>
    %11 = vector.multi_reduction <add>, %10, %cst_6 [1] : vector<12x32xf32> to vector<12xf32>
    %12 = vector.shape_cast %11 : vector<12xf32> to vector<12x1xf32>
    %cst_7 = arith.constant 3.200000e+01 : f32
    %13 = vector.broadcast %cst_7 : f32 to vector<12x1xf32>
    %14 = arith.divf %12, %13 : vector<12x1xf32>
    %15 = vector.broadcast %7 : vector<12x1xf32> to vector<12x32xf32>
    %16 = arith.subf %1, %15 : vector<12x32xf32>
    %cst_8 = arith.constant 9.99999974E-6 : f32
    %17 = vector.broadcast %cst_8 : f32 to vector<12x1xf32>
    %18 = arith.addf %14, %17 : vector<12x1xf32>
    %19 = math.rsqrt %18 : vector<12x1xf32>
    %20 = vector.broadcast %19 : vector<12x1xf32> to vector<12x32xf32>
    %21 = arith.mulf %16, %20 : vector<12x32xf32>
    %22 = vector.broadcast %2 : vector<1x32xf32> to vector<12x32xf32>
    %23 = arith.mulf %21, %22 : vector<12x32xf32>
    %24 = vector.broadcast %3 : vector<1x32xf32> to vector<12x32xf32>
    %25 = arith.addf %23, %24 : vector<12x32xf32>
    %26 = arith.truncf %25 : vector<12x32xf32> to vector<12x32xbf16>
    %c0_9 = arith.constant 0 : index
    %c0_10 = arith.constant 0 : index
    %27 = vector.load %arg4[%c0_9, %c0_10] : memref<32x64xbf16, #tpu.memory_space<vmem>>, vector<32x64xbf16>
    %cst_11 = arith.constant dense<0.000000e+00> : vector<12x64xf32>
    %28 = tpu.matmul %26, %27, %cst_11 {dimension_numbers = #tpu.dot_dimension_numbers<[1], [0], [0], [1], [0, 0, 1, 1], [], []>} : vector<12x32xbf16>, vector<32x64xbf16>, vector<12x64xf32> -> vector<12x64xf32>
    %c0_12 = arith.constant 0 : index
    %c0_13 = arith.constant 0 : index
    %29 = vector.load %arg5[%c0_12, %c0_13] : memref<1x64xf32, #tpu.memory_space<vmem>>, vector<1x64xf32>
    %30 = vector.broadcast %29 : vector<1x64xf32> to vector<12x64xf32>
    %31 = arith.addf %28, %30 : vector<12x64xf32>
    %cst_14 = arith.constant 0.000000e+00 : f32
    %32 = vector.broadcast %cst_14 : f32 to vector<12x64xf32>
    %33 = arith.maximumf %31, %32 : vector<12x64xf32>
    %34 = arith.truncf %33 : vector<12x64xf32> to vector<12x64xbf16>
    %c0_15 = arith.constant 0 : index
    %c0_16 = arith.constant 0 : index
    %35 = vector.load %arg6[%c0_15, %c0_16] : memref<64x32xbf16, #tpu.memory_space<vmem>>, vector<64x32xbf16>
    %cst_17 = arith.constant dense<0.000000e+00> : vector<12x32xf32>
    %36 = tpu.matmul %34, %35, %cst_17 {dimension_numbers = #tpu.dot_dimension_numbers<[1], [0], [0], [1], [0, 0, 1, 1], [], []>} : vector<12x64xbf16>, vector<64x32xbf16>, vector<12x32xf32> -> vector<12x32xf32>
    %c0_18 = arith.constant 0 : index
    %c0_19 = arith.constant 0 : index
    %37 = vector.load %arg7[%c0_18, %c0_19] : memref<1x32xf32, #tpu.memory_space<vmem>>, vector<1x32xf32>
    %38 = vector.broadcast %37 : vector<1x32xf32> to vector<12x32xf32>
    %39 = arith.addf %36, %38 : vector<12x32xf32>
    %40 = arith.addf %1, %39 : vector<12x32xf32>
    %41 = arith.truncf %40 : vector<12x32xf32> to vector<12x32xbf16>
    %c0_20 = arith.constant 0 : index
    %c0_21 = arith.constant 0 : index
    %42 = vector.load %arg8[%c0_20, %c0_21] : memref<12x32xbf16, #tpu.memory_space<vmem>>, vector<12x32xbf16>
    tpu.vector_store %arg8[%c0_20, %c0_21], %41 {strides = array<i32>} : memref<12x32xbf16, #tpu.memory_space<vmem>>, vector<12x32xbf16>,
    return
  }
  func.func @transform_0(%arg0: i32) -> (i32, i32) {
    %c0_i32 = arith.constant 0 : i32
    %c0_i32_0 = arith.constant 0 : i32
    return %arg0, %c0_i32 : i32, i32
  }
  func.func @transform_1(%arg0: i32) -> (i32, i32) {
    %c0_i32 = arith.constant 0 : i32
    %c0_i32_0 = arith.constant 0 : i32
    %c0_i32_1 = arith.constant 0 : i32
    return %c0_i32, %c0_i32_0 : i32, i32
  }
  func.func @transform_2(%arg0: i32) -> (i32, i32) {
    %c0_i32 = arith.constant 0 : i32
    %c0_i32_0 = arith.constant 0 : i32
    %c0_i32_1 = arith.constant 0 : i32
    return %c0_i32, %c0_i32_0 : i32, i32
  }
  func.func @transform_3(%arg0: i32) -> (i32, i32) {
    %c0_i32 = arith.constant 0 : i32
    %c0_i32_0 = arith.constant 0 : i32
    %c0_i32_1 = arith.constant 0 : i32
    return %c0_i32, %c0_i32_0 : i32, i32
  }
  func.func @transform_4(%arg0: i32) -> (i32, i32) {
    %c0_i32 = arith.constant 0 : i32
    %c0_i32_0 = arith.constant 0 : i32
    %c0_i32_1 = arith.constant 0 : i32
    return %c0_i32, %c0_i32_0 : i32, i32
  }
  func.func @transform_5(%arg0: i32) -> (i32, i32) {
    %c0_i32 = arith.constant 0 : i32
    %c0_i32_0 = arith.constant 0 : i32
    %c0_i32_1 = arith.constant 0 : i32
    return %c0_i32, %c0_i32_0 : i32, i32
  }
  func.func @transform_6(%arg0: i32) -> (i32, i32) {
    %c0_i32 = arith.constant 0 : i32
    %c0_i32_0 = arith.constant 0 : i32
    %c0_i32_1 = arith.constant 0 : i32
    return %c0_i32, %c0_i32_0 : i32, i32
  }
  func.func @transform_7(%arg0: i32) -> (i32, i32) {
    %c0_i32 = arith.constant 0 : i32
    %c0_i32_0 = arith.constant 0 : i32
    return %arg0, %c0_i32 : i32, i32
  }
}

</mosaic_0001>

<bundles_post_ra>
// kernel: asr_cif_forward.14
= control target key start
LH: loop header
LB: loop body
LE: loop exit
PB: predicated region body
PF: predicated region fallthrough
CT: control target
= control target key end

     0   :  { %s660_s21 = smov 0   ;;  %s662_s22 = smov 0   ;;  %s719_s0 = inlined_call_operand.vmem [shape: f32[2,16,8], index: 0, kind: input, shape index: {}]   ;;  %s720_s1 = inlined_call_operand.vmem [shape: bf16[8,32], index: 1, kind: input, shape index: {}]   ;;  %s721_s2 = inlined_call_operand.vmem [shape: f32[1,32], index: 2, kind: input, shape index: {}, may-alias: {2,4}]   ;;  %s722_s3 = inlined_call_operand.vmem [shape: f32[1,32], index: 3, kind: input, shape index: {}]   ;;  %s723_s4 = inlined_call_operand.vmem [shape: f32[1,32], index: 4, kind: input, shape index: {}, may-alias: {2,4}]   ;;  %s724_s5 = inlined_call_operand.vmem [shape: f32[16,32], index: 5, kind: input, shape index: {}]   ;;  %s725_s6 = inlined_call_operand.vmem [shape: bf16[2,16,32], index: 6, kind: output, shape index: {}]  }
   0x1   :  { %s664_s23 = smov 0  }
   0x2 LB: > { %s28_s24 = sadd.s32 1, %s617_s22  ;;  %p544_p0 = scmp.ge.s32.totalorder %s621_s23, 1  ;;  %s621_s23 = sphi %s664_s23, %s16_s23   ;;  %s617_s22 = sphi %s662_s22, %s727_s22   ;;  %s613_s21 = sphi %s660_s21, %s726_s21  }
   0x3   : > { %p30_p1 = scmp.ge.s32.totalorder %s28_s24, 2  ;;  %p244_p2 = scmp.lt.s32.totalorder %s621_s23, 3 }
   0x5   : > { %s729_s24 = smov (%p30_p1, %s28_s24), 0  ;;  %p245_p3 = pnand %p544_p0, %p244_p2 }
   0x6   : > { %p288_p4 = scmp.lt.s32.totalorder (!%p245_p3), %s613_s21, 1 }
   0x7   : > { %248 = sbr.rel (%p245_p3) target bundleno = 532 (0x214), region = 44 }
   0xc   : > { %v317_v0 = vld [vmem:[%s720_s1] sm:$0xf]  ;;  %vm329_vm0 = vcmask 1043456   ;;  %v623_v1 = vmov 0.0   ;;  %vm624_vm1 = vmmov 0   ;;  %s731_s21 = smov (!%p288_p4, %s613_s21), 1 }
   0xd   : > { %563 = vmatprep.subr.bf16.mxu0 %v623_v1  ;;  %v331_v2 = vsel %vm329_vm0, %v317_v0, 0  ;;  %565 = vmatprep.mubr.msk.bf16.mxu0 %vm624_vm1, %v623_v1  ;;  %s557_s27 = sshll.u32 %s731_s21, 4  ;;  %vm325_vm2 = vcmask 64512   ;;  %v549_v6 = vld [vmem:[%s721_s2] ss:$0 sm:$0xff]  ;;  %vm376_vm3 = vcmask 261120  }
   0xe   : > { %564 = vmatpush3.bf16.msra.mxu0 %v331_v2  ;;  %s295_s30 = scalar_lea.vmem %s719_s0, %s557_s27  ;;  %v551_v32 = vld [vmem:[%s722_s3] ss:$0 sm:$0xff]  ;;  %s558_s15 = sshll.u32 %s731_s21, 3  ;;  %vm434_vm4 = vcmask 257024   ;;  %v423_v44 = vld [vmem:[%s724_s5 + $0x8] sm:$0xff] }
   0xf   : > { %v314_v3 = vld [vmem:[%s295_s30] sm:$0xff]  ;;  %v315_v4 = vld [vmem:[%s295_s30 + $0x8] sm:$0xff]  ;;  %s311_s18 = scalar_lea.vmem %s725_s6, %s558_s15 }
  0x10   : > { %v316_v5 = vpack.c.bf16 %v315_v4, %v314_v3  ;;  %v552_v34 = vld [vmem:[%s723_s4] ss:$0 sm:$0xff] }
  0x11   : > { %v422_v39 = vld [vmem:[%s724_s5] sm:$0xff] }
  0x12   : > { %566 = vmatmul.mubr.msk.bf16.vlgmr.msra.gmra.mxu0 %vm325_vm2, %v316_v5 }
  0xd2   : > { %v367_v7 = vpop.f32.mrf.mxu0 }
  0xd3   : > { %v368_v8 = vadd.f32 %v549_v6, %v367_v7 }
  0xd4   : > { %v567_v9 = vpop.f32.mrf.mxu0 }
  0xd5   : > { %v377_v10 = vsel %vm376_vm3, %v368_v8, 0.0 }
  0xd6   : > { %378 = vadd.xlane.f32.xlu0 %v377_v10  ;;  %v370_v11 = vpop.f32.mrf.mxu0 }
  0xd7   : > { %v371_v12 = vadd.f32 %v549_v6, %v370_v11 }
  0xd8   : > { %v568_v13 = vpop.f32.mrf.mxu0 }
  0xd9   : > { %v380_v14 = vsel %vm376_vm3, %v371_v12, 0.0 }
  0xda   : > { %381 = vadd.xlane.f32.xlu0 %v380_v14 }
 0x15f   : > { %v379_v15 = vpop.xlane.xlu0 %378 }
 0x160   : > { %v384_v16 = vmul.f32 0.03125, %v379_v15 }
 0x162   : > { %v386_v17 = vsub.f32 %v368_v8, %v384_v16 }
 0x163   : > { %v382_v18 = vpop.xlane.xlu0 %381 }
 0x164   : > { %v385_v19 = vmul.f32 0.03125, %v382_v18  ;;  %v388_v20 = vmul.f32 %v386_v17, %v386_v17 }
 0x166   : > { %v387_v21 = vsub.f32 %v371_v12, %v385_v19  ;;  %v390_v22 = vsel %vm376_vm3, %v388_v20, 0.0 }
 0x167   : > { %391 = vadd.xlane.f32.xlu1 %v390_v22 }
 0x168   : > { %v389_v23 = vmul.f32 %v387_v21, %v387_v21 }
 0x16a   : > { %v393_v24 = vsel %vm376_vm3, %v389_v23, 0.0 }
 0x16b   : > { %394 = vadd.xlane.f32.xlu1 %v393_v24 }
 0x1f0   : > { %v392_v25 = vpop.xlane.xlu1 %391 }
 0x1f1   : > { %v396_v26 = vmul.f32 0.03125, %v392_v25 }
 0x1f3   : > { %v398_v27 = vadd.f32 1e-05, %v396_v26 }
 0x1f4   : > { %v395_v28 = vpop.xlane.xlu1 %394 }
 0x1f5   : > { %595 = vrsqrt.f32 %v398_v27  ;;  %v397_v29 = vmul.f32 0.03125, %v395_v28 }
 0x1f7   : > { %v399_v30 = vadd.f32 1e-05, %v397_v29 }
 0x1f9   : > { %597 = vrsqrt.f32 %v399_v30 }
 0x202   : > { %v596_v31 = vpop.eup %595 }
 0x203   : > { %v402_v33 = vmul.f32 %v596_v31, %v386_v17 }
 0x205   : > { %v410_v35 = vmul.f32 %v551_v32, %v402_v33 }
 0x206   : > { %v598_v36 = vpop.eup %597 }
 0x207   : > { %v418_v37 = vadd.f32 %v552_v34, %v410_v35  ;;  %v403_v38 = vmul.f32 %v598_v36, %v387_v21 }
 0x209   : > { %v420_v40 = vmul.f32 5.656854, %v418_v37  ;;  %v411_v41 = vmul.f32 %v551_v32, %v403_v38 }
 0x20b   : > { %v424_v42 = vadd.f32 %v422_v39, %v420_v40  ;;  %v419_v43 = vadd.f32 %v552_v34, %v411_v41 }
 0x20d   : > { %v559_v45 = vpack.c.bf16 %v424_v42, %v424_v42  ;;  %v421_v46 = vmul.f32 5.656854, %v419_v43 }
 0x20f   : > { %435 = vst.msk [vmem:[%s311_s18] sm:$0xf] %vm434_vm4, %v559_v45  ;;  %v425_v47 = vadd.f32 %v423_v44, %v421_v46 }
 0x211   : > { %v560_v48 = vpack.c.bf16 %v425_v47, %v425_v47 }
 0x213   : > { %436 = vst.msk [vmem:[%s311_s18 + $0x4] sm:$0xf] %vm434_vm4, %v560_v48 }
 0x214 PF: > { %s16_s23 = sadd.s32 1, %s621_s23   ;;  %s726_s21 = smov %s617_s22 }
 0x215   : > { %p13_p5 = scmp.ge.s32.totalorder %s16_s23, 4   ;;  %s727_s22 = smov %s729_s24 }
 0x217   :  { %15 = sbr.rel (!%p13_p5) target bundleno = 2 (0x2), region = 77 }

// kernel: asr_cif_forward.15
= control target key start
LH: loop header
LB: loop body
LE: loop exit
PB: predicated region body
PF: predicated region fallthrough
CT: control target
= control target key end

     0   :  { %vm31_vm0 = vcmask 261120   ;;  %vm201_vm1 = vcmask 781312   ;;  %s329_s0 = inlined_call_operand.vmem [shape: bf16[32,32], index: 0, kind: input, shape index: {}]   ;;  %s330_s3 = inlined_call_operand.vmem [shape: bf16[32,96], index: 3, kind: input, shape index: {}]   ;;  %s331_s1 = inlined_call_operand.vmem [shape: f32[1,32], index: 1, kind: input, shape index: {}]   ;;  %s332_s2 = inlined_call_operand.vmem [shape: f32[1,32], index: 2, kind: input, shape index: {}]   ;;  %s333_s4 = inlined_call_operand.vmem [shape: f32[1,96], index: 4, kind: input, shape index: {}]   ;;  %s334_s5 = inlined_call_operand.vmem [shape: bf16[32,96], index: 5, kind: output, shape index: {}]  }
   0x1   :  { %v226_v0 = vld [vmem:[%s329_s0] sm:$0xff]   ;;  %v233_v1 = vld [vmem:[%s329_s0 + $0x8] sm:$0xff]  }
   0x2   :  { %v227_v2 = vunpack.c.l.bf16 %v226_v0  ;;  %v231_v3 = vunpack.c.l.bf16 %v233_v1  ;;  %v228_v4 = vunpack.c.h.bf16 %v226_v0  ;;  %v232_v5 = vunpack.c.h.bf16 %v233_v1  ;;  %v246_v30 = vld [vmem:[%s330_s3 + $0x8] sm:$0xff]   ;;  %v247_v31 = vld [vmem:[%s330_s3] sm:$0xff]  }
   0x3   :  { %238 = vmatprep.subr.bf16.mxu0 %v246_v30  ;;  %v210_v46 = vld [vmem:[%s331_s1] ss:$0 sm:$0xff] }
   0x4   :  { %v32_v6 = vsel %vm31_vm0, %v227_v2, 0.0  ;;  %v38_v7 = vsel %vm31_vm0, %v231_v3, 0.0  ;;  %v35_v8 = vsel %vm31_vm0, %v228_v4, 0.0  ;;  %v41_v9 = vsel %vm31_vm0, %v232_v5, 0.0  ;;  %239 = vmatpush3.bf16.msra.mxu0 %v246_v30  ;;  %v211_v51 = vld [vmem:[%s332_s2] ss:$0 sm:$0xff] }
   0x5   :  { %33 = vadd.xlane.f32.xlu0 %v32_v6  ;;  %39 = vadd.xlane.f32.xlu1 %v38_v7  ;;  %v212_v0 = vld [vmem:[%s333_s4] ss:$0 sm:$0xff] }
   0x6   :  { %240 = vmatprep.subr.bf16.mxu0 %v247_v31 }
   0x8   :  { %241 = vmatpush3.bf16.msra.mxu0 %v247_v31 }
   0x9   :  { %36 = vadd.xlane.f32.xlu0 %v35_v8  ;;  %42 = vadd.xlane.f32.xlu1 %v41_v9 }
  0x8e   :  { %v34_v10 = vpop.xlane.xlu0 %33  ;;  %v40_v11 = vpop.xlane.xlu1 %39 }
  0x8f   :  { %v45_v12 = vmul.f32 0.03125, %v34_v10  ;;  %v47_v13 = vmul.f32 0.03125, %v40_v11 }
  0x91   :  { %v49_v14 = vsub.f32 %v227_v2, %v45_v12  ;;  %v51_v15 = vsub.f32 %v231_v3, %v47_v13 }
  0x92   :  { %v37_v16 = vpop.xlane.xlu0 %36  ;;  %v43_v17 = vpop.xlane.xlu1 %42 }
  0x93   :  { %v46_v18 = vmul.f32 0.03125, %v37_v16  ;;  %v48_v19 = vmul.f32 0.03125, %v43_v17  ;;  %v53_v20 = vmul.f32 %v49_v14, %v49_v14  ;;  %v55_v21 = vmul.f32 %v51_v15, %v51_v15 }
  0x95   :  { %v50_v22 = vsub.f32 %v228_v4, %v46_v18  ;;  %v52_v23 = vsub.f32 %v232_v5, %v48_v19  ;;  %v57_v24 = vsel %vm31_vm0, %v53_v20, 0.0  ;;  %v63_v25 = vsel %vm31_vm0, %v55_v21, 0.0 }
  0x96   :  { %58 = vadd.xlane.f32.xlu0 %v57_v24 }
  0x97   :  { %v54_v26 = vmul.f32 %v50_v22, %v50_v22  ;;  %v56_v27 = vmul.f32 %v52_v23, %v52_v23 }
  0x99   :  { %v60_v28 = vsel %vm31_vm0, %v54_v26, 0.0  ;;  %v66_v29 = vsel %vm31_vm0, %v56_v27, 0.0 }
  0x9a   :  { %64 = vadd.xlane.f32.xlu0 %v63_v25  ;;  %61 = vadd.xlane.f32.xlu1 %v60_v28 }
  0x9e   :  { %67 = vadd.xlane.f32.xlu1 %v66_v29 }
 0x11f   :  { %v59_v32 = vpop.xlane.xlu0 %58 }
 0x120   :  { %v69_v33 = vmul.f32 0.03125, %v59_v32 }
 0x122   :  { %v73_v34 = vadd.f32 1e-05, %v69_v33 }
 0x123   :  { %v62_v35 = vpop.xlane.xlu1 %61  ;;  %v65_v36 = vpop.xlane.xlu0 %64 }
 0x124   :  { %248 = vrsqrt.f32 %v73_v34  ;;  %v70_v37 = vmul.f32 0.03125, %v62_v35  ;;  %v71_v38 = vmul.f32 0.03125, %v65_v36 }
 0x126   :  { %v74_v39 = vadd.f32 1e-05, %v70_v37  ;;  %v75_v40 = vadd.f32 1e-05, %v71_v38 }
 0x127   :  { %v68_v41 = vpop.xlane.xlu1 %67 }
 0x128   :  { %250 = vrsqrt.f32 %v74_v39  ;;  %v72_v42 = vmul.f32 0.03125, %v68_v41 }
 0x129   :  { %252 = vrsqrt.f32 %v75_v40 }
 0x12a   :  { %v76_v43 = vadd.f32 1e-05, %v72_v42 }
 0x12c   :  { %254 = vrsqrt.f32 %v76_v43 }
 0x131   :  { %v249_v44 = vpop.eup %248 }
 0x132   :  { %v81_v45 = vmul.f32 %v249_v44, %v49_v14 }
 0x134   :  { %v91_v50 = vmul.f32 %v210_v46, %v81_v45 }
 0x135   :  { %v251_v47 = vpop.eup %250 }
 0x136   :  { %v253_v48 = vpop.eup %252  ;;  %v82_v49 = vmul.f32 %v251_v47, %v50_v22  ;;  %v101_v55 = vadd.f32 %v211_v51, %v91_v50 }
 0x137   :  { %v83_v52 = vmul.f32 %v253_v48, %v51_v15 }
 0x138   :  { %v92_v53 = vmul.f32 %v210_v46, %v82_v49 }
 0x139   :  { %v255_v54 = vpop.eup %254  ;;  %v93_v58 = vmul.f32 %v210_v46, %v83_v52 }
 0x13a   :  { %v102_v56 = vadd.f32 %v211_v51, %v92_v53  ;;  %v84_v57 = vmul.f32 %v255_v54, %v52_v23 }
 0x13b   :  { %v103_v61 = vadd.f32 %v211_v51, %v93_v58 }
 0x13c   :  { %v105_v59 = vpack.c.bf16 %v102_v56, %v101_v55  ;;  %v94_v60 = vmul.f32 %v210_v46, %v84_v57 }
 0x13e   :  { %242 = vmatprep.mubr.msk.bf16.mxu0 %vm31_vm0, %v105_v59  ;;  %v104_v62 = vadd.f32 %v211_v51, %v94_v60 }
 0x140   :  { %v106_v63 = vpack.c.bf16 %v104_v62, %v103_v61 }
 0x142   :  { %243 = vmatmul.mubr.msk.bf16.vlgmr.msra.gmra.mxu0 %vm31_vm0, %v106_v63 }
 0x202   :  { %v244_v1 = vpop.f32.mrf.mxu0 }
 0x203   :  { %v179_v2 = vadd.f32 %v244_v1, %v212_v0 }
 0x204   :  { %v170_v3 = vpop.f32.mrf.mxu0 }
 0x205   :  { %v223_v4 = vpack.c.bf16 %v179_v2, %v179_v2  ;;  %v171_v5 = vadd.f32 %v212_v0, %v170_v3 }
 0x206   :  { %v245_v6 = vpop.f32.mrf.mxu0 }
 0x207   :  { %204 = vst.msk [vmem:[%s334_s5 + $0x8] sm:$0xf] %vm201_vm1, %v223_v4  ;;  %v221_v7 = vpack.c.bf16 %v171_v5, %v171_v5  ;;  %v182_v8 = vadd.f32 %v245_v6, %v212_v0 }
 0x208   :  { %v173_v9 = vpop.f32.mrf.mxu0 }
 0x209   :  { %202 = vst.msk [vmem:[%s334_s5] sm:$0xf] %vm201_vm1, %v221_v7  ;;  %v224_v10 = vpack.c.bf16 %v182_v8, %v182_v8  ;;  %v174_v11 = vadd.f32 %v212_v0, %v173_v9 }
 0x20b   :  { %205 = vst.msk [vmem:[%s334_s5 + $0xc] sm:$0xf] %vm201_vm1, %v224_v10  ;;  %v222_v12 = vpack.c.bf16 %v174_v11, %v174_v11 }
 0x20d   :  { %203 = vst.msk [vmem:[%s334_s5 + $0x4] sm:$0xf] %vm201_vm1, %v222_v12 }

// kernel: asr_cif_forward.17
= control target key start
LH: loop header
LB: loop body
LE: loop exit
PB: predicated region body
PF: predicated region fallthrough
CT: control target
= control target key end

     0   :  { %vm43_vm0 = vcmask 261120   ;;  %vm242_vm1 = vcmask 523264   ;;  %vm392_vm2 = vcmask 257024   ;;  %s632_s0 = inlined_call_operand.vmem [shape: bf16[32,32], index: 0, kind: input, shape index: {}]   ;;  %s633_s3 = inlined_call_operand.vmem [shape: bf16[32,64], index: 3, kind: input, shape index: {}]   ;;  %s634_s5 = inlined_call_operand.vmem [shape: bf16[64,32], index: 5, kind: input, shape index: {}]   ;;  %s635_s1 = inlined_call_operand.vmem [shape: f32[1,32], index: 1, kind: input, shape index: {}, may-alias: {1,7}]   ;;  %s636_s2 = inlined_call_operand.vmem [shape: f32[1,32], index: 2, kind: input, shape index: {}, may-alias: {2,6,8}]   ;;  %s637_s4 = inlined_call_operand.vmem [shape: f32[1,64], index: 4, kind: input, shape index: {}]   ;;  %s638_s6 = inlined_call_operand.vmem [shape: f32[1,32], index: 6, kind: input, shape index: {}, may-alias: {2,6,8}]   ;;  %s639_s7 = inlined_call_operand.vmem [shape: f32[1,32], index: 7, kind: input, shape index: {}, may-alias: {1,7}]   ;;  %s640_s8 = inlined_call_operand.vmem [shape: f32[1,32], index: 8, kind: input, shape index: {}, may-alias: {2,6,8}]   ;;  %s641_s9 = inlined_call_operand.vmem [shape: bf16[32,32], index: 9, kind: output, shape index: {}]  }
   0x1   :  { %v426_v0 = vld [vmem:[%s632_s0] sm:$0xff]   ;;  %v433_v1 = vld [vmem:[%s632_s0 + $0x8] sm:$0xff]   ;;  %v466_v32 = vld [vmem:[%s634_s5 + $0x18] sm:$0xff]  }
   0x2   :  { %v542_v2 = vunpack.c.l.bf16 %v426_v0  ;;  %v544_v3 = vunpack.c.l.bf16 %v433_v1  ;;  %v546_v4 = vunpack.c.h.bf16 %v426_v0  ;;  %v548_v5 = vunpack.c.h.bf16 %v433_v1  ;;  %v464_v30 = vld [vmem:[%s633_s3 + $0x8] sm:$0xff]   ;;  %v465_v31 = vld [vmem:[%s633_s3] sm:$0xff]   ;;  %452 = vmatprep.subr.bf16.mxu1 %v466_v32  ;;  %v467_v1 = vld [vmem:[%s634_s5 + $0x10] sm:$0xff]  }
   0x3   :  { %444 = vmatprep.subr.bf16.mxu0 %v464_v30  ;;  %453 = vmatpush3.bf16.msra.mxu1 %v466_v32  ;;  %v401_v47 = vld [vmem:[%s635_s1] ss:$0 sm:$0xff] }
   0x4   :  { %v44_v6 = vsel %vm43_vm0, %v542_v2, 0.0  ;;  %v50_v7 = vsel %vm43_vm0, %v544_v3, 0.0  ;;  %v47_v8 = vsel %vm43_vm0, %v546_v4, 0.0  ;;  %v53_v9 = vsel %vm43_vm0, %v548_v5, 0.0  ;;  %445 = vmatpush3.bf16.msra.mxu0 %v464_v30  ;;  %v402_v52 = vld [vmem:[%s636_s2] ss:$0 sm:$0xff]  ;;  %454 = vmatprep.subr.bf16.mxu1 %v467_v1 }
   0x5   :  { %45 = vadd.xlane.f32.xlu0 %v44_v6  ;;  %51 = vadd.xlane.f32.xlu1 %v50_v7  ;;  %v468_v6 = vld [vmem:[%s634_s5 + $0x8] sm:$0xff]   ;;  %v469_v7 = vld [vmem:[%s634_s5] sm:$0xff]  }
   0x6   :  { %446 = vmatprep.subr.bf16.mxu0 %v465_v31 }
   0x7   :  { %455 = vmatpush3.bf16.msra.mxu1 %v467_v1 }
   0x8   :  { %447 = vmatpush3.bf16.msra.mxu0 %v465_v31  ;;  %456 = vmatprep.subr.bf16.mxu1 %v468_v6 }
   0x9   :  { %48 = vadd.xlane.f32.xlu0 %v47_v8  ;;  %54 = vadd.xlane.f32.xlu1 %v53_v9 }
   0xb   :  { %457 = vmatpush3.bf16.msra.mxu1 %v468_v6 }
   0xc   :  { %458 = vmatprep.subr.bf16.mxu1 %v469_v7 }
   0xf   :  { %459 = vmatpush3.bf16.msra.mxu1 %v469_v7 }
  0x8e   :  { %v46_v10 = vpop.xlane.xlu0 %45  ;;  %v52_v11 = vpop.xlane.xlu1 %51 }
  0x8f   :  { %v57_v12 = vmul.f32 0.03125, %v46_v10  ;;  %v59_v13 = vmul.f32 0.03125, %v52_v11  ;;  %v403_v10 = vld [vmem:[%s637_s4] ss:$0 sm:$0xff] }
  0x91   :  { %v61_v14 = vsub.f32 %v542_v2, %v57_v12  ;;  %v63_v15 = vsub.f32 %v544_v3, %v59_v13 }
  0x92   :  { %v49_v16 = vpop.xlane.xlu0 %48  ;;  %v55_v17 = vpop.xlane.xlu1 %54 }
  0x93   :  { %v58_v18 = vmul.f32 0.03125, %v49_v16  ;;  %v60_v19 = vmul.f32 0.03125, %v55_v17  ;;  %v65_v20 = vmul.f32 %v61_v14, %v61_v14  ;;  %v67_v21 = vmul.f32 %v63_v15, %v63_v15 }
  0x95   :  { %v62_v22 = vsub.f32 %v546_v4, %v58_v18  ;;  %v64_v23 = vsub.f32 %v548_v5, %v60_v19  ;;  %v69_v24 = vsel %vm43_vm0, %v65_v20, 0.0  ;;  %v75_v25 = vsel %vm43_vm0, %v67_v21, 0.0 }
  0x96   :  { %70 = vadd.xlane.f32.xlu0 %v69_v24  ;;  %v408_v24 = vld [vmem:[%s638_s6] ss:$0 sm:$0xff] }
  0x97   :  { %v66_v26 = vmul.f32 %v62_v22, %v62_v22  ;;  %v68_v27 = vmul.f32 %v64_v23, %v64_v23 }
  0x99   :  { %v72_v28 = vsel %vm43_vm0, %v66_v26, 0.0  ;;  %v78_v29 = vsel %vm43_vm0, %v68_v27, 0.0 }
  0x9a   :  { %76 = vadd.xlane.f32.xlu0 %v75_v25  ;;  %73 = vadd.xlane.f32.xlu1 %v72_v28 }
  0x9e   :  { %79 = vadd.xlane.f32.xlu1 %v78_v29 }
 0x11f   :  { %v71_v33 = vpop.xlane.xlu0 %70 }
 0x120   :  { %v81_v34 = vmul.f32 0.03125, %v71_v33 }
 0x122   :  { %v85_v35 = vadd.f32 1e-05, %v81_v34 }
 0x123   :  { %v74_v36 = vpop.xlane.xlu1 %73  ;;  %v77_v37 = vpop.xlane.xlu0 %76 }
 0x124   :  { %470 = vrsqrt.f32 %v85_v35  ;;  %v82_v38 = vmul.f32 0.03125, %v74_v36  ;;  %v83_v39 = vmul.f32 0.03125, %v77_v37 }
 0x126   :  { %v86_v40 = vadd.f32 1e-05, %v82_v38  ;;  %v87_v41 = vadd.f32 1e-05, %v83_v39 }
 0x127   :  { %v80_v42 = vpop.xlane.xlu1 %79 }
 0x128   :  { %472 = vrsqrt.f32 %v86_v40  ;;  %v84_v43 = vmul.f32 0.03125, %v80_v42 }
 0x129   :  { %474 = vrsqrt.f32 %v87_v41 }
 0x12a   :  { %v88_v44 = vadd.f32 1e-05, %v84_v43 }
 0x12c   :  { %476 = vrsqrt.f32 %v88_v44 }
 0x131   :  { %v471_v45 = vpop.eup %470 }
 0x132   :  { %v93_v46 = vmul.f32 %v471_v45, %v61_v14 }
 0x134   :  { %v103_v51 = vmul.f32 %v401_v47, %v93_v46 }
 0x135   :  { %v473_v48 = vpop.eup %472 }
 0x136   :  { %v475_v49 = vpop.eup %474  ;;  %v94_v50 = vmul.f32 %v473_v48, %v62_v22  ;;  %v113_v56 = vadd.f32 %v402_v52, %v103_v51 }
 0x137   :  { %v95_v53 = vmul.f32 %v475_v49, %v63_v15 }
 0x138   :  { %v104_v54 = vmul.f32 %v401_v47, %v94_v50 }
 0x139   :  { %v477_v55 = vpop.eup %476  ;;  %v105_v59 = vmul.f32 %v401_v47, %v95_v53 }
 0x13a   :  { %v114_v57 = vadd.f32 %v402_v52, %v104_v54  ;;  %v96_v58 = vmul.f32 %v477_v55, %v64_v23 }
 0x13b   :  { %v115_v62 = vadd.f32 %v402_v52, %v105_v59 }
 0x13c   :  { %v117_v60 = vpack.c.bf16 %v114_v57, %v113_v56  ;;  %v106_v61 = vmul.f32 %v401_v47, %v96_v58 }
 0x13e   :  { %448 = vmatprep.mubr.msk.bf16.mxu0 %vm43_vm0, %v117_v60  ;;  %v116_v63 = vadd.f32 %v402_v52, %v106_v61 }
 0x140   :  { %v118_v0 = vpack.c.bf16 %v116_v63, %v115_v62 }
 0x142   :  { %449 = vmatmul.mubr.msk.bf16.vlgmr.msra.gmra.mxu0 %vm43_vm0, %v118_v0 }
 0x202   :  { %v450_v8 = vpop.f32.mrf.mxu0 }
 0x203   :  { %v191_v14 = vadd.f32 %v450_v8, %v403_v10 }
 0x204   :  { %v182_v9 = vpop.f32.mrf.mxu0 }
 0x205   :  { %v183_v12 = vadd.f32 %v403_v10, %v182_v9  ;;  %v199_v20 = vmax.f32 %v191_v14, 0.0  ;;  %v415_v9 = vld [vmem:[%s639_s7] ss:$0 sm:$0xff] }
 0x206   :  { %v451_v11 = vpop.f32.mrf.mxu0 }
 0x207   :  { %v194_v13 = vadd.f32 %v451_v11, %v403_v10  ;;  %v197_v18 = vmax.f32 %v183_v12, 0.0  ;;  %v416_v11 = vld [vmem:[%s640_s8] ss:$0 sm:$0xff] }
 0x208   :  { %v185_v15 = vpop.f32.mrf.mxu0 }
 0x209   :  { %v186_v16 = vadd.f32 %v403_v10, %v185_v15  ;;  %v200_v17 = vmax.f32 %v194_v13, 0.0 }
 0x20b   :  { %v198_v19 = vmax.f32 %v186_v16, 0.0  ;;  %v202_v22 = vpack.c.bf16 %v200_v17, %v199_v20 }
 0x20d   :  { %v201_v21 = vpack.c.bf16 %v198_v19, %v197_v18 }
 0x20f   :  { %460 = vmatprep.mubr.msk.bf16.mxu1 %vm242_vm1, %v201_v21 }
 0x210   :  { %461 = vmatmul.mubr.msk.bf16.vlgmr.msra.gmra.mxu1 %vm242_vm1, %v202_v22 }
 0x2d0   :  { %v462_v23 = vpop.f32.mrf.mxu1 }
 0x2d1   :  { %v292_v26 = vadd.f32 %v462_v23, %v408_v24 }
 0x2d2   :  { %v283_v25 = vpop.f32.mrf.mxu1 }
 0x2d3   :  { %v284_v27 = vadd.f32 %v408_v24, %v283_v25  ;;  %v300_v34 = vadd.f32 %v544_v3, %v292_v26 }
 0x2d4   :  { %v463_v28 = vpop.f32.mrf.mxu1 }
 0x2d5   :  { %v298_v29 = vadd.f32 %v542_v2, %v284_v27  ;;  %v295_v31 = vadd.f32 %v463_v28, %v408_v24  ;;  %v310_v37 = vsel %vm43_vm0, %v300_v34, 0.0 }
 0x2d6   :  { %v286_v30 = vpop.f32.mrf.mxu1 }
 0x2d7   :  { %v287_v32 = vadd.f32 %v408_v24, %v286_v30  ;;  %v304_v33 = vsel %vm43_vm0, %v298_v29, 0.0  ;;  %v301_v38 = vadd.f32 %v548_v5, %v295_v31 }
 0x2d8   :  { %305 = vadd.xlane.f32.xlu0 %v304_v33 }
 0x2d9   :  { %v299_v35 = vadd.f32 %v546_v4, %v287_v32  ;;  %v313_v2 = vsel %vm43_vm0, %v301_v38, 0.0 }
 0x2db   :  { %v307_v36 = vsel %vm43_vm0, %v299_v35, 0.0 }
 0x2dc   :  { %308 = vadd.xlane.f32.xlu1 %v307_v36  ;;  %311 = vadd.xlane.f32.xlu0 %v310_v37 }
 0x2e0   :  { %314 = vadd.xlane.f32.xlu1 %v313_v2 }
 0x361   :  { %v306_v39 = vpop.xlane.xlu0 %305 }
 0x362   :  { %v316_v40 = vmul.f32 0.03125, %v306_v39 }
 0x364   :  { %v320_v41 = vsub.f32 %v298_v29, %v316_v40 }
 0x365   :  { %v309_v42 = vpop.xlane.xlu1 %308  ;;  %v312_v43 = vpop.xlane.xlu0 %311 }
 0x366   :  { %v317_v3 = vmul.f32 0.03125, %v309_v42  ;;  %v318_v44 = vmul.f32 0.03125, %v312_v43  ;;  %v324_v45 = vmul.f32 %v320_v41, %v320_v41 }
 0x368   :  { %v321_v4 = vsub.f32 %v299_v35, %v317_v3  ;;  %v322_v46 = vsub.f32 %v300_v34, %v318_v44  ;;  %v328_v47 = vsel %vm43_vm0, %v324_v45, 0.0 }
 0x369   :  { %v315_v48 = vpop.xlane.xlu1 %314  ;;  %329 = vadd.xlane.f32.xlu0 %v328_v47 }
 0x36a   :  { %v319_v5 = vmul.f32 0.03125, %v315_v48  ;;  %v325_v49 = vmul.f32 %v321_v4, %v321_v4  ;;  %v326_v50 = vmul.f32 %v322_v46, %v322_v46 }
 0x36c   :  { %v323_v51 = vsub.f32 %v301_v38, %v319_v5  ;;  %v331_v52 = vsel %vm43_vm0, %v325_v49, 0.0  ;;  %v334_v53 = vsel %vm43_vm0, %v326_v50, 0.0 }
 0x36d   :  { %332 = vadd.xlane.f32.xlu1 %v331_v52  ;;  %335 = vadd.xlane.f32.xlu0 %v334_v53 }
 0x36e   :  { %v327_v54 = vmul.f32 %v323_v51, %v323_v51 }
 0x370   :  { %v337_v55 = vsel %vm43_vm0, %v327_v54, 0.0 }
 0x371   :  { %338 = vadd.xlane.f32.xlu1 %v337_v55 }
 0x3f2   :  { %v330_v56 = vpop.xlane.xlu0 %329 }
 0x3f3   :  { %v340_v57 = vmul.f32 0.03125, %v330_v56 }
 0x3f5   :  { %v344_v58 = vadd.f32 1e-05, %v340_v57 }
 0x3f6   :  { %v333_v59 = vpop.xlane.xlu1 %332  ;;  %v336_v60 = vpop.xlane.xlu0 %335 }
 0x3f7   :  { %478 = vrsqrt.f32 %v344_v58  ;;  %v341_v61 = vmul.f32 0.03125, %v333_v59  ;;  %v342_v62 = vmul.f32 0.03125, %v336_v60 }
 0x3f9   :  { %v345_v63 = vadd.f32 1e-05, %v341_v61  ;;  %v346_v0 = vadd.f32 1e-05, %v342_v62 }
 0x3fa   :  { %v339_v1 = vpop.xlane.xlu1 %338 }
 0x3fb   :  { %480 = vrsqrt.f32 %v345_v63  ;;  %v343_v6 = vmul.f32 0.03125, %v339_v1 }
 0x3fc   :  { %482 = vrsqrt.f32 %v346_v0 }
 0x3fd   :  { %v347_v7 = vadd.f32 1e-05, %v343_v6 }
 0x3ff   :  { %484 = vrsqrt.f32 %v347_v7 }
 0x404   :  { %v479_v8 = vpop.eup %478 }
 0x405   :  { %v352_v10 = vmul.f32 %v479_v8, %v320_v41 }
 0x407   :  { %v362_v12 = vmul.f32 %v415_v9, %v352_v10 }
 0x408   :  { %v481_v13 = vpop.eup %480 }
 0x409   :  { %v483_v14 = vpop.eup %482  ;;  %v372_v15 = vadd.f32 %v416_v11, %v362_v12  ;;  %v353_v16 = vmul.f32 %v481_v13, %v321_v4 }
 0x40a   :  { %v354_v17 = vmul.f32 %v483_v14, %v322_v46 }
 0x40b   :  { %v421_v18 = vpack.c.bf16 %v372_v15, %v372_v15  ;;  %v363_v19 = vmul.f32 %v415_v9, %v353_v16 }
 0x40c   :  { %v485_v20 = vpop.eup %484  ;;  %v364_v21 = vmul.f32 %v415_v9, %v354_v17 }
 0x40d   :  { %393 = vst.msk [vmem:[%s641_s9] sm:$0xf] %vm392_vm2, %v421_v18  ;;  %v373_v22 = vadd.f32 %v416_v11, %v363_v19  ;;  %v355_v23 = vmul.f32 %v485_v20, %v323_v51 }
 0x40e   :  { %v374_v24 = vadd.f32 %v416_v11, %v364_v21 }
 0x40f   :  { %v422_v25 = vpack.c.bf16 %v373_v22, %v373_v22  ;;  %v365_v26 = vmul.f32 %v415_v9, %v355_v23 }
 0x410   :  { %v423_v27 = vpack.c.bf16 %v374_v24, %v374_v24 }
 0x411   :  { %394 = vst.msk [vmem:[%s641_s9 + $0x4] sm:$0xf] %vm392_vm2, %v422_v25  ;;  %v375_v28 = vadd.f32 %v416_v11, %v365_v26 }
 0x412   :  { %395 = vst.msk [vmem:[%s641_s9 + $0x8] sm:$0xf] %vm392_vm2, %v423_v27 }
 0x413   :  { %v424_v29 = vpack.c.bf16 %v375_v28, %v375_v28 }
 0x415   :  { %396 = vst.msk [vmem:[%s641_s9 + $0xc] sm:$0xf] %vm392_vm2, %v424_v29 }

// kernel: asr_cif_forward.27
= control target key start
LH: loop header
LB: loop body
LE: loop exit
PB: predicated region body
PF: predicated region fallthrough
CT: control target
= control target key end

     0   :  { %s685_s15 = smov 0   ;;  %s687_s16 = smov 0   ;;  %s741_s0 = inlined_call_operand.vmem [shape: bf16[2,16,32], index: 0, kind: input, shape index: {}]   ;;  %s742_s1 = inlined_call_operand.vmem [shape: bf16[32,16], index: 1, kind: input, shape index: {}]   ;;  %s743_s2 = inlined_call_operand.vmem [shape: f32[1,16], index: 2, kind: input, shape index: {}]   ;;  %s744_s3 = inlined_call_operand.vmem [shape: s32[2,1,13], index: 3, kind: input, shape index: {}]   ;;  %s745_s4 = inlined_call_operand.vmem [shape: f32[2,16,13], index: 4, kind: output, shape index: {}]  }
   0x1   :  { %s689_s17 = smov 0  }
   0x2 LB: > { %s26_s18 = sadd.s32 1, %s651_s16  ;;  %p552_p0 = scmp.ge.s32.totalorder %s655_s17, 1  ;;  %s655_s17 = sphi %s689_s17, %s14_s17   ;;  %s651_s16 = sphi %s687_s16, %s747_s16   ;;  %s647_s15 = sphi %s685_s15, %s746_s15  }
   0x3   : > { %p28_p1 = scmp.ge.s32.totalorder %s26_s18, 2  ;;  %p191_p2 = scmp.lt.s32.totalorder %s655_s17, 3 }
   0x5   : > { %s749_s18 = smov (%p28_p1, %s26_s18), 0  ;;  %p192_p3 = pnand %p552_p0, %p191_p2 }
   0x6   : > { %p229_p4 = scmp.lt.s32.totalorder (!%p192_p3), %s647_s15, 1 }
   0x7   : > { %195 = sbr.rel (%p192_p3) target bundleno = 537 (0x219), region = 36 }
   0xc   : > { %v622_v0 = vld [vmem:[%s742_s1 + $0x8] sm:$0xff]   ;;  %v657_v1 = vmov 0.0   ;;  %v623_v2 = vld [vmem:[%s742_s1] sm:$0xff]   ;;  %vm658_vm0 = vmmov 0   ;;  %s751_s15 = smov (!%p229_p4, %s647_s15), 1  ;;  %vm282_vm1 = vcmask 261120   ;;  %v352_v4 = vlaneseq }
   0xd   : > { %580 = vmatprep.subr.bf16.mxu0 %v657_v1  ;;  %584 = vmatprep.mubr.msk.bf16.mxu0 %vm658_vm0, %v657_v1  ;;  %s571_s23 = sshll.u32 %s751_s15, 3  ;;  %s240_s29 = scalar_lea.vmem %s744_s3, %s751_s15  ;;  %v659_v8 = vmov 1.0   ;;  %v557_v9 = vld [vmem:[%s743_s2] ss:$0 sm:$0xff]  ;;  %vm327_vm4 = vcmask 130048   ;;  %vm449_vm5 = vcmask 105472  }
   0xe   : > { %581 = vmatpush3.bf16.msra.mxu0 %v622_v0  ;;  %s236_s26 = scalar_lea.vmem %s741_s0, %s571_s23  ;;  %v353_v5 = vshrl.u32 %v352_v4, 7  ;;  %v562_v7 = vld [vmem:[%s240_s29] ss:$0 sm:$0xff]  ;;  %s572_s6 = sshll.u32 %s751_s15, 4 }
   0xf   : > { %582 = vmatprep.subr.bf16.mxu0 %v657_v1  ;;  %v624_v3 = vld [vmem:[%s236_s26] sm:$0xff]   ;;  %s249_s9 = scalar_lea.vmem %s745_s4, %s572_s6 }
  0x10   : > { %v354_v6 = vadd.s32 8, %v353_v5  ;;  %vm360_vm2 = vcmp.eq.s32.totalorder %v353_v5, %v562_v7 }
  0x12   : > { %583 = vmatpush3.bf16.msra.mxu0 %v623_v2  ;;  %vm361_vm3 = vcmp.eq.s32.totalorder %v354_v6, %v562_v7 }
  0x13   : > { %588 = vmatprep.subr.msk.mxu1 %vm361_vm3, %v659_v8 }
  0x14   : > { %589 = vmatpush3.msk.msra.mxu1 %vm361_vm3, %v659_v8 }
  0x15   : > { %585 = vmatmul.mubr.msk.bf16.vlgmr.msra.gmra.mxu0 %vm282_vm1, %v624_v3  ;;  %590 = vmatprep.subr.msk.mxu1 %vm360_vm2, %v659_v8 }
  0x16   : > { %591 = vmatpush3.msk.msra.mxu1 %vm360_vm2, %v659_v8 }
  0xd5   : > { %v320_v10 = vpop.f32.mrf.mxu0 }
  0xd6   : > { %v321_v11 = vadd.f32 %v557_v9, %v320_v10 }
  0xd7   : > { %v586_v12 = vpop.f32.mrf.mxu0 }
  0xd8   : > { %592 = vmatprep.mubr.msk.f32.mxu1 %vm327_vm4, %v321_v11  ;;  %v328_v13 = vsel %vm327_vm4, %v321_v11, -inf }
  0xd9   : > { %329 = vmax.xlane.f32.xlu0 %v328_v13  ;;  %v323_v14 = vpop.f32.mrf.mxu0 }
  0xda   : > { %v324_v15 = vadd.f32 %v557_v9, %v323_v14 }
  0xdb   : > { %v587_v16 = vpop.f32.mrf.mxu0 }
  0xdc   : > { %593 = vmatmul.mubr.msk.f32.vlgmr.msra.gmra.mxu1 %vm327_vm4, %v324_v15  ;;  %v331_v17 = vsel %vm327_vm4, %v324_v15, -inf }
  0xdd   : > { %332 = vmax.xlane.f32.xlu0 %v331_v17 }
 0x162   : > { %v330_v18 = vpop.xlane.xlu0 %329 }
 0x163   : > { %v334_v19 = vsub.f32 %v321_v11, %v330_v18 }
 0x165   : > { %v336_v20 = vmul.f32 1.442695, %v334_v19 }
 0x166   : > { %v333_v21 = vpop.xlane.xlu0 %332 }
 0x167   : > { %625 = vpow2.f32 %v336_v20  ;;  %v335_v22 = vsub.f32 %v324_v15, %v333_v21 }
 0x169   : > { %v338_v23 = vmul.f32 1.442695, %v335_v22 }
 0x16b   : > { %627 = vpow2.f32 %v338_v23 }
 0x174   : > { %v626_v24 = vpop.eup %625 }
 0x175   : > { %v340_v25 = vsel %vm327_vm4, %v626_v24, 0.0 }
 0x176   : > { %341 = vadd.xlane.f32.xlu1 %v340_v25 }
 0x178   : > { %v628_v26 = vpop.eup %627 }
 0x179   : > { %v343_v27 = vsel %vm327_vm4, %v628_v26, 0.0 }
 0x17a   : > { %344 = vadd.xlane.f32.xlu1 %v343_v27 }
 0x19c   : > { %v594_v31 = vpop.f32.mrf.mxu1 }
 0x19e   : > { %v438_v35 = vpop.f32.mrf.mxu1 }
 0x1ff   : > { %v342_v28 = vpop.xlane.xlu1 %341 }
 0x200   : > { %629 = vlog2.f32 %v342_v28 }
 0x203   : > { %v345_v29 = vpop.xlane.xlu1 %344 }
 0x204   : > { %631 = vlog2.f32 %v345_v29 }
 0x20d   : > { %v630_v30 = vpop.eup %629 }
 0x20e   : > { %v347_v32 = vmul.f32 0.6931472, %v630_v30 }
 0x210   : > { %v350_v33 = vadd.f32 %v347_v32, %v330_v18 }
 0x211   : > { %v632_v34 = vpop.eup %631 }
 0x212   : > { %v447_v36 = vsub.f32 %v438_v35, %v350_v33  ;;  %v349_v37 = vmul.f32 0.6931472, %v632_v34 }
 0x214   : > { %450 = vst.msk [vmem:[%s249_s9] sm:$0xff] %vm449_vm5, %v447_v36  ;;  %v351_v38 = vadd.f32 %v349_v37, %v333_v21 }
 0x216   : > { %v448_v39 = vsub.f32 %v594_v31, %v351_v38 }
 0x218   : > { %451 = vst.msk [vmem:[%s249_s9 + $0x8] sm:$0xff] %vm449_vm5, %v448_v39 }
 0x219 PF: > { %s14_s17 = sadd.s32 1, %s655_s17   ;;  %s746_s15 = smov %s651_s16 }
 0x21a   : > { %p11_p5 = scmp.ge.s32.totalorder %s14_s17, 4   ;;  %s747_s16 = smov %s749_s18 }
 0x21c   :  { %13 = sbr.rel (!%p11_p5) target bundleno = 2 (0x2), region = 69 }

// kernel: asr_cif_forward.16
= control target key start
LH: loop header
LB: loop body
LE: loop exit
PB: predicated region body
PF: predicated region fallthrough
CT: control target
= control target key end

     0   :  { %s1807_s0 = inlined_call_operand.vmem [shape: s32[2], index: 0, kind: input, shape index: {}]   ;;  %s1808_s1 = inlined_call_operand.vmem [shape: bf16[2,4,16,8], index: 1, kind: input, shape index: {}]   ;;  %s1809_s2 = inlined_call_operand.vmem [shape: bf16[2,4,16,8], index: 2, kind: input, shape index: {}]   ;;  %s1810_s3 = inlined_call_operand.vmem [shape: bf16[2,4,16,8], index: 3, kind: input, shape index: {}]   ;;  %s1811_s4 = inlined_call_operand.vmem [shape: bf16[4,8,32], index: 4, kind: input, shape index: {}]   ;;  %s1812_s5 = inlined_call_operand.vmem [shape: f32[1,32], index: 5, kind: input, shape index: {}]   ;;  %s1813_s6 = inlined_call_operand.vmem [shape: bf16[2,16,32], index: 6, kind: input, shape index: {}]   ;;  %s1814_s7 = inlined_call_operand.vmem [shape: bf16[2,16,32], index: 7, kind: output, shape index: {}]  }
   0x1   :  { %s12_s26 = sshll.u32 %s1807_s0, 4  ;;  %s13_s26 = int_to_ptr.vmem [resolvable:$true] %s12_s26 }
   0x2   :  { %s1539_s27 = scalar_lea.vmem %s13_s26, 16  ;;  %p1544_p1 = scmp.lt.s32.totalorder %s13_s26, %s13_s26 }
   0x3   :  { %p1540_p0 = scmp.ne.s32.totalorder %s13_s26, %s1539_s27  ;;  %p1545_p2 = scmp.lt.s32.totalorder %s1539_s27, %s1539_s27 }
   0x5   :  { %p1546_p3 = por %p1545_p2, %p1544_p1 }
   0x7   :  { %p1547_p4 = pnand %p1546_p3, %p1540_p0 }
   0x9   :  { %1550 = shalt.err (!%p1547_p4)  }
   0xa   :  { %s1577_s28 = smov [#allocation3]  }
   0xb   :  { %15 = dma.vmem_to_smem %s13_s26, 16, %s1577_s28, [#allocation2] }
   0xc   :  { %1563 = dma.done.wait [#allocation2], 16 }
   0xd   :  { %1564 = vsyncadd [#allocation2], 4294967280 }
   0xe   :  { %17 = sfence }
   0xf   :  { %s1623_s29 = smov 0   ;;  %s1625_s30 = smov 0  }
  0x10   :  { %s1627_s8 = smov 0  }
  0x11 LB: > { %s35_s0 = sadd.s32 1, %s1571_s30  ;;  %p1321_p5 = scmp.ge.s32.totalorder %s1575_s8, 1  ;;  %s1575_s8 = sphi %s1627_s8, %s23_s8   ;;  %s1571_s30 = sphi %s1625_s30, %s1818_s30   ;;  %s1567_s29 = sphi %s1623_s29, %s1817_s29  }
  0x12   : > { %p37_p6 = scmp.ge.s32.totalorder %s35_s0, 2  ;;  %p277_p7 = scmp.lt.s32.totalorder %s1575_s8, 3 }
  0x14   : > { %s1820_s0 = smov (%p37_p6, %s35_s0), 0  ;;  %p278_p8 = pnand %p1321_p5, %p277_p7 }
  0x15   : > { %p335_p9 = scmp.lt.s32.totalorder (!%p278_p8), %s1567_s29, 1  ;;  %s375_s20 = sld [smem:[#allocation3 + %s1567_s29]] (!%p278_p8) }
  0x16   : > { %281 = sbr.rel (%p278_p8) target bundleno = 975 (0x3cf), region = 44 }
  0x1b   : > { %v1578_v0 = vmov 0.0   ;;  %s1647_s9 = scalar_select %p335_p9, %s1567_s29, 1  ;;  %vm1579_vm0 = vmmov 0   ;;  %vm410_vm1 = vcmask 64512   ;;  %v637_v13 = vlaneseq }
  0x1c   : > { %1396 = vmatprep.subr.bf16.mxu0 %v1578_v0  ;;  %1402 = vmatprep.subr.bf16.mxu1 %v1578_v0  ;;  %v639_v15 = vstv %s375_s20  ;;  %vm649_vm3 = vcmask 130048   ;;  %vm961_vm4 = vcmask 1043456   ;;  %vm1147_vm5 = vcmask 261120  }
  0x1d   : > { %1398 = vmatprep.mubr.msk.bf16.mxu0 %vm1579_vm0, %v1578_v0  ;;  %1404 = vmatprep.mubr.msk.bf16.mxu1 %vm1579_vm0, %v1578_v0  ;;  %s1361_s10 = sshll.u32 %s1647_s9, 5  ;;  %v638_v14 = vand.u32 127, %v637_v13  ;;  %s1364_s29 = sshll.u32 %s1647_s9, 3  ;;  %vm1185_vm6 = vcmask 257024  }
  0x1e   : > { %s348_s13 = scalar_lea.vmem %s1809_s2, %s1361_s10  ;;  %s342_s16 = scalar_lea.vmem %s1808_s1, %s1361_s10 }
  0x1f   : > { %v1495_v1 = vld [vmem:[%s348_s13] sm:$0xff]   ;;  %v1496_v2 = vld [vmem:[%s348_s13 + $0x8] sm:$0xff]   ;;  %v1499_v6 = vld [vmem:[%s348_s13 + $0x10] sm:$0xff]   ;;  %s1667_s19 = scalar_lea.vmem %s1810_s3, %s1361_s10  ;;  %vm1686_vm2 = vcmp.lt.s32.totalorder %v638_v14, %v639_v15  ;;  %s362_s12 = scalar_lea.vmem %s1813_s6, %s1364_s29 }
  0x20   : > { %v415_v3 = vsel %vm410_vm1, %v1495_v1, 0  ;;  %v472_v4 = vsel %vm410_vm1, %v1496_v2, 0  ;;  %v1497_v5 = vld [vmem:[%s342_s16] sm:$0xff]   ;;  %v1500_v7 = vld [vmem:[%s348_s13 + $0x18] sm:$0xff]   ;;  %v1498_v8 = vld [vmem:[%s342_s16 + $0x8] sm:$0xff]   ;;  %v529_v9 = vsel %vm410_vm1, %v1499_v6, 0  ;;  %s372_s17 = scalar_lea.vmem %s1814_s7, %s1364_s29 }
  0x21   : > { %1397 = vmatpush3.bf16.xpose.msra.mxu0 %v415_v3  ;;  %1403 = vmatpush3.bf16.xpose.msra.mxu1 %v472_v4  ;;  %v586_v10 = vsel %vm410_vm1, %v1500_v7, 0  ;;  %v1501_v11 = vld [vmem:[%s342_s16 + $0x10] sm:$0xff]   ;;  %v1502_v12 = vld [vmem:[%s342_s16 + $0x18] sm:$0xff]  }
  0x22   : > { %1408 = vmatprep.subr.bf16.mxu0 %v1578_v0  ;;  %1414 = vmatprep.subr.bf16.mxu1 %v1578_v0 }
  0x28   : > { %1399 = vmatmul.mubr.msk.bf16.vlgmr.msra.gmra.mxu0 %vm410_vm1, %v1497_v5  ;;  %1405 = vmatmul.mubr.msk.bf16.vlgmr.msra.gmra.mxu1 %vm410_vm1, %v1498_v8 }
  0x29   : > { %1409 = vmatpush3.bf16.xpose.msra.mxu0 %v529_v9  ;;  %1415 = vmatpush3.bf16.xpose.msra.mxu1 %v586_v10 }
  0x2a   : > { %1410 = vmatprep.mubr.msk.bf16.mxu0 %vm1579_vm0, %v1578_v0  ;;  %1416 = vmatprep.mubr.msk.bf16.mxu1 %vm1579_vm0, %v1578_v0 }
  0x2b   : > { %1420 = vmatprep.subr.bf16.mxu0 %v1578_v0  ;;  %1426 = vmatprep.subr.bf16.mxu1 %v1578_v0 }
  0x30   : > { %1411 = vmatmul.mubr.msk.bf16.vlgmr.msra.gmra.mxu0 %vm410_vm1, %v1501_v11  ;;  %1417 = vmatmul.mubr.msk.bf16.vlgmr.msra.gmra.mxu1 %vm410_vm1, %v1502_v12 }
  0x31   : > { %1422 = vmatprep.mubr.msk.bf16.mxu0 %vm1579_vm0, %v1578_v0  ;;  %1428 = vmatprep.mubr.msk.bf16.mxu1 %vm1579_vm0, %v1578_v0 }
  0xe8   : > { %v451_v16 = vpop.f32.mrf.mxu0  ;;  %v508_v19 = vpop.f32.mrf.mxu1 }
  0xe9   : > { %v629_v18 = vmul.f32 0.35355338, %v451_v16  ;;  %v631_v20 = vmul.f32 0.35355338, %v508_v19 }
  0xea   : > { %v1400_v21 = vpop.f32.mrf.mxu0  ;;  %v1406_v22 = vpop.f32.mrf.mxu1 }
  0xeb   : > { %v641_v23 = vsel %vm1686_vm2, %v629_v18, -1e+30  ;;  %v643_v25 = vsel %vm1686_vm2, %v631_v20, -1e+30 }
  0xec   : > { %v454_v24 = vpop.f32.mrf.mxu0  ;;  %v650_v26 = vsel %vm649_vm3, %v641_v23, -inf  ;;  %v511_v28 = vpop.f32.mrf.mxu1  ;;  %v656_v29 = vsel %vm649_vm3, %v643_v25, -inf }
  0xed   : > { %v630_v27 = vmul.f32 0.35355338, %v454_v24  ;;  %651 = vmax.xlane.f32.xlu0 %v650_v26  ;;  %v632_v30 = vmul.f32 0.35355338, %v511_v28  ;;  %657 = vmax.xlane.f32.xlu1 %v656_v29 }
  0xee   : > { %v1401_v31 = vpop.f32.mrf.mxu0  ;;  %v1407_v32 = vpop.f32.mrf.mxu1 }
  0xef   : > { %v642_v33 = vsel %vm1686_vm2, %v630_v27, -1e+30  ;;  %v644_v35 = vsel %vm1686_vm2, %v632_v30, -1e+30 }
  0xf0   : > { %v565_v34 = vpop.f32.mrf.mxu0  ;;  %v653_v36 = vsel %vm649_vm3, %v642_v33, -inf  ;;  %v622_v38 = vpop.f32.mrf.mxu1  ;;  %v659_v39 = vsel %vm649_vm3, %v644_v35, -inf }
  0xf1   : > { %v633_v37 = vmul.f32 0.35355338, %v565_v34  ;;  %654 = vmax.xlane.f32.xlu0 %v653_v36  ;;  %v635_v40 = vmul.f32 0.35355338, %v622_v38  ;;  %660 = vmax.xlane.f32.xlu1 %v659_v39  ;;  %v1503_v34 = vld [vmem:[%s1667_s19] sm:$0xff]  }
  0xf2   : > { %v1412_v41 = vpop.f32.mrf.mxu0  ;;  %v1418_v42 = vpop.f32.mrf.mxu1  ;;  %1421 = vmatpush3.bf16.msra.mxu0 %v1503_v34 }
  0xf3   : > { %v645_v43 = vsel %vm1686_vm2, %v633_v37, -1e+30  ;;  %v647_v46 = vsel %vm1686_vm2, %v635_v40, -1e+30  ;;  %1432 = vmatprep.subr.bf16.mxu0 %v1578_v0 }
  0xf4   : > { %v568_v44 = vpop.f32.mrf.mxu0  ;;  %v662_v45 = vsel %vm649_vm3, %v645_v43, -inf  ;;  %v625_v48 = vpop.f32.mrf.mxu1  ;;  %v668_v51 = vsel %vm649_vm3, %v647_v46, -inf }
  0xf5   : > { %v634_v47 = vmul.f32 0.35355338, %v568_v44  ;;  %663 = vmax.xlane.f32.xlu0 %v662_v45  ;;  %v636_v49 = vmul.f32 0.35355338, %v625_v48 }
  0xf6   : > { %v1413_v50 = vpop.f32.mrf.mxu0  ;;  %v1419_v52 = vpop.f32.mrf.mxu1 }
  0xf7   : > { %v646_v53 = vsel %vm1686_vm2, %v634_v47, -1e+30  ;;  %v648_v55 = vsel %vm1686_vm2, %v636_v49, -1e+30 }
  0xf8   : > { %v665_v54 = vsel %vm649_vm3, %v646_v53, -inf  ;;  %v671_v56 = vsel %vm649_vm3, %v648_v55, -inf }
  0xf9   : > { %669 = vmax.xlane.f32.xlu0 %v668_v51  ;;  %666 = vmax.xlane.f32.xlu1 %v665_v54 }
  0xfd   : > { %672 = vmax.xlane.f32.xlu1 %v671_v56 }
 0x176   : > { %v652_v57 = vpop.xlane.xlu0 %651  ;;  %v658_v58 = vpop.xlane.xlu1 %657 }
 0x177   : > { %v674_v59 = vsub.f32 %v641_v23, %v652_v57  ;;  %v676_v60 = vsub.f32 %v643_v25, %v658_v58  ;;  %v1505_v57 = vld [vmem:[%s1667_s19 + $0x10] sm:$0xff]  }
 0x179   : > { %v682_v61 = vmul.f32 1.442695, %v674_v59  ;;  %v686_v62 = vmul.f32 1.442695, %v676_v60 }
 0x17a   : > { %v655_v63 = vpop.xlane.xlu0 %654  ;;  %v661_v1 = vpop.xlane.xlu1 %660 }
 0x17b   : > { %1507 = vpow2.f32 %v682_v61  ;;  %v675_v2 = vsub.f32 %v642_v33, %v655_v63  ;;  %v677_v3 = vsub.f32 %v644_v35, %v661_v1  ;;  %v1504_v35 = vld [vmem:[%s1667_s19 + $0x8] sm:$0xff]   ;;  %v1506_v63 = vld [vmem:[%s1667_s19 + $0x18] sm:$0xff]  }
 0x17c   : > { %1509 = vpow2.f32 %v686_v62  ;;  %1427 = vmatpush3.bf16.msra.mxu1 %v1504_v35 }
 0x17d   : > { %v684_v4 = vmul.f32 1.442695, %v675_v2  ;;  %v688_v5 = vmul.f32 1.442695, %v677_v3  ;;  %1438 = vmatprep.subr.bf16.mxu1 %v1578_v0 }
 0x17e   : > { %v664_v6 = vpop.xlane.xlu0 %663 }
 0x17f   : > { %1511 = vpow2.f32 %v684_v4  ;;  %v678_v7 = vsub.f32 %v645_v43, %v664_v6 }
 0x180   : > { %1513 = vpow2.f32 %v688_v5 }
 0x181   : > { %v690_v8 = vmul.f32 1.442695, %v678_v7 }
 0x182   : > { %v670_v9 = vpop.xlane.xlu0 %669  ;;  %v667_v10 = vpop.xlane.xlu1 %666 }
 0x183   : > { %1515 = vpow2.f32 %v690_v8  ;;  %v680_v11 = vsub.f32 %v647_v46, %v670_v9  ;;  %v679_v12 = vsub.f32 %v646_v53, %v667_v10 }
 0x185   : > { %v694_v13 = vmul.f32 1.442695, %v680_v11  ;;  %v692_v14 = vmul.f32 1.442695, %v679_v12  ;;  %v954_v11 = vld [vmem:[%s1811_s4] sm:$0xf] }
 0x186   : > { %v673_v15 = vpop.xlane.xlu1 %672  ;;  %v963_v12 = vsel %vm961_vm4, %v954_v11, 0 }
 0x187   : > { %1517 = vpow2.f32 %v694_v13  ;;  %v681_v16 = vsub.f32 %v648_v55, %v673_v15  ;;  %v955_v13 = vld [vmem:[%s1811_s4 + $0x4] sm:$0xf] }
 0x188   : > { %v1508_v17 = vpop.eup %1507  ;;  %1519 = vpow2.f32 %v692_v14  ;;  %v1010_v14 = vsel %vm961_vm4, %v955_v13, 0 }
 0x189   : > { %v696_v18 = vmul.f32 1.442695, %v681_v16  ;;  %v698_v19 = vsel %vm649_vm3, %v1508_v17, 0.0  ;;  %v1510_v20 = vpop.eup %1509 }
 0x18a   : > { %699 = vadd.xlane.f32.xlu0 %v698_v19  ;;  %v704_v22 = vsel %vm649_vm3, %v1510_v20, 0.0 }
 0x18b   : > { %1521 = vpow2.f32 %v696_v18 }
 0x18c   : > { %v1512_v21 = vpop.eup %1511 }
 0x18d   : > { %v701_v23 = vsel %vm649_vm3, %v1512_v21, 0.0  ;;  %v1514_v24 = vpop.eup %1513 }
 0x18e   : > { %705 = vadd.xlane.f32.xlu0 %v704_v22  ;;  %702 = vadd.xlane.f32.xlu1 %v701_v23  ;;  %v707_v27 = vsel %vm649_vm3, %v1514_v24, 0.0 }
 0x190   : > { %v1717_v25 = vpop.eup %1515 }
 0x191   : > { %v710_v26 = vsel %vm649_vm3, %v1717_v25, 0.0 }
 0x192   : > { %711 = vadd.xlane.f32.xlu0 %v710_v26  ;;  %708 = vadd.xlane.f32.xlu1 %v707_v27 }
 0x194   : > { %v1722_v28 = vpop.eup %1517 }
 0x195   : > { %v1520_v29 = vpop.eup %1519  ;;  %v716_v30 = vsel %vm649_vm3, %v1722_v28, 0.0 }
 0x196   : > { %717 = vadd.xlane.f32.xlu0 %v716_v30  ;;  %v713_v31 = vsel %vm649_vm3, %v1520_v29, 0.0 }
 0x197   : > { %714 = vadd.xlane.f32.xlu1 %v713_v31 }
 0x198   : > { %v1522_v32 = vpop.eup %1521 }
 0x199   : > { %v719_v33 = vsel %vm649_vm3, %v1522_v32, 0.0 }
 0x19b   : > { %720 = vadd.xlane.f32.xlu1 %v719_v33 }
 0x213   : > { %v700_v36 = vpop.xlane.xlu0 %699 }
 0x214   : > { %v722_v37 = vmax.f32 %v700_v36, 1e-30 }
 0x216   : > { %1523 = vrcp.f32 %v722_v37 }
 0x217   : > { %v706_v38 = vpop.xlane.xlu0 %705  ;;  %v703_v39 = vpop.xlane.xlu1 %702 }
 0x218   : > { %v723_v40 = vmax.f32 %v703_v39, 1e-30  ;;  %v724_v41 = vmax.f32 %v706_v38, 1e-30 }
 0x21a   : > { %1525 = vrcp.f32 %v723_v40 }
 0x21b   : > { %v712_v42 = vpop.xlane.xlu0 %711  ;;  %v709_v43 = vpop.xlane.xlu1 %708  ;;  %1527 = vrcp.f32 %v724_v41 }
 0x21c   : > { %v725_v44 = vmax.f32 %v709_v43, 1e-30  ;;  %v726_v45 = vmax.f32 %v712_v42, 1e-30 }
 0x21e   : > { %1529 = vrcp.f32 %v725_v44 }
 0x21f   : > { %v718_v46 = vpop.xlane.xlu0 %717  ;;  %1531 = vrcp.f32 %v726_v45 }
 0x220   : > { %v715_v47 = vpop.xlane.xlu1 %714  ;;  %v728_v48 = vmax.f32 %v718_v46, 1e-30 }
 0x221   : > { %v727_v49 = vmax.f32 %v715_v47, 1e-30 }
 0x223   : > { %1533 = vrcp.f32 %v727_v49  ;;  %v1524_v52 = vpop.eup %1523 }
 0x224   : > { %v721_v50 = vpop.xlane.xlu1 %720  ;;  %1535 = vrcp.f32 %v728_v48  ;;  %v738_v54 = vmul.f32 %v1524_v52, %v1508_v17  ;;  %v956_v17 = vld [vmem:[%s1811_s4 + $0x8] sm:$0xf] }
 0x225   : > { %v729_v51 = vmax.f32 %v721_v50, 1e-30 }
 0x227   : > { %1537 = vrcp.f32 %v729_v51  ;;  %v1526_v53 = vpop.eup %1525 }
 0x228   : > { %v739_v55 = vmul.f32 %v1526_v53, %v1512_v21  ;;  %v1528_v56 = vpop.eup %1527  ;;  %v1057_v21 = vsel %vm961_vm4, %v956_v17, 0  ;;  %v1369_v53 = vld [vmem:[%s362_s12] sm:$0xff]  }
 0x229   : > { %v740_v60 = vmul.f32 %v1528_v56, %v1510_v20 }
 0x22a   : > { %v746_v58 = vpack.c.bf16 %v739_v55, %v738_v54 }
 0x22b   : > { %v1530_v59 = vpop.eup %1529 }
 0x22c   : > { %1423 = vmatmul.mubr.msk.bf16.vlgmr.msra.gmra.mxu0 %vm649_vm3, %v746_v58  ;;  %v741_v61 = vmul.f32 %v1530_v59, %v1514_v24  ;;  %v1532_v62 = vpop.eup %1531  ;;  %v957_v24 = vld [vmem:[%s1811_s4 + $0xc] sm:$0xf] }
 0x22d   : > { %1433 = vmatpush3.bf16.msra.mxu0 %v1505_v57  ;;  %1434 = vmatprep.mubr.msk.bf16.mxu0 %vm1579_vm0, %v1578_v0  ;;  %v742_v3 = vmul.f32 %v1532_v62, %v1717_v25 }
 0x22e   : > { %v747_v1 = vpack.c.bf16 %v741_v61, %v740_v60  ;;  %1444 = vmatprep.subr.bf16.mxu0 %v1578_v0  ;;  %v1356_v60 = vld [vmem:[%s1812_s5] ss:$0 sm:$0xff] }
 0x230   : > { %v1534_v2 = vpop.eup %1533  ;;  %1429 = vmatmul.mubr.msk.bf16.vlgmr.msra.gmra.mxu1 %vm649_vm3, %v747_v1 }
 0x231   : > { %v743_v4 = vmul.f32 %v1534_v2, %v1520_v29  ;;  %v1536_v5 = vpop.eup %1535  ;;  %1439 = vmatpush3.bf16.msra.mxu1 %v1506_v63  ;;  %1440 = vmatprep.mubr.msk.bf16.mxu1 %vm1579_vm0, %v1578_v0  ;;  %v1370_v63 = vunpack.c.l.bf16 %v1369_v53 }
 0x232   : > { %1450 = vmatprep.subr.bf16.mxu1 %v1578_v0  ;;  %v744_v8 = vmul.f32 %v1536_v5, %v1722_v28  ;;  %v1104_v28 = vsel %vm961_vm4, %v957_v24, 0 }
 0x233   : > { %v748_v6 = vpack.c.bf16 %v743_v4, %v742_v3 }
 0x234   : > { %v1538_v7 = vpop.eup %1537 }
 0x235   : > { %1435 = vmatmul.mubr.msk.bf16.vlgmr.msra.gmra.mxu0 %vm649_vm3, %v748_v6  ;;  %v745_v9 = vmul.f32 %v1538_v7, %v1522_v32 }
 0x236   : > { %1446 = vmatprep.mubr.msk.bf16.mxu0 %vm1579_vm0, %v1578_v0  ;;  %1445 = vmatpush3.bf16.msra.mxu0 %v963_v12 }
 0x237   : > { %v749_v10 = vpack.c.bf16 %v745_v9, %v744_v8  ;;  %1456 = vmatprep.subr.bf16.mxu0 %v1578_v0  ;;  %v1371_v9 = vunpack.c.h.bf16 %v1369_v53 }
 0x239   : > { %1441 = vmatmul.mubr.msk.bf16.vlgmr.msra.gmra.mxu1 %vm649_vm3, %v749_v10 }
 0x23a   : > { %1452 = vmatprep.mubr.msk.bf16.mxu1 %vm1579_vm0, %v1578_v0  ;;  %1451 = vmatpush3.bf16.msra.mxu1 %v1010_v14 }
 0x23b   : > { %1462 = vmatprep.subr.bf16.mxu1 %v1578_v0 }
 0x2ec   : > { %v793_v15 = vpop.f32.mrf.mxu0 }
 0x2ee   : > { %v1424_v16 = vpop.f32.mrf.mxu0 }
 0x2f0   : > { %v796_v18 = vpop.f32.mrf.mxu0  ;;  %v843_v19 = vpop.f32.mrf.mxu1 }
 0x2f1   : > { %v950_v20 = vpack.c.bf16 %v796_v18, %v793_v15 }
 0x2f2   : > { %v1425_v22 = vpop.f32.mrf.mxu0  ;;  %v1430_v23 = vpop.f32.mrf.mxu1 }
 0x2f3   : > { %1447 = vmatmul.mubr.msk.bf16.vlgmr.msra.gmra.mxu0 %vm410_vm1, %v950_v20 }
 0x2f4   : > { %v846_v25 = vpop.f32.mrf.mxu1  ;;  %1457 = vmatpush3.bf16.msra.mxu0 %v1057_v21  ;;  %1458 = vmatprep.mubr.msk.bf16.mxu0 %vm1579_vm0, %v1578_v0 }
 0x2f5   : > { %v893_v26 = vpop.f32.mrf.mxu0  ;;  %v951_v27 = vpack.c.bf16 %v846_v25, %v843_v19 }
 0x2f6   : > { %v1431_v29 = vpop.f32.mrf.mxu1 }
 0x2f7   : > { %v1436_v30 = vpop.f32.mrf.mxu0  ;;  %1453 = vmatmul.mubr.msk.bf16.vlgmr.msra.gmra.mxu1 %vm410_vm1, %v951_v27 }
 0x2f8   : > { %1463 = vmatpush3.bf16.msra.mxu1 %v1104_v28  ;;  %1464 = vmatprep.mubr.msk.bf16.mxu1 %vm1579_vm0, %v1578_v0 }
 0x2f9   : > { %v896_v31 = vpop.f32.mrf.mxu0  ;;  %v943_v32 = vpop.f32.mrf.mxu1 }
 0x2fa   : > { %v952_v33 = vpack.c.bf16 %v896_v31, %v893_v26 }
 0x2fb   : > { %v1437_v34 = vpop.f32.mrf.mxu0  ;;  %v1442_v35 = vpop.f32.mrf.mxu1 }
 0x2fc   : > { %1459 = vmatmul.mubr.msk.bf16.vlgmr.msra.gmra.mxu0 %vm410_vm1, %v952_v33 }
 0x2fd   : > { %v946_v36 = vpop.f32.mrf.mxu1 }
 0x2fe   : > { %v953_v37 = vpack.c.bf16 %v946_v36, %v943_v32 }
 0x2ff   : > { %v1443_v38 = vpop.f32.mrf.mxu1 }
 0x300   : > { %1465 = vmatmul.mubr.msk.bf16.vlgmr.msra.gmra.mxu1 %vm410_vm1, %v953_v37 }
 0x3b3   : > { %v999_v39 = vpop.f32.mrf.mxu0 }
 0x3b4   : > { %v1148_v47 = vsel %vm1147_vm5, %v999_v39, 0.0 }
 0x3b5   : > { %v1448_v40 = vpop.f32.mrf.mxu0 }
 0x3b7   : > { %v1002_v41 = vpop.f32.mrf.mxu0  ;;  %v1046_v42 = vpop.f32.mrf.mxu1 }
 0x3b8   : > { %v1149_v0 = vsel %vm1147_vm5, %v1046_v42, 0.0  ;;  %v1155_v57 = vsel %vm1147_vm5, %v1002_v41, 0.0 }
 0x3b9   : > { %v1449_v43 = vpop.f32.mrf.mxu0  ;;  %v1454_v44 = vpop.f32.mrf.mxu1  ;;  %v1150_v49 = vadd.f32 %v1149_v0, %v1148_v47 }
 0x3bb   : > { %v1049_v45 = vpop.f32.mrf.mxu1 }
 0x3bc   : > { %v1093_v46 = vpop.f32.mrf.mxu0  ;;  %v1156_v52 = vsel %vm1147_vm5, %v1049_v45, 0.0 }
 0x3bd   : > { %v1151_v48 = vsel %vm1147_vm5, %v1093_v46, 0.0  ;;  %v1455_v50 = vpop.f32.mrf.mxu1  ;;  %v1157_v61 = vadd.f32 %v1156_v52, %v1155_v57 }
 0x3be   : > { %v1460_v51 = vpop.f32.mrf.mxu0  ;;  %v1152_v54 = vadd.f32 %v1151_v48, %v1150_v49 }
 0x3c0   : > { %v1096_v55 = vpop.f32.mrf.mxu0  ;;  %v1140_v56 = vpop.f32.mrf.mxu1 }
 0x3c1   : > { %v1158_v58 = vsel %vm1147_vm5, %v1096_v55, 0.0  ;;  %v1153_v59 = vsel %vm1147_vm5, %v1140_v56, 0.0 }
 0x3c2   : > { %v1154_v62 = vadd.f32 %v1153_v59, %v1152_v54  ;;  %v1461_v1 = vpop.f32.mrf.mxu0  ;;  %v1466_v2 = vpop.f32.mrf.mxu1  ;;  %v1159_v3 = vadd.f32 %v1158_v58, %v1157_v61 }
 0x3c4   : > { %v1169_v4 = vadd.f32 %v1356_v60, %v1154_v62  ;;  %v1143_v5 = vpop.f32.mrf.mxu1 }
 0x3c5   : > { %v1160_v6 = vsel %vm1147_vm5, %v1143_v5, 0.0 }
 0x3c6   : > { %v1175_v7 = vadd.f32 %v1370_v63, %v1169_v4  ;;  %v1161_v8 = vadd.f32 %v1160_v6, %v1159_v3  ;;  %v1467_v10 = vpop.f32.mrf.mxu1 }
 0x3c8   : > { %v1366_v11 = vpack.c.bf16 %v1175_v7, %v1175_v7  ;;  %v1170_v12 = vadd.f32 %v1356_v60, %v1161_v8 }
 0x3ca   : > { %1186 = vst.msk [vmem:[%s372_s17] sm:$0xf] %vm1185_vm6, %v1366_v11  ;;  %v1176_v13 = vadd.f32 %v1371_v9, %v1170_v12 }
 0x3cc   : > { %v1367_v14 = vpack.c.bf16 %v1176_v13, %v1176_v13 }
 0x3ce   : > { %1187 = vst.msk [vmem:[%s372_s17 + $0x4] sm:$0xf] %vm1185_vm6, %v1367_v14 }
 0x3cf PF: > { %s23_s8 = sadd.s32 1, %s1575_s8   ;;  %s1817_s29 = smov %s1571_s30 }
 0x3d0   : > { %p20_p10 = scmp.ge.s32.totalorder %s23_s8, 4   ;;  %s1818_s30 = smov %s1820_s0 }
 0x3d2   :  { %22 = sbr.rel (!%p20_p10) target bundleno = 17 (0x11), region = 83 }

// kernel: custom-call.8
= control target key start
LH: loop header
LB: loop body
LE: loop exit
PB: predicated region body
PF: predicated region fallthrough
CT: control target
= control target key end

     0   :  { %s6_s0 = inlined_call_operand.vmem [shape: f32[15,2,13], index: 0, kind: output, shape index: {}]  }

// kernel: custom-call.10
= control target key start
LH: loop header
LB: loop body
LE: loop exit
PB: predicated region body
PF: predicated region fallthrough
CT: control target
= control target key end

     0   :  { %s6_s0 = inlined_call_operand.vmem [shape: f32[16,2,32], index: 0, kind: output, shape index: {}]  }

// kernel: custom-call.9
= control target key start
LH: loop header
LB: loop body
LE: loop exit
PB: predicated region body
PF: predicated region fallthrough
CT: control target
= control target key end

     0   :  { %s6_s0 = inlined_call_operand.vmem [shape: f32[16,2], index: 0, kind: output, shape index: {}]  }

// kernel: custom-call.7
= control target key start
LH: loop header
LB: loop body
LE: loop exit
PB: predicated region body
PF: predicated region fallthrough
CT: control target
= control target key end

     0   :  { %s6_s0 = inlined_call_operand.vmem [shape: f32[2,32], index: 0, kind: output, shape index: {}]  }

// kernel: custom-call.6
= control target key start
LH: loop header
LB: loop body
LE: loop exit
PB: predicated region body
PF: predicated region fallthrough
CT: control target
= control target key end

     0   :  { %s6_s0 = inlined_call_operand.vmem [shape: f32[2], index: 0, kind: output, shape index: {}]  }

// kernel: asr_cif_forward.18
= control target key start
LH: loop header
LB: loop body
LE: loop exit
PB: predicated region body
PF: predicated region fallthrough
CT: control target
= control target key end

     0   :  { %s607_s0 = inlined_call_operand.vmem [shape: s32[2], index: 0, kind: input, shape index: {}]   ;;  %s608_s1 = inlined_call_operand.vmem [shape: bf16[2,16,32], index: 1, kind: input, shape index: {}]   ;;  %s609_s2 = inlined_call_operand.vmem [shape: f32[3,32], index: 2, kind: input, shape index: {}]   ;;  %s610_s3 = inlined_call_operand.vmem [shape: f32[1,32], index: 3, kind: input, shape index: {}]   ;;  %s611_s4 = inlined_call_operand.vmem [shape: f32[1,32], index: 4, kind: input, shape index: {}]   ;;  %s612_s6 = inlined_call_operand.vmem [shape: f32[2,1,16], index: 6, kind: output, shape index: {}]   ;;  %s613_s5 = inlined_call_operand.<no memory space> [shape: f32[1,1], index: 5, kind: input, shape index: {}]  }
   0x1   :  { %s11_s23 = sshll.u32 %s607_s0, 4  ;;  %v15_v0 = vstv %s613_s5  ;;  %s12_s23 = int_to_ptr.vmem [resolvable:$true] %s11_s23 }
   0x2   :  { %16 = vst [vmem:[#allocation4] sm:$0x1] %v15_v0  ;;  %s495_s26 = scalar_lea.vmem %s12_s23, 16  ;;  %p500_p1 = scmp.lt.s32.totalorder %s12_s23, %s12_s23 }
   0x3   :  { %p496_p0 = scmp.ne.s32.totalorder %s12_s23, %s495_s26  ;;  %p501_p2 = scmp.lt.s32.totalorder %s495_s26, %s495_s26 }
   0x5   :  { %p502_p3 = por %p501_p2, %p500_p1 }
   0x7   :  { %p503_p4 = pnand %p502_p3, %p496_p0 }
   0x9   :  { %506 = shalt.err (!%p503_p4)  }
   0xa   :  { %s517_s27 = smov [#allocation3]  }
   0xb   :  { %14 = dma.vmem_to_smem %s12_s23, 16, %s517_s27, [#allocation2] }
   0xc   :  { %511 = dma.done.wait [#allocation2], 16 }
   0xd   :  { %512 = vsyncadd [#allocation2], 4294967280 }
   0xe   :  { %18 = sfence }
   0xf   :  { %s562_s28 = smov 0  }
  0x10 LB: > { %s568_s0 = sadd.s32 4294967295, %s515_s28   ;;  %p450_p5 = scmp.ge.s32.totalorder %s515_s28, 1  ;;  %s515_s28 = sphi %s562_s28, %s24_s28  }
  0x11   : > { %p196_p6 = scmp.lt.s32.totalorder %s515_s28, 3 }
  0x13   : > { %p197_p7 = pnand %p450_p5, %p196_p6 }
  0x14   : > { %p222_p8 = scmp.lt.s32.totalorder (!%p197_p7), %s568_s0, 1  ;;  %s393_s19 = sld [smem:[#allocation3 + %s568_s0]] (!%p197_p7) }
  0x15   : > { %200 = sbr.rel (%p197_p7) target bundleno = 286 (0x11e), region = 40 }
  0x1a   : > { %v234_v1 = vlaneseq  ;;  %v518_v2 = vmov 0.0   ;;  %s574_s5 = scalar_select %p222_p8, %s568_s0, 1  ;;  %vm519_vm0 = vmmov 0   ;;  %v520_v4 = vmov 0   ;;  %v294_v5 = vld [vmem:[#allocation4] sm:$0x1] }
  0x1b   : > { %471 = vmatprep.subr.mxu0 %v518_v2  ;;  %475 = vmatprep.mubr.msk.f32.mxu0 %vm519_vm0, %v518_v2  ;;  %v455_v10 = vld [vmem:[%s609_s2 + $0x1] ss:$0 sm:$0xff]  ;;  %v453_v15 = vld [vmem:[%s609_s2] ss:$0 sm:$0xff]  ;;  %v456_v21 = vld [vmem:[%s609_s2 + $0x2] ss:$0 sm:$0xff]  ;;  %v394_v51 = vstv %s393_s19 }
  0x1c   : > { %v235_v3 = vshrl.u32 %v234_v1, 7  ;;  %490 = vset.pattern.permute.xlu0 %v520_v4  ;;  %s463_s29 = sshll.u32 %s574_s5, 3  ;;  %v454_v19 = vld [vmem:[%s610_s3] ss:$0 sm:$0xff]  ;;  %vm304_vm5 = vcmask 261120   ;;  %v392_v50 = vand.u32 127, %v234_v1  ;;  %s229_s22 = scalar_lea.vmem %s612_s6, %s574_s5 }
  0x1d   : > { %297 = vperm.xlu0 %490, %v294_v5   ;;  %s226_s8 = scalar_lea.vmem %s608_s1, %s463_s29  ;;  %v293_v40 = vld [vmem:[%s611_s4] sm:$0x1]  ;;  %vm397_vm7 = vcmask 122880  }
  0x1e   : > { %v236_v6 = vadd.s32 8, %v235_v3  ;;  %v465_v7 = vld [vmem:[%s226_s8] sm:$0xff]   ;;  %vm237_vm1 = vcmp.eq.s32.totalorder %v235_v3, 0  ;;  %vm241_vm2 = vcmp.lt.s32.totalorder %v235_v3, 1  ;;  %vm250_vm4 = vcmp.lt.s32.totalorder %v235_v3, 7 }
  0x1f   : > { %v466_v8 = vunpack.c.l.bf16 %v465_v7  ;;  %v467_v9 = vunpack.c.h.bf16 %v465_v7  ;;  %v302_v41 = vsub.s32 0, %v235_v3  ;;  %vm395_vm6 = vcmp.lt.s32.totalorder %v392_v50, %v394_v51 }
  0x20   : > { %vm247_vm3 = vcmp.eq.s32.totalorder %v236_v6, 15 }
  0x21   : > { %v239_v11 = vrot.slane %v466_v8, 7  ;;  %v240_v12 = vrot.slane %v467_v9, 7  ;;  %v248_v13 = vrot.slane %v466_v8, 1  ;;  %v249_v14 = vrot.slane %v467_v9, 1 }
  0x22   : > { %v277_v20 = vmul.f32 %v467_v9, %v455_v10  ;;  %v276_v27 = vmul.f32 %v466_v8, %v455_v10 }
  0x23   : > { %v242_v16 = vsel %vm241_vm2, %v239_v11, %v240_v12  ;;  %v243_v17 = vsel %vm241_vm2, %v240_v12, %v239_v11  ;;  %v252_v18 = vsel %vm250_vm4, %v249_v14, %v248_v13  ;;  %v251_v23 = vsel %vm250_vm4, %v248_v13, %v249_v14 }
  0x24   : > { %v244_v22 = vsel %vm237_vm1, 0.0, %v243_v17  ;;  %v254_v24 = vsel %vm247_vm3, 0.0, %v252_v18  ;;  %v262_v25 = vmul.f32 %v453_v15, %v242_v16  ;;  %v285_v31 = vmul.f32 %v456_v21, %v251_v23 }
  0x25   : > { %v261_v26 = vmul.f32 %v453_v15, %v244_v22  ;;  %v286_v29 = vmul.f32 %v456_v21, %v254_v24 }
  0x26   : > { %v270_v28 = vadd.f32 %v454_v19, %v262_v25 }
  0x27   : > { %v269_v30 = vadd.f32 %v454_v19, %v261_v26 }
  0x28   : > { %v279_v32 = vadd.f32 %v277_v20, %v270_v28 }
  0x29   : > { %v278_v33 = vadd.f32 %v276_v27, %v269_v30 }
  0x2a   : > { %v288_v34 = vadd.f32 %v286_v29, %v279_v32 }
  0x2b   : > { %v287_v35 = vadd.f32 %v285_v31, %v278_v33 }
  0x2c   : > { %v290_v36 = vadd.f32 %v467_v9, %v288_v34 }
  0x2d   : > { %v289_v37 = vadd.f32 %v466_v8, %v287_v35 }
  0x2e   : > { %v292_v38 = vmax.f32 %v290_v36, 0.0 }
  0x2f   : > { %v291_v39 = vmax.f32 %v289_v37, 0.0 }
  0x30   : > { %472 = vmatpush3.xpose.msk.msra.mxu0 %vm304_vm5, %v292_v38 }
  0x31   : > { %473 = vmatprep.subr.mxu0 %v518_v2 }
  0x34   : > { %474 = vmatpush3.xpose.msk.msra.mxu0 %vm304_vm5, %v291_v39 }
  0x37   : > { %476 = vmatmul.mubr.msk.f32.vlgmr.msra.gmra.mxu0 %vm304_vm5, %v293_v40 }
  0x98   : > { %v298_v42 = vpop.permute.xlu0 %297 }
  0x99   : > { %v303_v43 = vrot.slane %v298_v42, %v302_v41 }
  0xf7   : > { %v380_v44 = vpop.f32.mrf.mxu0 }
  0xf8   : > { %v381_v45 = vadd.f32 %v380_v44, %v303_v43 }
  0xf9   : > { %v477_v46 = vpop.f32.mrf.mxu0 }
  0xfa   : > { %v460_v47 = vmul.f32 -1.442695, %v381_v45 }
  0xfc   : > { %491 = vpow2.f32 %v460_v47 }
 0x109   : > { %v492_v48 = vpop.eup %491 }
 0x10a   : > { %v387_v49 = vadd.f32 1.0, %v492_v48 }
 0x10c   : > { %493 = vrcp.f32 %v387_v49 }
 0x119   : > { %v494_v52 = vpop.eup %493 }
 0x11a   : > { %v390_v53 = vmax.f32 %v494_v52, 0.0 }
 0x11c   : > { %v396_v54 = vsel %vm395_vm6, %v390_v53, 0.0 }
 0x11d   : > { %398 = vst.msk [vmem:[%s229_s22] sm:$0x1] %vm397_vm7, %v396_v54 }
 0x11e PF: > { %s24_s28 = sadd.s32 1, %s515_s28  }
 0x11f   : > { %p21_p9 = scmp.ge.s32.totalorder %s24_s28, 4  }
 0x121   :  { %23 = sbr.rel (!%p21_p9) target bundleno = 16 (0x10), region = 70 }

// kernel: asr_cif_forward.19
= control target key start
LH: loop header
LB: loop body
LE: loop exit
PB: predicated region body
PF: predicated region fallthrough
CT: control target
= control target key end

     0   :  { %s429_s12 = smov 0   ;;  %s452_s0 = inlined_call_operand.vmem [shape: s32[2,1,16], index: 0, kind: input, shape index: {}]   ;;  %s453_s1 = inlined_call_operand.vmem [shape: f32[2,1,16], index: 1, kind: input, shape index: {}]   ;;  %s454_s2 = inlined_call_operand.vmem [shape: f32[2,16,32], index: 2, kind: input, shape index: {}]   ;;  %s455_s3 = inlined_call_operand.vmem [shape: f32[2,6,32], index: 3, kind: output, shape index: {}]  }
   0x1 LB: > { %s364_s13 = sadd.s32 4294967295, %s404_s12   ;;  %p368_p0 = scmp.ge.s32.totalorder %s404_s12, 1  ;;  %s404_s12 = sphi %s429_s12, %s13_s12  }
   0x2   : > { %p153_p1 = scmp.lt.s32.totalorder %s404_s12, 3 }
   0x4   : > { %p154_p2 = pnand %p368_p0, %p153_p1 }
   0x5   : > { %p182_p3 = scmp.lt.s32.totalorder (!%p154_p2), %s364_s13, 1 }
   0x6   : > { %157 = sbr.rel (%p154_p2) target bundleno = 218 (0xda), region = 32 }
   0xb   : > { %v199_v0 = vlaneseq  ;;  %v406_v1 = vmov 0.0   ;;  %vm407_vm0 = vmmov 0   ;;  %s457_s13 = smov (!%p182_p3, %s364_s13), 1  ;;  %v408_v8 = vmov 0  }
   0xc   : > { %380 = vmatprep.subr.mxu0 %v406_v1  ;;  %384 = vmatprep.mubr.msk.f32.mxu0 %vm407_vm0, %v406_v1  ;;  %s376_s14 = sshll.u32 %s457_s13, 4  ;;  %s184_s17 = scalar_lea.vmem %s452_s0, %s457_s13  ;;  %vm217_vm4 = vcmask 130048   ;;  %vm291_vm6 = vcmask 259072  }
   0xd   : > { %v200_v2 = vshrl.u32 %v199_v0, 7  ;;  %s192_s20 = scalar_lea.vmem %s454_s2, %s376_s14  ;;  %s187_s23 = scalar_lea.vmem %s453_s1, %s457_s13  ;;  %v372_v3 = vld [vmem:[%s184_s17] ss:$0 sm:$0xff] }
   0xe   : > { %v216_v5 = vld [vmem:[%s192_s20 + $0x8] sm:$0xff]  ;;  %v215_v6 = vld [vmem:[%s192_s20] sm:$0xff]  ;;  %s371_s24 = sshll.u32 %s457_s13, 3 }
   0xf   : > { %v210_v4 = vsub.s32 0, %v200_v2  ;;  %v198_v7 = vld [vmem:[%s187_s23] sm:$0x1]  ;;  %381 = vmatpush3.msra.mxu0 %v216_v5  ;;  %vm205_vm2 = vcmp.eq.s32.totalorder %v200_v2, %v372_v3  ;;  %s196_s27 = scalar_lea.vmem %s455_s3, %s371_s24 }
  0x10   : > { %vm206_vm1 = vcmp.gt.f32.partialorder %v198_v7, 0.5  ;;  %382 = vmatprep.subr.mxu0 %v406_v1 }
  0x11   : > { %v207_v9 = vsel %vm206_vm1, 1, %v408_v8  ;;  %383 = vmatpush3.msra.mxu0 %v215_v6 }
  0x12   : > { %v211_v10 = vrot.slane %v207_v9, %v210_v4 }
  0x14   : > { %vm212_vm3 = vcmp.eq.s32.totalorder %v211_v10, 1 }
  0x15   : > { %vm213_vm5 = vmand %vm205_vm2, %vm212_vm3 }
  0x16   : > { %v214_v11 = vsel %vm213_vm5, 1.0, %v406_v1 }
  0x17   : > { %385 = vmatmul.mubr.msk.f32.vlgmr.msra.gmra.mxu0 %vm217_vm4, %v214_v11 }
  0xd7   : > { %v287_v12 = vpop.f32.mrf.mxu0 }
  0xd8   : > { %292 = vst.msk [vmem:[%s196_s27] sm:$0x3f] %vm291_vm6, %v287_v12 }
  0xd9   : > { %v386_v13 = vpop.f32.mrf.mxu0 }
  0xda PF: > { %s13_s12 = sadd.s32 1, %s404_s12  }
  0xdb   : > { %p10_p4 = scmp.ge.s32.totalorder %s13_s12, 4  }
  0xdd   :  { %12 = sbr.rel (!%p10_p4) target bundleno = 1 (0x1), region = 68 }

// kernel: asr_cif_forward.20
= control target key start
LH: loop header
LB: loop body
LE: loop exit
PB: predicated region body
PF: predicated region fallthrough
CT: control target
= control target key end

     0   :  { %vm27_vm0 = vcmask 261120   ;;  %vm31_vm1 = vcmask 257024   ;;  %v185_v16 = vmov 0.0   ;;  %vm186_vm2 = vmmov 0   ;;  %s247_s0 = inlined_call_operand.vmem [shape: bf16[12,32], index: 0, kind: input, shape index: {}]   ;;  %s248_s3 = inlined_call_operand.vmem [shape: bf16[32,96], index: 3, kind: input, shape index: {}]   ;;  %s249_s1 = inlined_call_operand.vmem [shape: f32[1,32], index: 1, kind: input, shape index: {}]   ;;  %s250_s2 = inlined_call_operand.vmem [shape: f32[1,32], index: 2, kind: input, shape index: {}]   ;;  %s251_s4 = inlined_call_operand.vmem [shape: f32[1,96], index: 4, kind: input, shape index: {}]   ;;  %s252_s5 = inlined_call_operand.vmem [shape: bf16[12,96], index: 5, kind: output, shape index: {}]  }
   0x1   :  { %v21_v0 = vld [vmem:[%s247_s0] sm:$0xf]  ;;  %v22_v1 = vld [vmem:[%s247_s0 + $0x4] sm:$0x3]  ;;  %169 = vmatprep.subr.bf16.mxu0 %v185_v16  ;;  %v179_v17 = vld [vmem:[%s248_s3 + $0x8] sm:$0xff]   ;;  %173 = vmatprep.mubr.msk.bf16.mxu0 %vm186_vm2, %v185_v16  ;;  %vm148_vm3 = vcmask 781312  }
   0x2   :  { %v23_v2 = vunpack.c.l.bf16 %v21_v0  ;;  %v24_v3 = vunpack.c.l.bf16 %v22_v1  ;;  %170 = vmatpush3.bf16.msra.mxu0 %v179_v17  ;;  %v180_v18 = vld [vmem:[%s248_s3] sm:$0xff]   ;;  %vm150_vm4 = vcmask 779264  }
   0x3   :  { %171 = vmatprep.subr.bf16.mxu0 %v185_v16  ;;  %v156_v27 = vld [vmem:[%s249_s1] ss:$0 sm:$0xff] }
   0x4   :  { %v28_v4 = vsel %vm27_vm0, %v23_v2, 0.0  ;;  %v32_v5 = vsel %vm31_vm1, %v24_v3, 0.0  ;;  %v157_v31 = vld [vmem:[%s250_s2] ss:$0 sm:$0xff] }
   0x5   :  { %29 = vadd.xlane.f32.xlu0 %v28_v4  ;;  %v158_v36 = vld [vmem:[%s251_s4] ss:$0 sm:$0xff] }
   0x6   :  { %172 = vmatpush3.bf16.msra.mxu0 %v180_v18 }
   0x9   :  { %33 = vadd.xlane.f32.xlu0 %v32_v5 }
  0x8e   :  { %v30_v6 = vpop.xlane.xlu0 %29 }
  0x8f   :  { %v36_v7 = vmul.f32 0.03125, %v30_v6 }
  0x91   :  { %v38_v8 = vsub.f32 %v23_v2, %v36_v7 }
  0x92   :  { %v34_v9 = vpop.xlane.xlu0 %33 }
  0x93   :  { %v37_v10 = vmul.f32 0.03125, %v34_v9  ;;  %v40_v11 = vmul.f32 %v38_v8, %v38_v8 }
  0x95   :  { %v39_v12 = vsub.f32 %v24_v3, %v37_v10  ;;  %v42_v13 = vsel %vm27_vm0, %v40_v11, 0.0 }
  0x96   :  { %43 = vadd.xlane.f32.xlu1 %v42_v13 }
  0x97   :  { %v41_v14 = vmul.f32 %v39_v12, %v39_v12 }
  0x99   :  { %v45_v15 = vsel %vm31_vm1, %v41_v14, 0.0 }
  0x9a   :  { %46 = vadd.xlane.f32.xlu1 %v45_v15 }
 0x11f   :  { %v44_v19 = vpop.xlane.xlu1 %43 }
 0x120   :  { %v48_v20 = vmul.f32 0.03125, %v44_v19 }
 0x122   :  { %v50_v21 = vadd.f32 1e-05, %v48_v20 }
 0x123   :  { %v47_v22 = vpop.xlane.xlu1 %46 }
 0x124   :  { %181 = vrsqrt.f32 %v50_v21  ;;  %v49_v23 = vmul.f32 0.03125, %v47_v22 }
 0x126   :  { %v51_v24 = vadd.f32 1e-05, %v49_v23 }
 0x128   :  { %183 = vrsqrt.f32 %v51_v24 }
 0x131   :  { %v182_v25 = vpop.eup %181 }
 0x132   :  { %v54_v26 = vmul.f32 %v182_v25, %v38_v8 }
 0x134   :  { %v62_v30 = vmul.f32 %v156_v27, %v54_v26 }
 0x135   :  { %v184_v28 = vpop.eup %183 }
 0x136   :  { %v55_v29 = vmul.f32 %v184_v28, %v39_v12  ;;  %v70_v33 = vadd.f32 %v157_v31, %v62_v30 }
 0x138   :  { %v63_v32 = vmul.f32 %v156_v27, %v55_v29 }
 0x13a   :  { %v71_v34 = vadd.f32 %v157_v31, %v63_v32 }
 0x13c   :  { %v72_v35 = vpack.c.bf16 %v71_v34, %v70_v33 }
 0x13e   :  { %174 = vmatmul.mubr.msk.bf16.vlgmr.msra.gmra.mxu0 %vm27_vm0, %v72_v35 }
 0x1fe   :  { %v133_v37 = vpop.f32.mrf.mxu0 }
 0x1ff   :  { %v134_v38 = vadd.f32 %v158_v36, %v133_v37 }
 0x200   :  { %v175_v39 = vpop.f32.mrf.mxu0 }
 0x201   :  { %v164_v40 = vpack.c.bf16 %v134_v38, %v134_v38 }
 0x202   :  { %v136_v41 = vpop.f32.mrf.mxu0 }
 0x203   :  { %149 = vst.msk [vmem:[%s252_s5] sm:$0xf] %vm148_vm3, %v164_v40  ;;  %v137_v42 = vadd.f32 %v158_v36, %v136_v41 }
 0x204   :  { %v176_v43 = vpop.f32.mrf.mxu0 }
 0x205   :  { %v165_v44 = vpack.c.bf16 %v137_v42, %v137_v42 }
 0x207   :  { %151 = vst.msk [vmem:[%s252_s5 + $0x4] sm:$0x3] %vm150_vm4, %v165_v44 }

// kernel: asr_cif_forward.22
= control target key start
LH: loop header
LB: loop body
LE: loop exit
PB: predicated region body
PF: predicated region fallthrough
CT: control target
= control target key end

     0   :  { %vm27_vm0 = vcmask 261120   ;;  %vm31_vm1 = vcmask 257024   ;;  %v184_v16 = vmov 0.0   ;;  %vm185_vm2 = vmmov 0   ;;  %s249_s0 = inlined_call_operand.vmem [shape: bf16[12,32], index: 0, kind: input, shape index: {}]   ;;  %s250_s3 = inlined_call_operand.vmem [shape: bf16[32,32], index: 3, kind: input, shape index: {}]   ;;  %s251_s1 = inlined_call_operand.vmem [shape: f32[1,32], index: 1, kind: input, shape index: {}]   ;;  %s252_s2 = inlined_call_operand.vmem [shape: f32[1,32], index: 2, kind: input, shape index: {}, may-alias: {2,4}]   ;;  %s253_s4 = inlined_call_operand.vmem [shape: f32[1,32], index: 4, kind: input, shape index: {}, may-alias: {2,4}]   ;;  %s254_s5 = inlined_call_operand.vmem [shape: bf16[12,32], index: 5, kind: output, shape index: {}]  }
   0x1   :  { %v21_v0 = vld [vmem:[%s249_s0] sm:$0xf]  ;;  %v22_v1 = vld [vmem:[%s249_s0 + $0x4] sm:$0x3]  ;;  %168 = vmatprep.subr.bf16.mxu0 %v184_v16  ;;  %v178_v17 = vld [vmem:[%s250_s3 + $0x8] sm:$0xff]   ;;  %172 = vmatprep.mubr.msk.bf16.mxu0 %vm185_vm2, %v184_v16  ;;  %vm149_vm3 = vcmask 254976  }
   0x2   :  { %v23_v2 = vunpack.c.l.bf16 %v21_v0  ;;  %v24_v3 = vunpack.c.l.bf16 %v22_v1  ;;  %169 = vmatpush3.bf16.msra.mxu0 %v178_v17  ;;  %v179_v18 = vld [vmem:[%s250_s3] sm:$0xff]  }
   0x3   :  { %170 = vmatprep.subr.bf16.mxu0 %v184_v16  ;;  %v155_v27 = vld [vmem:[%s251_s1] ss:$0 sm:$0xff] }
   0x4   :  { %v28_v4 = vsel %vm27_vm0, %v23_v2, 0.0  ;;  %v32_v5 = vsel %vm31_vm1, %v24_v3, 0.0  ;;  %v156_v31 = vld [vmem:[%s252_s2] ss:$0 sm:$0xff] }
   0x5   :  { %29 = vadd.xlane.f32.xlu0 %v28_v4  ;;  %v157_v36 = vld [vmem:[%s253_s4] ss:$0 sm:$0xff] }
   0x6   :  { %171 = vmatpush3.bf16.msra.mxu0 %v179_v18 }
   0x9   :  { %33 = vadd.xlane.f32.xlu0 %v32_v5 }
  0x8e   :  { %v30_v6 = vpop.xlane.xlu0 %29 }
  0x8f   :  { %v36_v7 = vmul.f32 0.03125, %v30_v6 }
  0x91   :  { %v38_v8 = vsub.f32 %v23_v2, %v36_v7 }
  0x92   :  { %v34_v9 = vpop.xlane.xlu0 %33 }
  0x93   :  { %v37_v10 = vmul.f32 0.03125, %v34_v9  ;;  %v40_v11 = vmul.f32 %v38_v8, %v38_v8 }
  0x95   :  { %v39_v12 = vsub.f32 %v24_v3, %v37_v10  ;;  %v42_v13 = vsel %vm27_vm0, %v40_v11, 0.0 }
  0x96   :  { %43 = vadd.xlane.f32.xlu1 %v42_v13 }
  0x97   :  { %v41_v14 = vmul.f32 %v39_v12, %v39_v12 }
  0x99   :  { %v45_v15 = vsel %vm31_vm1, %v41_v14, 0.0 }
  0x9a   :  { %46 = vadd.xlane.f32.xlu1 %v45_v15 }
 0x11f   :  { %v44_v19 = vpop.xlane.xlu1 %43 }
 0x120   :  { %v48_v20 = vmul.f32 0.03125, %v44_v19 }
 0x122   :  { %v50_v21 = vadd.f32 1e-05, %v48_v20 }
 0x123   :  { %v47_v22 = vpop.xlane.xlu1 %46 }
 0x124   :  { %180 = vrsqrt.f32 %v50_v21  ;;  %v49_v23 = vmul.f32 0.03125, %v47_v22 }
 0x126   :  { %v51_v24 = vadd.f32 1e-05, %v49_v23 }
 0x128   :  { %182 = vrsqrt.f32 %v51_v24 }
 0x131   :  { %v181_v25 = vpop.eup %180 }
 0x132   :  { %v54_v26 = vmul.f32 %v181_v25, %v38_v8 }
 0x134   :  { %v62_v30 = vmul.f32 %v155_v27, %v54_v26 }
 0x135   :  { %v183_v28 = vpop.eup %182 }
 0x136   :  { %v55_v29 = vmul.f32 %v183_v28, %v39_v12  ;;  %v70_v33 = vadd.f32 %v156_v31, %v62_v30 }
 0x138   :  { %v63_v32 = vmul.f32 %v155_v27, %v55_v29 }
 0x13a   :  { %v71_v34 = vadd.f32 %v156_v31, %v63_v32 }
 0x13c   :  { %v72_v35 = vpack.c.bf16 %v71_v34, %v70_v33 }
 0x13e   :  { %173 = vmatmul.mubr.msk.bf16.vlgmr.msra.gmra.mxu0 %vm27_vm0, %v72_v35 }
 0x1fe   :  { %v133_v37 = vpop.f32.mrf.mxu0 }
 0x1ff   :  { %v134_v38 = vadd.f32 %v157_v36, %v133_v37 }
 0x200   :  { %v174_v39 = vpop.f32.mrf.mxu0 }
 0x201   :  { %v163_v40 = vpack.c.bf16 %v134_v38, %v134_v38 }
 0x202   :  { %v136_v41 = vpop.f32.mrf.mxu0 }
 0x203   :  { %148 = vst.msk [vmem:[%s254_s5] sm:$0xf] %vm31_vm1, %v163_v40  ;;  %v137_v42 = vadd.f32 %v157_v36, %v136_v41 }
 0x204   :  { %v175_v43 = vpop.f32.mrf.mxu0 }
 0x205   :  { %v164_v44 = vpack.c.bf16 %v137_v42, %v137_v42 }
 0x207   :  { %150 = vst.msk [vmem:[%s254_s5 + $0x4] sm:$0x3] %vm149_vm3, %v164_v44 }

// kernel: asr_cif_forward.21
= control target key start
LH: loop header
LB: loop body
LE: loop exit
PB: predicated region body
PF: predicated region fallthrough
CT: control target
= control target key end

     0   :  { %s1542_s0 = inlined_call_operand.vmem [shape: s32[2], index: 0, kind: input, shape index: {}]   ;;  %s1543_s1 = inlined_call_operand.vmem [shape: bf16[2,4,6,8], index: 1, kind: input, shape index: {}]   ;;  %s1544_s2 = inlined_call_operand.vmem [shape: bf16[2,4,6,8], index: 2, kind: input, shape index: {}]   ;;  %s1545_s3 = inlined_call_operand.vmem [shape: bf16[2,4,6,8], index: 3, kind: input, shape index: {}]   ;;  %s1546_s4 = inlined_call_operand.vmem [shape: bf16[4,8,32], index: 4, kind: input, shape index: {}]   ;;  %s1547_s5 = inlined_call_operand.vmem [shape: f32[1,32], index: 5, kind: input, shape index: {}]   ;;  %s1548_s6 = inlined_call_operand.vmem [shape: bf16[2,6,32], index: 6, kind: input, shape index: {}]   ;;  %s1549_s7 = inlined_call_operand.vmem [shape: bf16[2,6,32], index: 7, kind: output, shape index: {}]  }
   0x1   :  { %s12_s26 = sshll.u32 %s1542_s0, 4  ;;  %s13_s26 = int_to_ptr.vmem [resolvable:$true] %s12_s26 }
   0x2   :  { %s1307_s27 = scalar_lea.vmem %s13_s26, 16  ;;  %p1312_p1 = scmp.lt.s32.totalorder %s13_s26, %s13_s26 }
   0x3   :  { %p1308_p0 = scmp.ne.s32.totalorder %s13_s26, %s1307_s27  ;;  %p1313_p2 = scmp.lt.s32.totalorder %s1307_s27, %s1307_s27 }
   0x5   :  { %p1314_p3 = por %p1313_p2, %p1312_p1 }
   0x7   :  { %p1315_p4 = pnand %p1314_p3, %p1308_p0 }
   0x9   :  { %1318 = shalt.err (!%p1315_p4)  }
   0xa   :  { %s1345_s28 = smov [#allocation3]  }
   0xb   :  { %15 = dma.vmem_to_smem %s13_s26, 16, %s1345_s28, [#allocation2] }
   0xc   :  { %1331 = dma.done.wait [#allocation2], 16 }
   0xd   :  { %1332 = vsyncadd [#allocation2], 4294967280 }
   0xe   :  { %17 = sfence }
   0xf   :  { %s1391_s29 = smov 0   ;;  %s1393_s30 = smov 0  }
  0x10   :  { %s1395_s8 = smov 0  }
  0x11 LB: > { %s35_s0 = sadd.s32 1, %s1339_s30  ;;  %p1141_p5 = scmp.ge.s32.totalorder %s1343_s8, 1  ;;  %s1343_s8 = sphi %s1395_s8, %s23_s8   ;;  %s1339_s30 = sphi %s1393_s30, %s1553_s30   ;;  %s1335_s29 = sphi %s1391_s29, %s1552_s29  }
  0x12   : > { %p37_p6 = scmp.ge.s32.totalorder %s35_s0, 2  ;;  %p272_p7 = scmp.lt.s32.totalorder %s1343_s8, 3 }
  0x14   : > { %s1555_s0 = smov (%p37_p6, %s35_s0), 0  ;;  %p273_p8 = pnand %p1141_p5, %p272_p7 }
  0x15   : > { %p324_p9 = scmp.lt.s32.totalorder (!%p273_p8), %s1335_s29, 1  ;;  %s357_s17 = sld [smem:[#allocation3 + %s1335_s29]] (!%p273_p8) }
  0x16   : > { %276 = sbr.rel (%p273_p8) target bundleno = 962 (0x3c2), region = 44 }
  0x1b   : > { %v1346_v0 = vmov 0.0   ;;  %s1415_s9 = scalar_select %p324_p9, %s1335_s29, 1  ;;  %vm1347_vm0 = vmmov 0   ;;  %vm370_vm1 = vcmask 64512   ;;  %v559_v13 = vlaneseq }
  0x1c   : > { %1192 = vmatprep.subr.bf16.mxu0 %v1346_v0  ;;  %1198 = vmatprep.subr.bf16.mxu1 %v1346_v0  ;;  %v561_v15 = vstv %s357_s17  ;;  %vm567_vm3 = vcmask 46080   ;;  %vm624_vm4 = vcmask 1042432   ;;  %vm620_vm5 = vcmask 48128  }
  0x1d   : > { %1194 = vmatprep.mubr.msk.bf16.mxu0 %vm1347_vm0, %v1346_v0  ;;  %1200 = vmatprep.mubr.msk.bf16.mxu1 %vm1347_vm0, %v1346_v0  ;;  %s1422_s10 = sshll.u32 %s1415_s9, 4  ;;  %v560_v14 = vand.u32 127, %v559_v13  ;;  %vm817_vm6 = vcmask 1043456   ;;  %s1148_s29 = sshll.u32 %s1415_s9, 2  ;;  %vm999_vm7 = vcmask 259072   ;;  %vm1019_vm8 = vcmask 256000  }
  0x1e   : > { %s336_s13 = scalar_lea.vmem %s1544_s2, %s1422_s10  ;;  %s331_s16 = scalar_lea.vmem %s1543_s1, %s1422_s10 }
  0x1f   : > { %v362_v1 = vld [vmem:[%s336_s13] sm:$0x7]  ;;  %v363_v2 = vld [vmem:[%s336_s13 + $0x4] sm:$0x7]  ;;  %v364_v5 = vld [vmem:[%s336_s13 + $0x8] sm:$0x7]  ;;  %vm1453_vm2 = vcmp.lt.s32.totalorder %v560_v14, %v561_v15  ;;  %s341_s20 = scalar_lea.vmem %s1545_s3, %s1422_s10  ;;  %s348_s12 = scalar_lea.vmem %s1548_s6, %s1148_s29 }
  0x20   : > { %v375_v3 = vsel %vm370_vm1, %v362_v1, 0  ;;  %v421_v4 = vsel %vm370_vm1, %v363_v2, 0  ;;  %v365_v6 = vld [vmem:[%s336_s13 + $0xc] sm:$0x7]  ;;  %v358_v7 = vld [vmem:[%s331_s16] sm:$0x7] }
  0x21   : > { %1193 = vmatpush3.bf16.xpose.msra.mxu0 %v375_v3  ;;  %1199 = vmatpush3.bf16.xpose.msra.mxu1 %v421_v4  ;;  %v359_v8 = vld [vmem:[%s331_s16 + $0x4] sm:$0x7]  ;;  %v467_v9 = vsel %vm370_vm1, %v364_v5, 0  ;;  %v513_v10 = vsel %vm370_vm1, %v365_v6, 0  ;;  %v360_v11 = vld [vmem:[%s331_s16 + $0x8] sm:$0x7] }
  0x22   : > { %1204 = vmatprep.subr.bf16.mxu0 %v1346_v0  ;;  %1210 = vmatprep.subr.bf16.mxu1 %v1346_v0  ;;  %v361_v12 = vld [vmem:[%s331_s16 + $0xc] sm:$0x7]  ;;  %v366_v2 = vld [vmem:[%s341_s20] sm:$0x7]  ;;  %v367_v3 = vld [vmem:[%s341_s20 + $0x4] sm:$0x7]  ;;  %s355_s16 = scalar_lea.vmem %s1549_s7, %s1148_s29 }
  0x23   : > { %v626_v4 = vsel %vm624_vm4, %v366_v2, 0  ;;  %v672_v5 = vsel %vm624_vm4, %v367_v3, 0  ;;  %v368_v6 = vld [vmem:[%s341_s20 + $0x8] sm:$0x7] }
  0x28   : > { %1195 = vmatmul.mubr.msk.bf16.vlgmr.msra.gmra.mxu0 %vm370_vm1, %v358_v7  ;;  %1201 = vmatmul.mubr.msk.bf16.vlgmr.msra.gmra.mxu1 %vm370_vm1, %v359_v8  ;;  %v718_v7 = vsel %vm624_vm4, %v368_v6, 0  ;;  %v369_v8 = vld [vmem:[%s341_s20 + $0xc] sm:$0x7] }
  0x29   : > { %1205 = vmatpush3.bf16.xpose.msra.mxu0 %v467_v9  ;;  %1211 = vmatpush3.bf16.xpose.msra.mxu1 %v513_v10  ;;  %v764_v9 = vsel %vm624_vm4, %v369_v8, 0  ;;  %v1015_v8 = vld [vmem:[%s348_s12] sm:$0x7] }
  0x2a   : > { %1206 = vmatprep.mubr.msk.bf16.mxu0 %vm1347_vm0, %v1346_v0  ;;  %1212 = vmatprep.mubr.msk.bf16.mxu1 %vm1347_vm0, %v1346_v0 }
  0x2b   : > { %1216 = vmatprep.subr.bf16.mxu0 %v1346_v0  ;;  %1222 = vmatprep.subr.bf16.mxu1 %v1346_v0 }
  0x30   : > { %1207 = vmatmul.mubr.msk.bf16.vlgmr.msra.gmra.mxu0 %vm370_vm1, %v360_v11  ;;  %1213 = vmatmul.mubr.msk.bf16.vlgmr.msra.gmra.mxu1 %vm370_vm1, %v361_v12 }
  0x31   : > { %1218 = vmatprep.mubr.msk.bf16.mxu0 %vm1347_vm0, %v1346_v0  ;;  %1224 = vmatprep.mubr.msk.bf16.mxu1 %vm1347_vm0, %v1346_v0 }
  0x32   : > { %1217 = vmatpush3.bf16.msra.mxu0 %v626_v4  ;;  %1223 = vmatpush3.bf16.msra.mxu1 %v672_v5 }
  0x33   : > { %1228 = vmatprep.subr.bf16.mxu0 %v1346_v0  ;;  %1234 = vmatprep.subr.bf16.mxu1 %v1346_v0 }
  0xe8   : > { %v411_v16 = vpop.f32.mrf.mxu0  ;;  %v457_v17 = vpop.f32.mrf.mxu1 }
  0xe9   : > { %v555_v19 = vmul.f32 0.35355338, %v411_v16  ;;  %v556_v20 = vmul.f32 0.35355338, %v457_v17 }
  0xea   : > { %v1196_v21 = vpop.f32.mrf.mxu0  ;;  %v1202_v22 = vpop.f32.mrf.mxu1 }
  0xeb   : > { %v563_v23 = vsel %vm1453_vm2, %v555_v19, -1e+30  ;;  %v564_v24 = vsel %vm1453_vm2, %v556_v20, -1e+30 }
  0xec   : > { %v414_v25 = vpop.f32.mrf.mxu0  ;;  %v460_v26 = vpop.f32.mrf.mxu1  ;;  %v568_v27 = vsel %vm567_vm3, %v563_v23, -inf  ;;  %v571_v30 = vsel %vm567_vm3, %v564_v24, -inf }
  0xed   : > { %569 = vmax.xlane.f32.xlu0 %v568_v27  ;;  %v810_v25 = vld [vmem:[%s1546_s4] sm:$0xf] }
  0xee   : > { %v1197_v28 = vpop.f32.mrf.mxu0  ;;  %v1203_v29 = vpop.f32.mrf.mxu1 }
  0xef   : > { %v819_v28 = vsel %vm817_vm6, %v810_v25, 0 }
  0xf0   : > { %v503_v31 = vpop.f32.mrf.mxu0  ;;  %v549_v32 = vpop.f32.mrf.mxu1 }
  0xf1   : > { %v557_v33 = vmul.f32 0.35355338, %v503_v31  ;;  %v558_v34 = vmul.f32 0.35355338, %v549_v32  ;;  %572 = vmax.xlane.f32.xlu0 %v571_v30  ;;  %v811_v32 = vld [vmem:[%s1546_s4 + $0x4] sm:$0xf] }
  0xf2   : > { %v1208_v35 = vpop.f32.mrf.mxu0  ;;  %v1214_v36 = vpop.f32.mrf.mxu1 }
  0xf3   : > { %v565_v37 = vsel %vm1453_vm2, %v557_v33, -1e+30  ;;  %v566_v38 = vsel %vm1453_vm2, %v558_v34, -1e+30  ;;  %v865_v33 = vsel %vm817_vm6, %v811_v32, 0 }
  0xf4   : > { %v506_v39 = vpop.f32.mrf.mxu0  ;;  %v552_v40 = vpop.f32.mrf.mxu1  ;;  %v574_v41 = vsel %vm567_vm3, %v565_v37, -inf  ;;  %v577_v44 = vsel %vm567_vm3, %v566_v38, -inf  ;;  %v812_v34 = vld [vmem:[%s1546_s4 + $0x8] sm:$0xf] }
  0xf5   : > { %575 = vmax.xlane.f32.xlu1 %v574_v41  ;;  %v813_v39 = vld [vmem:[%s1546_s4 + $0xc] sm:$0xf] }
  0xf6   : > { %v1209_v42 = vpop.f32.mrf.mxu0  ;;  %v1215_v43 = vpop.f32.mrf.mxu1 }
  0xf7   : > { %v957_v43 = vsel %vm817_vm6, %v813_v39, 0 }
  0xf9   : > { %578 = vmax.xlane.f32.xlu1 %v577_v44 }
 0x176   : > { %v570_v45 = vpop.xlane.xlu0 %569 }
 0x177   : > { %v580_v46 = vsub.f32 %v563_v23, %v570_v45 }
 0x179   : > { %v584_v47 = vmul.f32 1.442695, %v580_v46 }
 0x17a   : > { %v573_v48 = vpop.xlane.xlu0 %572 }
 0x17b   : > { %1291 = vpow2.f32 %v584_v47  ;;  %v581_v49 = vsub.f32 %v564_v24, %v573_v48 }
 0x17d   : > { %v586_v50 = vmul.f32 1.442695, %v581_v49 }
 0x17e   : > { %v576_v51 = vpop.xlane.xlu1 %575 }
 0x17f   : > { %1293 = vpow2.f32 %v586_v50  ;;  %v582_v52 = vsub.f32 %v565_v37, %v576_v51  ;;  %v911_v37 = vsel %vm817_vm6, %v812_v34, 0 }
 0x181   : > { %v588_v53 = vmul.f32 1.442695, %v582_v52 }
 0x182   : > { %v579_v54 = vpop.xlane.xlu1 %578 }
 0x183   : > { %1295 = vpow2.f32 %v588_v53  ;;  %v583_v55 = vsub.f32 %v566_v38, %v579_v54 }
 0x185   : > { %v590_v56 = vmul.f32 1.442695, %v583_v55 }
 0x187   : > { %1297 = vpow2.f32 %v590_v56 }
 0x188   : > { %v1292_v57 = vpop.eup %1291 }
 0x189   : > { %v592_v58 = vsel %vm567_vm3, %v1292_v57, 0.0 }
 0x18a   : > { %593 = vadd.xlane.f32.xlu0 %v592_v58 }
 0x18c   : > { %v1294_v59 = vpop.eup %1293 }
 0x18d   : > { %v595_v60 = vsel %vm567_vm3, %v1294_v59, 0.0 }
 0x18e   : > { %596 = vadd.xlane.f32.xlu1 %v595_v60 }
 0x190   : > { %v1296_v61 = vpop.eup %1295 }
 0x191   : > { %v598_v62 = vsel %vm567_vm3, %v1296_v61, 0.0 }
 0x192   : > { %599 = vadd.xlane.f32.xlu0 %v598_v62 }
 0x194   : > { %v1298_v63 = vpop.eup %1297 }
 0x195   : > { %v601_v1 = vsel %vm567_vm3, %v1298_v63, 0.0 }
 0x196   : > { %602 = vadd.xlane.f32.xlu1 %v601_v1 }
 0x213   : > { %v594_v10 = vpop.xlane.xlu0 %593 }
 0x214   : > { %v604_v11 = vmax.f32 %v594_v10, 1e-30 }
 0x216   : > { %1299 = vrcp.f32 %v604_v11 }
 0x217   : > { %v597_v12 = vpop.xlane.xlu1 %596 }
 0x218   : > { %v605_v13 = vmax.f32 %v597_v12, 1e-30 }
 0x21a   : > { %1301 = vrcp.f32 %v605_v13  ;;  %v1162_v13 = vld [vmem:[%s1547_s5] ss:$0 sm:$0xff] }
 0x21b   : > { %v600_v14 = vpop.xlane.xlu0 %599 }
 0x21c   : > { %v606_v15 = vmax.f32 %v600_v14, 1e-30 }
 0x21e   : > { %1303 = vrcp.f32 %v606_v15  ;;  %v1016_v15 = vunpack.c.l.bf16 %v1015_v8 }
 0x21f   : > { %v603_v16 = vpop.xlane.xlu1 %602 }
 0x220   : > { %v607_v17 = vmax.f32 %v603_v16, 1e-30 }
 0x222   : > { %1305 = vrcp.f32 %v607_v17 }
 0x223   : > { %v1300_v18 = vpop.eup %1299 }
 0x224   : > { %v612_v19 = vmul.f32 %v1300_v18, %v1292_v57 }
 0x226   : > { %v616_v20 = vpack.c.bf16 %v612_v19, %v612_v19 }
 0x227   : > { %v1302_v21 = vpop.eup %1301 }
 0x228   : > { %1219 = vmatmul.mubr.msk.bf16.vlgmr.msra.gmra.mxu0 %vm620_vm5, %v616_v20  ;;  %v613_v22 = vmul.f32 %v1302_v21, %v1294_v59 }
 0x229   : > { %1229 = vmatpush3.bf16.msra.mxu0 %v718_v7  ;;  %1230 = vmatprep.mubr.msk.bf16.mxu0 %vm1347_vm0, %v1346_v0 }
 0x22a   : > { %v617_v23 = vpack.c.bf16 %v613_v22, %v613_v22  ;;  %1240 = vmatprep.subr.bf16.mxu0 %v1346_v0 }
 0x22b   : > { %v1304_v24 = vpop.eup %1303 }
 0x22c   : > { %1225 = vmatmul.mubr.msk.bf16.vlgmr.msra.gmra.mxu1 %vm620_vm5, %v617_v23  ;;  %v614_v26 = vmul.f32 %v1304_v24, %v1296_v61 }
 0x22d   : > { %1235 = vmatpush3.bf16.msra.mxu1 %v764_v9  ;;  %1236 = vmatprep.mubr.msk.bf16.mxu1 %vm1347_vm0, %v1346_v0 }
 0x22e   : > { %v618_v27 = vpack.c.bf16 %v614_v26, %v614_v26  ;;  %1246 = vmatprep.subr.bf16.mxu1 %v1346_v0 }
 0x22f   : > { %v1306_v29 = vpop.eup %1305 }
 0x230   : > { %1231 = vmatmul.mubr.msk.bf16.vlgmr.msra.gmra.mxu0 %vm620_vm5, %v618_v27  ;;  %v615_v30 = vmul.f32 %v1306_v29, %v1298_v63 }
 0x231   : > { %1241 = vmatpush3.bf16.msra.mxu0 %v819_v28  ;;  %1242 = vmatprep.mubr.msk.bf16.mxu0 %vm1347_vm0, %v1346_v0 }
 0x232   : > { %v619_v31 = vpack.c.bf16 %v615_v30, %v615_v30  ;;  %1252 = vmatprep.subr.bf16.mxu0 %v1346_v0 }
 0x234   : > { %1237 = vmatmul.mubr.msk.bf16.vlgmr.msra.gmra.mxu1 %vm620_vm5, %v619_v31 }
 0x235   : > { %1248 = vmatprep.mubr.msk.bf16.mxu1 %vm1347_vm0, %v1346_v0  ;;  %1247 = vmatpush3.bf16.msra.mxu1 %v865_v33 }
 0x236   : > { %1258 = vmatprep.subr.bf16.mxu1 %v1346_v0 }
 0x2e8   : > { %v662_v35 = vpop.f32.mrf.mxu0 }
 0x2e9   : > { %v806_v36 = vpack.c.bf16 %v662_v35, %v662_v35 }
 0x2ea   : > { %v1220_v38 = vpop.f32.mrf.mxu0 }
 0x2eb   : > { %1243 = vmatmul.mubr.msk.bf16.vlgmr.msra.gmra.mxu0 %vm370_vm1, %v806_v36 }
 0x2ec   : > { %v665_v40 = vpop.f32.mrf.mxu0  ;;  %v708_v41 = vpop.f32.mrf.mxu1  ;;  %1253 = vmatpush3.bf16.msra.mxu0 %v911_v37  ;;  %1254 = vmatprep.mubr.msk.bf16.mxu0 %vm1347_vm0, %v1346_v0 }
 0x2ed   : > { %v807_v42 = vpack.c.bf16 %v708_v41, %v708_v41 }
 0x2ee   : > { %v1221_v44 = vpop.f32.mrf.mxu0  ;;  %v1226_v45 = vpop.f32.mrf.mxu1 }
 0x2ef   : > { %1249 = vmatmul.mubr.msk.bf16.vlgmr.msra.gmra.mxu1 %vm370_vm1, %v807_v42 }
 0x2f0   : > { %v711_v46 = vpop.f32.mrf.mxu1  ;;  %v754_v47 = vpop.f32.mrf.mxu0  ;;  %1259 = vmatpush3.bf16.msra.mxu1 %v957_v43  ;;  %1260 = vmatprep.mubr.msk.bf16.mxu1 %vm1347_vm0, %v1346_v0 }
 0x2f1   : > { %v808_v48 = vpack.c.bf16 %v754_v47, %v754_v47 }
 0x2f2   : > { %v1227_v49 = vpop.f32.mrf.mxu1  ;;  %v1232_v50 = vpop.f32.mrf.mxu0 }
 0x2f3   : > { %1255 = vmatmul.mubr.msk.bf16.vlgmr.msra.gmra.mxu0 %vm370_vm1, %v808_v48 }
 0x2f4   : > { %v757_v51 = vpop.f32.mrf.mxu0  ;;  %v800_v52 = vpop.f32.mrf.mxu1 }
 0x2f5   : > { %v809_v53 = vpack.c.bf16 %v800_v52, %v800_v52 }
 0x2f6   : > { %v1233_v54 = vpop.f32.mrf.mxu0  ;;  %v1238_v55 = vpop.f32.mrf.mxu1 }
 0x2f7   : > { %1261 = vmatmul.mubr.msk.bf16.vlgmr.msra.gmra.mxu1 %vm370_vm1, %v809_v53 }
 0x2f8   : > { %v803_v56 = vpop.f32.mrf.mxu1 }
 0x2fa   : > { %v1239_v57 = vpop.f32.mrf.mxu1 }
 0x3ab   : > { %v855_v58 = vpop.f32.mrf.mxu0 }
 0x3ac   : > { %v1000_v3 = vsel %vm999_vm7, %v855_v58, 0.0 }
 0x3ad   : > { %v1244_v59 = vpop.f32.mrf.mxu0 }
 0x3af   : > { %v858_v60 = vpop.f32.mrf.mxu0  ;;  %v901_v61 = vpop.f32.mrf.mxu1 }
 0x3b0   : > { %v1001_v63 = vsel %vm999_vm7, %v901_v61, 0.0 }
 0x3b1   : > { %v1245_v0 = vpop.f32.mrf.mxu0  ;;  %v1250_v62 = vpop.f32.mrf.mxu1  ;;  %v1002_v5 = vadd.f32 %v1001_v63, %v1000_v3 }
 0x3b3   : > { %v904_v1 = vpop.f32.mrf.mxu1  ;;  %v947_v2 = vpop.f32.mrf.mxu0 }
 0x3b4   : > { %v1003_v4 = vsel %vm999_vm7, %v947_v2, 0.0 }
 0x3b5   : > { %v1251_v6 = vpop.f32.mrf.mxu1  ;;  %v1256_v7 = vpop.f32.mrf.mxu0  ;;  %v1004_v9 = vadd.f32 %v1003_v4, %v1002_v5 }
 0x3b7   : > { %v950_v10 = vpop.f32.mrf.mxu0  ;;  %v993_v11 = vpop.f32.mrf.mxu1 }
 0x3b8   : > { %v1005_v12 = vsel %vm999_vm7, %v993_v11, 0.0 }
 0x3b9   : > { %v1006_v14 = vadd.f32 %v1005_v12, %v1004_v9  ;;  %v1257_v16 = vpop.f32.mrf.mxu0  ;;  %v1262_v17 = vpop.f32.mrf.mxu1 }
 0x3bb   : > { %v1014_v18 = vadd.f32 %v1162_v13, %v1006_v14  ;;  %v996_v19 = vpop.f32.mrf.mxu1 }
 0x3bd   : > { %v1017_v20 = vadd.f32 %v1016_v15, %v1014_v18  ;;  %v1263_v21 = vpop.f32.mrf.mxu1 }
 0x3bf   : > { %v1018_v22 = vpack.c.bf16 %v1017_v20, %v1017_v20 }
 0x3c1   : > { %1020 = vst.msk [vmem:[%s355_s16] sm:$0x7] %vm1019_vm8, %v1018_v22 }
 0x3c2 PF: > { %s23_s8 = sadd.s32 1, %s1343_s8   ;;  %s1552_s29 = smov %s1339_s30 }
 0x3c3   : > { %p20_p10 = scmp.ge.s32.totalorder %s23_s8, 4   ;;  %s1553_s30 = smov %s1555_s0 }
 0x3c5   :  { %22 = sbr.rel (!%p20_p10) target bundleno = 17 (0x11), region = 83 }

// kernel: asr_cif_forward.23
= control target key start
LH: loop header
LB: loop body
LE: loop exit
PB: predicated region body
PF: predicated region fallthrough
CT: control target
= control target key end

     0   :  { %vm52_vm0 = vcmask 261120   ;;  %vm124_vm1 = vcmask 519168   ;;  %s211_s1 = inlined_call_operand.vmem [shape: bf16[32,64], index: 1, kind: input, shape index: {}]   ;;  %s212_s0 = inlined_call_operand.vmem [shape: bf16[32,32], index: 0, kind: input, shape index: {}]   ;;  %s213_s2 = inlined_call_operand.vmem [shape: f32[1,64], index: 2, kind: input, shape index: {}]   ;;  %s214_s3 = inlined_call_operand.vmem [shape: bf16[32,64], index: 3, kind: output, shape index: {}]  }
   0x1   :  { %v160_v0 = vld [vmem:[%s211_s1 + $0x8] sm:$0xff]   ;;  %v161_v1 = vld [vmem:[%s211_s1] sm:$0xff]  }
   0x2   :  { %152 = vmatprep.subr.bf16.mxu0 %v160_v0  ;;  %v162_v2 = vld [vmem:[%s212_s0] sm:$0xff]   ;;  %v163_v3 = vld [vmem:[%s212_s0 + $0x8] sm:$0xff]  }
   0x3   :  { %153 = vmatpush3.bf16.msra.mxu0 %v160_v0  ;;  %156 = vmatprep.mubr.msk.bf16.mxu0 %vm52_vm0, %v162_v2  ;;  %v133_v4 = vld [vmem:[%s213_s2] ss:$0 sm:$0xff] }
   0x4   :  { %154 = vmatprep.subr.bf16.mxu0 %v161_v1 }
   0x7   :  { %155 = vmatpush3.bf16.msra.mxu0 %v161_v1 }
   0xa   :  { %157 = vmatmul.mubr.msk.bf16.vlgmr.msra.gmra.mxu0 %vm52_vm0, %v163_v3 }
  0xca   :  { %v158_v5 = vpop.f32.mrf.mxu0 }
  0xcb   :  { %v102_v6 = vadd.f32 %v158_v5, %v133_v4 }
  0xcc   :  { %v93_v7 = vpop.f32.mrf.mxu0 }
  0xcd   :  { %v146_v8 = vpack.c.bf16 %v102_v6, %v102_v6  ;;  %v94_v9 = vadd.f32 %v133_v4, %v93_v7 }
  0xce   :  { %v159_v10 = vpop.f32.mrf.mxu0 }
  0xcf   :  { %127 = vst.msk [vmem:[%s214_s3 + $0x8] sm:$0xf] %vm124_vm1, %v146_v8  ;;  %v144_v11 = vpack.c.bf16 %v94_v9, %v94_v9  ;;  %v105_v12 = vadd.f32 %v159_v10, %v133_v4 }
  0xd0   :  { %v96_v13 = vpop.f32.mrf.mxu0 }
  0xd1   :  { %125 = vst.msk [vmem:[%s214_s3] sm:$0xf] %vm124_vm1, %v144_v11  ;;  %v147_v14 = vpack.c.bf16 %v105_v12, %v105_v12  ;;  %v97_v15 = vadd.f32 %v133_v4, %v96_v13 }
  0xd3   :  { %128 = vst.msk [vmem:[%s214_s3 + $0xc] sm:$0xf] %vm124_vm1, %v147_v14  ;;  %v145_v16 = vpack.c.bf16 %v97_v15, %v97_v15 }
  0xd5   :  { %126 = vst.msk [vmem:[%s214_s3 + $0x4] sm:$0xf] %vm124_vm1, %v145_v16 }

// kernel: asr_cif_forward.26
= control target key start
LH: loop header
LB: loop body
LE: loop exit
PB: predicated region body
PF: predicated region fallthrough
CT: control target
= control target key end

     0   :  { %vm32_vm0 = vcmask 261120   ;;  %vm36_vm1 = vcmask 257024   ;;  %v259_v16 = vmov 0.0   ;;  %vm260_vm2 = vmmov 0   ;;  %s357_s0 = inlined_call_operand.vmem [shape: bf16[12,32], index: 0, kind: input, shape index: {}]   ;;  %s358_s3 = inlined_call_operand.vmem [shape: bf16[32,16], index: 3, kind: input, shape index: {}]   ;;  %s359_s1 = inlined_call_operand.vmem [shape: f32[1,32], index: 1, kind: input, shape index: {}]   ;;  %s360_s2 = inlined_call_operand.vmem [shape: f32[1,32], index: 2, kind: input, shape index: {}]   ;;  %s361_s4 = inlined_call_operand.vmem [shape: f32[1,16], index: 4, kind: input, shape index: {}]   ;;  %s362_s5 = inlined_call_operand.vmem [shape: s32[12,1], index: 5, kind: input, shape index: {}]   ;;  %s363_s6 = inlined_call_operand.vmem [shape: f32[12,1], index: 6, kind: output, shape index: {0}]   ;;  %s364_s7 = inlined_call_operand.vmem [shape: f32[12,1], index: 7, kind: output, shape index: {1}]  }
   0x1   :  { %v26_v0 = vld [vmem:[%s357_s0] sm:$0xf]  ;;  %v27_v1 = vld [vmem:[%s357_s0 + $0x4] sm:$0x3]  ;;  %232 = vmatprep.subr.bf16.mxu0 %v259_v16  ;;  %v245_v17 = vld [vmem:[%s358_s3 + $0x8] sm:$0xff]   ;;  %236 = vmatprep.mubr.msk.bf16.mxu0 %vm260_vm2, %v259_v16  ;;  %v261_v36 = vmov 0   ;;  %v171_v53 = vlaneseq }
   0x2   :  { %v28_v2 = vunpack.c.l.bf16 %v26_v0  ;;  %v29_v3 = vunpack.c.l.bf16 %v27_v1  ;;  %233 = vmatpush3.bf16.msra.mxu0 %v245_v17  ;;  %v246_v18 = vld [vmem:[%s358_s3] sm:$0xff]   ;;  %244 = vset.pattern.permute.xlu1 %v261_v36  ;;  %vm145_vm3 = vcmask 130048   ;;  %vm149_vm4 = vcmask 125952   ;;  %v174_v46 = vld [vmem:[%s362_s5 + $0x8] sm:$0xf] }
   0x3   :  { %234 = vmatprep.subr.bf16.mxu0 %v259_v16  ;;  %v221_v27 = vld [vmem:[%s359_s1] ss:$0 sm:$0xff]  ;;  %243 = vset.pattern.permute.xlu0 %v261_v36  ;;  %v172_v55 = vand.u32 127, %v171_v53  ;;  %vm197_vm7 = vcmask 7168   ;;  %vm199_vm8 = vcmask 3072  }
   0x4   :  { %v33_v4 = vsel %vm32_vm0, %v28_v2, 0.0  ;;  %v37_v5 = vsel %vm36_vm1, %v29_v3, 0.0  ;;  %v222_v31 = vld [vmem:[%s360_s2] ss:$0 sm:$0xff] }
   0x5   :  { %34 = vadd.xlane.f32.xlu0 %v33_v4  ;;  %v223_v37 = vld [vmem:[%s361_s4] ss:$0 sm:$0xff] }
   0x6   :  { %235 = vmatpush3.bf16.msra.mxu0 %v246_v18  ;;  %v173_v47 = vld [vmem:[%s362_s5] sm:$0xff] }
   0x9   :  { %38 = vadd.xlane.f32.xlu0 %v37_v5 }
  0x8e   :  { %v35_v6 = vpop.xlane.xlu0 %34 }
  0x8f   :  { %v41_v7 = vmul.f32 0.03125, %v35_v6 }
  0x91   :  { %v43_v8 = vsub.f32 %v28_v2, %v41_v7 }
  0x92   :  { %v39_v9 = vpop.xlane.xlu0 %38 }
  0x93   :  { %v42_v10 = vmul.f32 0.03125, %v39_v9  ;;  %v45_v11 = vmul.f32 %v43_v8, %v43_v8 }
  0x95   :  { %v44_v12 = vsub.f32 %v29_v3, %v42_v10  ;;  %v47_v13 = vsel %vm32_vm0, %v45_v11, 0.0 }
  0x96   :  { %48 = vadd.xlane.f32.xlu1 %v47_v13 }
  0x97   :  { %v46_v14 = vmul.f32 %v44_v12, %v44_v12 }
  0x99   :  { %v50_v15 = vsel %vm36_vm1, %v46_v14, 0.0 }
  0x9a   :  { %51 = vadd.xlane.f32.xlu1 %v50_v15 }
 0x11f   :  { %v49_v19 = vpop.xlane.xlu1 %48 }
 0x120   :  { %v53_v20 = vmul.f32 0.03125, %v49_v19 }
 0x122   :  { %v55_v21 = vadd.f32 1e-05, %v53_v20 }
 0x123   :  { %v52_v22 = vpop.xlane.xlu1 %51 }
 0x124   :  { %247 = vrsqrt.f32 %v55_v21  ;;  %v54_v23 = vmul.f32 0.03125, %v52_v22 }
 0x126   :  { %v56_v24 = vadd.f32 1e-05, %v54_v23 }
 0x128   :  { %249 = vrsqrt.f32 %v56_v24 }
 0x131   :  { %v248_v25 = vpop.eup %247 }
 0x132   :  { %v59_v26 = vmul.f32 %v248_v25, %v43_v8 }
 0x134   :  { %v67_v30 = vmul.f32 %v221_v27, %v59_v26 }
 0x135   :  { %v250_v28 = vpop.eup %249 }
 0x136   :  { %v60_v29 = vmul.f32 %v250_v28, %v44_v12  ;;  %v75_v33 = vadd.f32 %v222_v31, %v67_v30 }
 0x138   :  { %v68_v32 = vmul.f32 %v221_v27, %v60_v29 }
 0x13a   :  { %v76_v34 = vadd.f32 %v222_v31, %v68_v32 }
 0x13c   :  { %v77_v35 = vpack.c.bf16 %v76_v34, %v75_v33 }
 0x13e   :  { %237 = vmatmul.mubr.msk.bf16.vlgmr.msra.gmra.mxu0 %vm32_vm0, %v77_v35 }
 0x1fe   :  { %v138_v38 = vpop.f32.mrf.mxu0 }
 0x1ff   :  { %v139_v39 = vadd.f32 %v223_v37, %v138_v38 }
 0x200   :  { %v238_v40 = vpop.f32.mrf.mxu0 }
 0x201   :  { %v146_v41 = vsel %vm145_vm3, %v139_v39, -inf  ;;  %v201_v4 = vsel %vm145_vm3, %v139_v39, 0.0 }
 0x202   :  { %147 = vmax.xlane.f32.xlu0 %v146_v41  ;;  %v141_v42 = vpop.f32.mrf.mxu0 }
 0x203   :  { %v142_v43 = vadd.f32 %v223_v37, %v141_v42 }
 0x204   :  { %v239_v44 = vpop.f32.mrf.mxu0 }
 0x205   :  { %v150_v45 = vsel %vm149_vm4, %v142_v43, -inf  ;;  %v204_v5 = vsel %vm149_vm4, %v142_v43, 0.0 }
 0x206   :  { %151 = vmax.xlane.f32.xlu1 %v150_v45 }
 0x217   :  { %179 = vperm.xlu1 %244, %v174_v46  }
 0x218   :  { %176 = vperm.xlu0 %243, %v173_v47  }
 0x28b   :  { %v148_v48 = vpop.xlane.xlu0 %147 }
 0x28c   :  { %v153_v49 = vsub.f32 %v139_v39, %v148_v48 }
 0x28e   :  { %v155_v50 = vmul.f32 1.442695, %v153_v49 }
 0x28f   :  { %v152_v51 = vpop.xlane.xlu1 %151 }
 0x290   :  { %251 = vpow2.f32 %v155_v50  ;;  %v154_v52 = vsub.f32 %v142_v43, %v152_v51 }
 0x292   :  { %v157_v54 = vmul.f32 1.442695, %v154_v52 }
 0x293   :  { %v177_v56 = vpop.permute.xlu0 %176  ;;  %v180_v57 = vpop.permute.xlu1 %179 }
 0x294   :  { %253 = vpow2.f32 %v157_v54  ;;  %vm181_vm5 = vcmp.eq.s32.totalorder %v172_v55, %v177_v56  ;;  %vm182_vm6 = vcmp.eq.s32.totalorder %v172_v55, %v180_v57 }
 0x295   :  { %v227_v58 = vsel %vm181_vm5, 1.0, %v259_v16  ;;  %v228_v62 = vsel %vm182_vm6, 1.0, %v259_v16 }
 0x296   :  { %v187_v61 = vmul.f32 %v227_v58, %v139_v39  ;;  %v188_v2 = vmul.f32 %v228_v62, %v142_v43 }
 0x298   :  { %v189_v0 = vsel %vm145_vm3, %v187_v61, 0.0  ;;  %v192_v3 = vsel %vm149_vm4, %v188_v2, 0.0 }
 0x29d   :  { %v252_v59 = vpop.eup %251 }
 0x29e   :  { %v159_v60 = vsel %vm145_vm3, %v252_v59, 0.0 }
 0x29f   :  { %160 = vadd.xlane.f32.xlu1 %v159_v60 }
 0x2a1   :  { %v254_v63 = vpop.eup %253 }
 0x2a2   :  { %v162_v1 = vsel %vm149_vm4, %v254_v63, 0.0 }
 0x2a3   :  { %190 = vadd.xlane.f32.xlu1 %v189_v0  ;;  %163 = vadd.xlane.f32.xlu0 %v162_v1 }
 0x2a7   :  { %193 = vadd.xlane.f32.xlu1 %v192_v3 }
 0x2ab   :  { %202 = vadd.xlane.f32.xlu1 %v201_v4 }
 0x2af   :  { %205 = vadd.xlane.f32.xlu1 %v204_v5 }
 0x328   :  { %v161_v6 = vpop.xlane.xlu1 %160 }
 0x329   :  { %255 = vlog2.f32 %v161_v6 }
 0x32c   :  { %v164_v7 = vpop.xlane.xlu0 %163  ;;  %v191_v8 = vpop.xlane.xlu1 %190 }
 0x32d   :  { %257 = vlog2.f32 %v164_v7 }
 0x330   :  { %v194_v9 = vpop.xlane.xlu1 %193 }
 0x334   :  { %v203_v14 = vpop.xlane.xlu1 %202 }
 0x336   :  { %v256_v10 = vpop.eup %255 }
 0x337   :  { %v166_v11 = vmul.f32 0.6931472, %v256_v10 }
 0x338   :  { %v206_v22 = vpop.xlane.xlu1 %205 }
 0x339   :  { %v169_v12 = vadd.f32 %v166_v11, %v148_v48 }
 0x33a   :  { %v258_v13 = vpop.eup %257 }
 0x33b   :  { %v168_v15 = vmul.f32 0.6931472, %v258_v13  ;;  %v195_v16 = vsub.f32 %v191_v8, %v169_v12  ;;  %v207_v17 = vmul.f32 16.0, %v169_v12 }
 0x33d   :  { %198 = vst.msk [vmem:[%s363_s6] sm:$0xff] %vm197_vm7, %v195_v16  ;;  %v170_v18 = vadd.f32 %v168_v15, %v152_v51  ;;  %v209_v19 = vsub.f32 %v203_v14, %v207_v17 }
 0x33f   :  { %v196_v20 = vsub.f32 %v194_v9, %v170_v18  ;;  %211 = vst.msk [vmem:[%s364_s7] sm:$0xff] %vm197_vm7, %v209_v19  ;;  %v208_v21 = vmul.f32 16.0, %v170_v18 }
 0x341   :  { %200 = vst.msk [vmem:[%s363_s6 + $0x8] sm:$0xf] %vm199_vm8, %v196_v20  ;;  %v210_v23 = vsub.f32 %v206_v22, %v208_v21 }
 0x343   :  { %212 = vst.msk [vmem:[%s364_s7 + $0x8] sm:$0xf] %vm199_vm8, %v210_v23 }

// kernel: asr_cif_forward.25
= control target key start
LH: loop header
LB: loop body
LE: loop exit
PB: predicated region body
PF: predicated region fallthrough
CT: control target
= control target key end

     0   :  { %vm33_vm0 = vcmask 261120   ;;  %vm37_vm1 = vcmask 257024   ;;  %v306_v16 = vmov 0.0   ;;  %vm307_vm2 = vmmov 0   ;;  %s406_s0 = inlined_call_operand.vmem [shape: bf16[12,32], index: 0, kind: input, shape index: {}]   ;;  %s407_s3 = inlined_call_operand.vmem [shape: bf16[32,64], index: 3, kind: input, shape index: {}]   ;;  %s408_s5 = inlined_call_operand.vmem [shape: bf16[64,32], index: 5, kind: input, shape index: {}]   ;;  %s409_s1 = inlined_call_operand.vmem [shape: f32[1,32], index: 1, kind: input, shape index: {}]   ;;  %s410_s2 = inlined_call_operand.vmem [shape: f32[1,32], index: 2, kind: input, shape index: {}, may-alias: {2,6}]   ;;  %s411_s4 = inlined_call_operand.vmem [shape: f32[1,64], index: 4, kind: input, shape index: {}]   ;;  %s412_s6 = inlined_call_operand.vmem [shape: f32[1,32], index: 6, kind: input, shape index: {}, may-alias: {2,6}]   ;;  %s413_s7 = inlined_call_operand.vmem [shape: bf16[12,32], index: 7, kind: output, shape index: {}]  }
   0x1   :  { %v27_v0 = vld [vmem:[%s406_s0] sm:$0xf]  ;;  %v28_v1 = vld [vmem:[%s406_s0 + $0x4] sm:$0x3]  ;;  %274 = vmatprep.subr.bf16.mxu0 %v306_v16  ;;  %v296_v17 = vld [vmem:[%s407_s3 + $0x8] sm:$0xff]   ;;  %278 = vmatprep.mubr.msk.bf16.mxu0 %vm307_vm2, %v306_v16  ;;  %vm188_vm3 = vcmask 523264  }
   0x2   :  { %v354_v2 = vunpack.c.l.bf16 %v27_v0  ;;  %v356_v3 = vunpack.c.l.bf16 %v28_v1  ;;  %282 = vmatprep.subr.bf16.mxu1 %v306_v16  ;;  %290 = vmatprep.mubr.msk.bf16.mxu1 %vm307_vm2, %v306_v16  ;;  %v297_v18 = vld [vmem:[%s407_s3] sm:$0xff]   ;;  %v298_v19 = vld [vmem:[%s408_s5 + $0x18] sm:$0xff]   ;;  %v299_v37 = vld [vmem:[%s408_s5 + $0x10] sm:$0xff]   ;;  %vm244_vm4 = vcmask 254976  }
   0x3   :  { %275 = vmatpush3.bf16.msra.mxu0 %v296_v17  ;;  %283 = vmatpush3.bf16.msra.mxu1 %v298_v19  ;;  %v250_v28 = vld [vmem:[%s409_s1] ss:$0 sm:$0xff]  ;;  %v300_v38 = vld [vmem:[%s408_s5 + $0x8] sm:$0xff]  }
   0x4   :  { %v34_v4 = vsel %vm33_vm0, %v354_v2, 0.0  ;;  %v38_v5 = vsel %vm37_vm1, %v356_v3, 0.0  ;;  %276 = vmatprep.subr.bf16.mxu0 %v306_v16  ;;  %284 = vmatprep.subr.bf16.mxu1 %v306_v16  ;;  %v251_v32 = vld [vmem:[%s410_s2] ss:$0 sm:$0xff] }
   0x5   :  { %35 = vadd.xlane.f32.xlu0 %v34_v4  ;;  %v301_v39 = vld [vmem:[%s408_s5] sm:$0xff]  }
   0x6   :  { %v252_v40 = vld [vmem:[%s411_s4] ss:$0 sm:$0xff] }
   0x7   :  { %277 = vmatpush3.bf16.msra.mxu0 %v297_v18  ;;  %285 = vmatpush3.bf16.msra.mxu1 %v299_v37  ;;  %v256_v50 = vld [vmem:[%s412_s6] ss:$0 sm:$0xff] }
   0x8   :  { %286 = vmatprep.subr.bf16.mxu1 %v306_v16 }
   0x9   :  { %39 = vadd.xlane.f32.xlu0 %v38_v5 }
   0xb   :  { %287 = vmatpush3.bf16.msra.mxu1 %v300_v38 }
   0xc   :  { %288 = vmatprep.subr.bf16.mxu1 %v306_v16 }
   0xf   :  { %289 = vmatpush3.bf16.msra.mxu1 %v301_v39 }
  0x8e   :  { %v36_v6 = vpop.xlane.xlu0 %35 }
  0x8f   :  { %v42_v7 = vmul.f32 0.03125, %v36_v6 }
  0x91   :  { %v44_v8 = vsub.f32 %v354_v2, %v42_v7 }
  0x92   :  { %v40_v9 = vpop.xlane.xlu0 %39 }
  0x93   :  { %v43_v10 = vmul.f32 0.03125, %v40_v9  ;;  %v46_v11 = vmul.f32 %v44_v8, %v44_v8 }
  0x95   :  { %v45_v12 = vsub.f32 %v356_v3, %v43_v10  ;;  %v48_v13 = vsel %vm33_vm0, %v46_v11, 0.0 }
  0x96   :  { %49 = vadd.xlane.f32.xlu1 %v48_v13 }
  0x97   :  { %v47_v14 = vmul.f32 %v45_v12, %v45_v12 }
  0x99   :  { %v51_v15 = vsel %vm37_vm1, %v47_v14, 0.0 }
  0x9a   :  { %52 = vadd.xlane.f32.xlu1 %v51_v15 }
 0x11f   :  { %v50_v20 = vpop.xlane.xlu1 %49 }
 0x120   :  { %v54_v21 = vmul.f32 0.03125, %v50_v20 }
 0x122   :  { %v56_v22 = vadd.f32 1e-05, %v54_v21 }
 0x123   :  { %v53_v23 = vpop.xlane.xlu1 %52 }
 0x124   :  { %302 = vrsqrt.f32 %v56_v22  ;;  %v55_v24 = vmul.f32 0.03125, %v53_v23 }
 0x126   :  { %v57_v25 = vadd.f32 1e-05, %v55_v24 }
 0x128   :  { %304 = vrsqrt.f32 %v57_v25 }
 0x131   :  { %v303_v26 = vpop.eup %302 }
 0x132   :  { %v60_v27 = vmul.f32 %v303_v26, %v44_v8 }
 0x134   :  { %v68_v31 = vmul.f32 %v250_v28, %v60_v27 }
 0x135   :  { %v305_v29 = vpop.eup %304 }
 0x136   :  { %v61_v30 = vmul.f32 %v305_v29, %v45_v12  ;;  %v76_v34 = vadd.f32 %v251_v32, %v68_v31 }
 0x138   :  { %v69_v33 = vmul.f32 %v250_v28, %v61_v30 }
 0x13a   :  { %v77_v35 = vadd.f32 %v251_v32, %v69_v33 }
 0x13c   :  { %v78_v36 = vpack.c.bf16 %v77_v35, %v76_v34 }
 0x13e   :  { %279 = vmatmul.mubr.msk.bf16.vlgmr.msra.gmra.mxu0 %vm33_vm0, %v78_v36 }
 0x1fe   :  { %v139_v41 = vpop.f32.mrf.mxu0 }
 0x1ff   :  { %v140_v43 = vadd.f32 %v252_v40, %v139_v41 }
 0x200   :  { %v280_v42 = vpop.f32.mrf.mxu0 }
 0x201   :  { %v146_v47 = vmax.f32 %v140_v43, 0.0 }
 0x202   :  { %v142_v44 = vpop.f32.mrf.mxu0 }
 0x203   :  { %v143_v45 = vadd.f32 %v252_v40, %v142_v44 }
 0x204   :  { %v281_v46 = vpop.f32.mrf.mxu0 }
 0x205   :  { %v147_v48 = vmax.f32 %v143_v45, 0.0 }
 0x207   :  { %v148_v49 = vpack.c.bf16 %v147_v48, %v146_v47 }
 0x209   :  { %291 = vmatmul.mubr.msk.bf16.vlgmr.msra.gmra.mxu1 %vm188_vm3, %v148_v49 }
 0x2c9   :  { %v226_v51 = vpop.f32.mrf.mxu1 }
 0x2ca   :  { %v227_v52 = vadd.f32 %v256_v50, %v226_v51 }
 0x2cb   :  { %v292_v53 = vpop.f32.mrf.mxu1 }
 0x2cc   :  { %v233_v54 = vadd.f32 %v227_v52, %v354_v2 }
 0x2cd   :  { %v229_v55 = vpop.f32.mrf.mxu1 }
 0x2ce   :  { %v264_v56 = vpack.c.bf16 %v233_v54, %v233_v54  ;;  %v230_v57 = vadd.f32 %v256_v50, %v229_v55 }
 0x2cf   :  { %v293_v58 = vpop.f32.mrf.mxu1 }
 0x2d0   :  { %243 = vst.msk [vmem:[%s413_s7] sm:$0xf] %vm37_vm1, %v264_v56  ;;  %v234_v59 = vadd.f32 %v230_v57, %v356_v3 }
 0x2d2   :  { %v265_v60 = vpack.c.bf16 %v234_v59, %v234_v59 }
 0x2d4   :  { %245 = vst.msk [vmem:[%s413_s7 + $0x4] sm:$0x3] %vm244_vm4, %v265_v60 }

// kernel: asr_cif_forward.24
= control target key start
LH: loop header
LB: loop body
LE: loop exit
PB: predicated region body
PF: predicated region fallthrough
CT: control target
= control target key end

     0   :  { %s1599_s0 = inlined_call_operand.vmem [shape: s32[2], index: 0, kind: input, shape index: {}]   ;;  %s1600_s1 = inlined_call_operand.vmem [shape: bf16[2,4,6,8], index: 1, kind: input, shape index: {}]   ;;  %s1601_s2 = inlined_call_operand.vmem [shape: bf16[2,4,16,8], index: 2, kind: input, shape index: {}]   ;;  %s1602_s3 = inlined_call_operand.vmem [shape: bf16[2,4,16,8], index: 3, kind: input, shape index: {}]   ;;  %s1603_s4 = inlined_call_operand.vmem [shape: bf16[4,8,32], index: 4, kind: input, shape index: {}]   ;;  %s1604_s5 = inlined_call_operand.vmem [shape: f32[1,32], index: 5, kind: input, shape index: {}]   ;;  %s1605_s6 = inlined_call_operand.vmem [shape: bf16[2,6,32], index: 6, kind: input, shape index: {}]   ;;  %s1606_s7 = inlined_call_operand.vmem [shape: bf16[2,6,32], index: 7, kind: output, shape index: {}]  }
   0x1   :  { %s12_s26 = sshll.u32 %s1599_s0, 4  ;;  %s13_s26 = int_to_ptr.vmem [resolvable:$true] %s12_s26 }
   0x2   :  { %s1362_s27 = scalar_lea.vmem %s13_s26, 16  ;;  %p1367_p1 = scmp.lt.s32.totalorder %s13_s26, %s13_s26 }
   0x3   :  { %p1363_p0 = scmp.ne.s32.totalorder %s13_s26, %s1362_s27  ;;  %p1368_p2 = scmp.lt.s32.totalorder %s1362_s27, %s1362_s27 }
   0x5   :  { %p1369_p3 = por %p1368_p2, %p1367_p1 }
   0x7   :  { %p1370_p4 = pnand %p1369_p3, %p1363_p0 }
   0x9   :  { %1373 = shalt.err (!%p1370_p4)  }
   0xa   :  { %s1400_s28 = smov [#allocation3]  }
   0xb   :  { %15 = dma.vmem_to_smem %s13_s26, 16, %s1400_s28, [#allocation2] }
   0xc   :  { %1386 = dma.done.wait [#allocation2], 16 }
   0xd   :  { %1387 = vsyncadd [#allocation2], 4294967280 }
   0xe   :  { %17 = sfence }
   0xf   :  { %s1446_s29 = smov 0   ;;  %s1448_s30 = smov 0  }
  0x10   :  { %s1450_s8 = smov 0  }
  0x11 LB: > { %s35_s0 = sadd.s32 1, %s1394_s30  ;;  %p1180_p5 = scmp.ge.s32.totalorder %s1398_s8, 1  ;;  %s1398_s8 = sphi %s1450_s8, %s23_s8   ;;  %s1394_s30 = sphi %s1448_s30, %s1610_s30   ;;  %s1390_s29 = sphi %s1446_s29, %s1609_s29  }
  0x12   : > { %p37_p6 = scmp.ge.s32.totalorder %s35_s0, 2  ;;  %p272_p7 = scmp.lt.s32.totalorder %s1398_s8, 3 }
  0x14   : > { %s1612_s0 = smov (%p37_p6, %s35_s0), 0  ;;  %p273_p8 = pnand %p1180_p5, %p272_p7 }
  0x15   : > { %p324_p9 = scmp.lt.s32.totalorder (!%p273_p8), %s1390_s29, 1  ;;  %s357_s21 = sld [smem:[#allocation3 + %s1390_s29]] (!%p273_p8) }
  0x16   : > { %276 = sbr.rel (%p273_p8) target bundleno = 962 (0x3c2), region = 44 }
  0x1b   : > { %v1401_v0 = vmov 0.0   ;;  %s1470_s9 = scalar_select %p324_p9, %s1390_s29, 1  ;;  %vm1402_vm0 = vmmov 0   ;;  %vm383_vm1 = vcmask 64512   ;;  %v587_v13 = vlaneseq }
  0x1c   : > { %1239 = vmatprep.subr.bf16.mxu0 %v1401_v0  ;;  %1245 = vmatprep.subr.bf16.mxu1 %v1401_v0  ;;  %v589_v15 = vstv %s357_s21  ;;  %vm595_vm3 = vcmask 128000   ;;  %vm654_vm4 = vcmask 130048   ;;  %vm856_vm5 = vcmask 1043456  }
  0x1d   : > { %1241 = vmatprep.mubr.msk.bf16.mxu0 %vm1402_vm0, %v1401_v0  ;;  %1247 = vmatprep.mubr.msk.bf16.mxu1 %vm1402_vm0, %v1401_v0  ;;  %s1213_s10 = sshll.u32 %s1470_s9, 5  ;;  %s1212_s14 = sshll.u32 %s1470_s9, 4  ;;  %v588_v14 = vand.u32 127, %v587_v13  ;;  %vm1038_vm6 = vcmask 259072   ;;  %vm1058_vm7 = vcmask 256000  }
  0x1e   : > { %s336_s13 = scalar_lea.vmem %s1601_s2, %s1213_s10  ;;  %s331_s17 = scalar_lea.vmem %s1600_s1, %s1212_s14 }
  0x1f   : > { %v1338_v1 = vld [vmem:[%s336_s13] sm:$0xff]   ;;  %v1339_v2 = vld [vmem:[%s336_s13 + $0x8] sm:$0xff]   ;;  %v1340_v5 = vld [vmem:[%s336_s13 + $0x10] sm:$0xff]   ;;  %s1490_s20 = scalar_lea.vmem %s1602_s3, %s1213_s10  ;;  %vm1510_vm2 = vcmp.lt.s32.totalorder %v588_v14, %v589_v15  ;;  %s1187_s10 = sshll.u32 %s1470_s9, 2 }
  0x20   : > { %v388_v3 = vsel %vm383_vm1, %v1338_v1, 0  ;;  %v439_v4 = vsel %vm383_vm1, %v1339_v2, 0  ;;  %v358_v6 = vld [vmem:[%s331_s17] sm:$0x7]  ;;  %v1341_v7 = vld [vmem:[%s336_s13 + $0x18] sm:$0xff]   ;;  %v490_v9 = vsel %vm383_vm1, %v1340_v5, 0  ;;  %s348_s13 = scalar_lea.vmem %s1605_s6, %s1187_s10 }
  0x21   : > { %1240 = vmatpush3.bf16.xpose.msra.mxu0 %v388_v3  ;;  %1246 = vmatpush3.bf16.xpose.msra.mxu1 %v439_v4  ;;  %v359_v8 = vld [vmem:[%s331_s17 + $0x4] sm:$0x7]  ;;  %v541_v10 = vsel %vm383_vm1, %v1341_v7, 0  ;;  %v360_v11 = vld [vmem:[%s331_s17 + $0x8] sm:$0x7]  ;;  %v1344_v14 = vld [vmem:[%s1490_s20 + $0x10] sm:$0xff]  }
  0x22   : > { %1251 = vmatprep.subr.bf16.mxu0 %v1401_v0  ;;  %1257 = vmatprep.subr.bf16.mxu1 %v1401_v0  ;;  %v361_v12 = vld [vmem:[%s331_s17 + $0xc] sm:$0x7]  ;;  %v1342_v2 = vld [vmem:[%s1490_s20] sm:$0xff]   ;;  %s355_s17 = scalar_lea.vmem %s1606_s7, %s1187_s10 }
  0x23   : > { %v1343_v3 = vld [vmem:[%s1490_s20 + $0x8] sm:$0xff]  }
  0x28   : > { %1242 = vmatmul.mubr.msk.bf16.vlgmr.msra.gmra.mxu0 %vm383_vm1, %v358_v6  ;;  %1248 = vmatmul.mubr.msk.bf16.vlgmr.msra.gmra.mxu1 %vm383_vm1, %v359_v8 }
  0x29   : > { %1252 = vmatpush3.bf16.xpose.msra.mxu0 %v490_v9  ;;  %1258 = vmatpush3.bf16.xpose.msra.mxu1 %v541_v10 }
  0x2a   : > { %1253 = vmatprep.mubr.msk.bf16.mxu0 %vm1402_vm0, %v1401_v0  ;;  %1259 = vmatprep.mubr.msk.bf16.mxu1 %vm1402_vm0, %v1401_v0 }
  0x2b   : > { %1263 = vmatprep.subr.bf16.mxu0 %v1401_v0  ;;  %1269 = vmatprep.subr.bf16.mxu1 %v1401_v0 }
  0x30   : > { %1254 = vmatmul.mubr.msk.bf16.vlgmr.msra.gmra.mxu0 %vm383_vm1, %v360_v11  ;;  %1260 = vmatmul.mubr.msk.bf16.vlgmr.msra.gmra.mxu1 %vm383_vm1, %v361_v12 }
  0x31   : > { %1265 = vmatprep.mubr.msk.bf16.mxu0 %vm1402_vm0, %v1401_v0  ;;  %1271 = vmatprep.mubr.msk.bf16.mxu1 %vm1402_vm0, %v1401_v0 }
  0x32   : > { %1264 = vmatpush3.bf16.msra.mxu0 %v1342_v2  ;;  %1270 = vmatpush3.bf16.msra.mxu1 %v1343_v3 }
  0x33   : > { %1275 = vmatprep.subr.bf16.mxu0 %v1401_v0  ;;  %1281 = vmatprep.subr.bf16.mxu1 %v1401_v0 }
  0xe8   : > { %v424_v16 = vpop.f32.mrf.mxu0  ;;  %v475_v19 = vpop.f32.mrf.mxu1 }
  0xe9   : > { %v583_v18 = vmul.f32 0.35355338, %v424_v16  ;;  %v584_v20 = vmul.f32 0.35355338, %v475_v19 }
  0xea   : > { %v1243_v21 = vpop.f32.mrf.mxu0  ;;  %v1249_v22 = vpop.f32.mrf.mxu1 }
  0xeb   : > { %v591_v23 = vsel %vm1510_vm2, %v583_v18, -1e+30  ;;  %v592_v26 = vsel %vm1510_vm2, %v584_v20, -1e+30  ;;  %v1345_v18 = vld [vmem:[%s1490_s20 + $0x18] sm:$0xff]  }
  0xec   : > { %v427_v24 = vpop.f32.mrf.mxu0  ;;  %v596_v25 = vsel %vm595_vm3, %v591_v23, -inf  ;;  %v478_v27 = vpop.f32.mrf.mxu1  ;;  %v599_v29 = vsel %vm595_vm3, %v592_v26, -inf  ;;  %v849_v21 = vld [vmem:[%s1603_s4] sm:$0xf] }
  0xed   : > { %597 = vmax.xlane.f32.xlu0 %v596_v25  ;;  %v858_v24 = vsel %vm856_vm5, %v849_v21, 0 }
  0xee   : > { %v1244_v28 = vpop.f32.mrf.mxu0  ;;  %v1250_v30 = vpop.f32.mrf.mxu1 }
  0xef   : > { %v850_v28 = vld [vmem:[%s1603_s4 + $0x4] sm:$0xf]  ;;  %v851_v30 = vld [vmem:[%s1603_s4 + $0x8] sm:$0xf] }
  0xf0   : > { %v526_v31 = vpop.f32.mrf.mxu0  ;;  %v577_v33 = vpop.f32.mrf.mxu1 }
  0xf1   : > { %v585_v32 = vmul.f32 0.35355338, %v526_v31  ;;  %600 = vmax.xlane.f32.xlu0 %v599_v29  ;;  %v586_v34 = vmul.f32 0.35355338, %v577_v33  ;;  %v904_v29 = vsel %vm856_vm5, %v850_v28, 0  ;;  %v950_v33 = vsel %vm856_vm5, %v851_v30, 0 }
  0xf2   : > { %v1255_v35 = vpop.f32.mrf.mxu0  ;;  %v1261_v36 = vpop.f32.mrf.mxu1 }
  0xf3   : > { %v593_v37 = vsel %vm1510_vm2, %v585_v32, -1e+30  ;;  %v594_v40 = vsel %vm1510_vm2, %v586_v34, -1e+30  ;;  %v852_v35 = vld [vmem:[%s1603_s4 + $0xc] sm:$0xf] }
  0xf4   : > { %v529_v38 = vpop.f32.mrf.mxu0  ;;  %v602_v39 = vsel %vm595_vm3, %v593_v37, -inf  ;;  %v580_v41 = vpop.f32.mrf.mxu1  ;;  %v605_v43 = vsel %vm595_vm3, %v594_v40, -inf }
  0xf5   : > { %603 = vmax.xlane.f32.xlu1 %v602_v39  ;;  %v996_v39 = vsel %vm856_vm5, %v852_v35, 0 }
  0xf6   : > { %v1256_v42 = vpop.f32.mrf.mxu0  ;;  %v1262_v44 = vpop.f32.mrf.mxu1 }
  0xf9   : > { %606 = vmax.xlane.f32.xlu1 %v605_v43 }
 0x176   : > { %v598_v45 = vpop.xlane.xlu0 %597 }
 0x177   : > { %v608_v46 = vsub.f32 %v591_v23, %v598_v45 }
 0x179   : > { %v612_v47 = vmul.f32 1.442695, %v608_v46 }
 0x17a   : > { %v601_v48 = vpop.xlane.xlu0 %600 }
 0x17b   : > { %1346 = vpow2.f32 %v612_v47  ;;  %v609_v49 = vsub.f32 %v592_v26, %v601_v48 }
 0x17d   : > { %v614_v50 = vmul.f32 1.442695, %v609_v49 }
 0x17e   : > { %v604_v51 = vpop.xlane.xlu1 %603 }
 0x17f   : > { %1348 = vpow2.f32 %v614_v50  ;;  %v610_v52 = vsub.f32 %v593_v37, %v604_v51 }
 0x181   : > { %v616_v53 = vmul.f32 1.442695, %v610_v52 }
 0x182   : > { %v607_v54 = vpop.xlane.xlu1 %606 }
 0x183   : > { %1350 = vpow2.f32 %v616_v53  ;;  %v611_v55 = vsub.f32 %v594_v40, %v607_v54 }
 0x185   : > { %v618_v56 = vmul.f32 1.442695, %v611_v55 }
 0x187   : > { %1352 = vpow2.f32 %v618_v56 }
 0x188   : > { %v1347_v57 = vpop.eup %1346 }
 0x189   : > { %v620_v58 = vsel %vm595_vm3, %v1347_v57, 0.0 }
 0x18a   : > { %621 = vadd.xlane.f32.xlu0 %v620_v58 }
 0x18c   : > { %v1349_v59 = vpop.eup %1348 }
 0x18d   : > { %v623_v60 = vsel %vm595_vm3, %v1349_v59, 0.0 }
 0x18e   : > { %624 = vadd.xlane.f32.xlu1 %v623_v60 }
 0x190   : > { %v1351_v61 = vpop.eup %1350 }
 0x191   : > { %v626_v62 = vsel %vm595_vm3, %v1351_v61, 0.0 }
 0x192   : > { %627 = vadd.xlane.f32.xlu0 %v626_v62 }
 0x194   : > { %v1353_v63 = vpop.eup %1352 }
 0x195   : > { %v629_v1 = vsel %vm595_vm3, %v1353_v63, 0.0 }
 0x196   : > { %630 = vadd.xlane.f32.xlu1 %v629_v1 }
 0x213   : > { %v622_v4 = vpop.xlane.xlu0 %621 }
 0x214   : > { %v632_v5 = vmax.f32 %v622_v4, 1e-30  ;;  %v1054_v4 = vld [vmem:[%s348_s13] sm:$0x7] }
 0x216   : > { %1354 = vrcp.f32 %v632_v5 }
 0x217   : > { %v625_v6 = vpop.xlane.xlu1 %624 }
 0x218   : > { %v633_v7 = vmax.f32 %v625_v6, 1e-30 }
 0x21a   : > { %1356 = vrcp.f32 %v633_v7 }
 0x21b   : > { %v628_v8 = vpop.xlane.xlu0 %627 }
 0x21c   : > { %v634_v9 = vmax.f32 %v628_v8, 1e-30 }
 0x21e   : > { %1358 = vrcp.f32 %v634_v9  ;;  %v1209_v9 = vld [vmem:[%s1604_s5] ss:$0 sm:$0xff] }
 0x21f   : > { %v631_v10 = vpop.xlane.xlu1 %630 }
 0x220   : > { %v635_v11 = vmax.f32 %v631_v10, 1e-30 }
 0x222   : > { %1360 = vrcp.f32 %v635_v11  ;;  %v1055_v11 = vunpack.c.l.bf16 %v1054_v4 }
 0x223   : > { %v1355_v12 = vpop.eup %1354 }
 0x224   : > { %v640_v13 = vmul.f32 %v1355_v12, %v1347_v57 }
 0x226   : > { %v644_v15 = vpack.c.bf16 %v640_v13, %v640_v13 }
 0x227   : > { %v1357_v16 = vpop.eup %1356 }
 0x228   : > { %1266 = vmatmul.mubr.msk.bf16.vlgmr.msra.gmra.mxu0 %vm654_vm4, %v644_v15  ;;  %v641_v17 = vmul.f32 %v1357_v16, %v1349_v59 }
 0x229   : > { %1276 = vmatpush3.bf16.msra.mxu0 %v1344_v14  ;;  %1277 = vmatprep.mubr.msk.bf16.mxu0 %vm1402_vm0, %v1401_v0 }
 0x22a   : > { %v645_v19 = vpack.c.bf16 %v641_v17, %v641_v17  ;;  %1287 = vmatprep.subr.bf16.mxu0 %v1401_v0 }
 0x22b   : > { %v1359_v20 = vpop.eup %1358 }
 0x22c   : > { %1272 = vmatmul.mubr.msk.bf16.vlgmr.msra.gmra.mxu1 %vm654_vm4, %v645_v19  ;;  %v642_v22 = vmul.f32 %v1359_v20, %v1351_v61 }
 0x22d   : > { %1282 = vmatpush3.bf16.msra.mxu1 %v1345_v18  ;;  %1283 = vmatprep.mubr.msk.bf16.mxu1 %vm1402_vm0, %v1401_v0 }
 0x22e   : > { %v646_v23 = vpack.c.bf16 %v642_v22, %v642_v22  ;;  %1293 = vmatprep.subr.bf16.mxu1 %v1401_v0 }
 0x22f   : > { %v1361_v25 = vpop.eup %1360 }
 0x230   : > { %1278 = vmatmul.mubr.msk.bf16.vlgmr.msra.gmra.mxu0 %vm654_vm4, %v646_v23  ;;  %v643_v26 = vmul.f32 %v1361_v25, %v1353_v63 }
 0x231   : > { %1288 = vmatpush3.bf16.msra.mxu0 %v858_v24  ;;  %1289 = vmatprep.mubr.msk.bf16.mxu0 %vm1402_vm0, %v1401_v0 }
 0x232   : > { %v647_v27 = vpack.c.bf16 %v643_v26, %v643_v26  ;;  %1299 = vmatprep.subr.bf16.mxu0 %v1401_v0 }
 0x234   : > { %1284 = vmatmul.mubr.msk.bf16.vlgmr.msra.gmra.mxu1 %vm654_vm4, %v647_v27 }
 0x235   : > { %1295 = vmatprep.mubr.msk.bf16.mxu1 %vm1402_vm0, %v1401_v0  ;;  %1294 = vmatpush3.bf16.msra.mxu1 %v904_v29 }
 0x236   : > { %1305 = vmatprep.subr.bf16.mxu1 %v1401_v0 }
 0x2e8   : > { %v692_v31 = vpop.f32.mrf.mxu0 }
 0x2e9   : > { %v845_v32 = vpack.c.bf16 %v692_v31, %v692_v31 }
 0x2ea   : > { %v1267_v34 = vpop.f32.mrf.mxu0 }
 0x2eb   : > { %1290 = vmatmul.mubr.msk.bf16.vlgmr.msra.gmra.mxu0 %vm383_vm1, %v845_v32 }
 0x2ec   : > { %v695_v36 = vpop.f32.mrf.mxu0  ;;  %v741_v37 = vpop.f32.mrf.mxu1  ;;  %1300 = vmatpush3.bf16.msra.mxu0 %v950_v33  ;;  %1301 = vmatprep.mubr.msk.bf16.mxu0 %vm1402_vm0, %v1401_v0 }
 0x2ed   : > { %v846_v38 = vpack.c.bf16 %v741_v37, %v741_v37 }
 0x2ee   : > { %v1268_v40 = vpop.f32.mrf.mxu0  ;;  %v1273_v41 = vpop.f32.mrf.mxu1 }
 0x2ef   : > { %1296 = vmatmul.mubr.msk.bf16.vlgmr.msra.gmra.mxu1 %vm383_vm1, %v846_v38 }
 0x2f0   : > { %v744_v42 = vpop.f32.mrf.mxu1  ;;  %v790_v43 = vpop.f32.mrf.mxu0  ;;  %1306 = vmatpush3.bf16.msra.mxu1 %v996_v39  ;;  %1307 = vmatprep.mubr.msk.bf16.mxu1 %vm1402_vm0, %v1401_v0 }
 0x2f1   : > { %v847_v44 = vpack.c.bf16 %v790_v43, %v790_v43 }
 0x2f2   : > { %v1274_v45 = vpop.f32.mrf.mxu1  ;;  %v1279_v46 = vpop.f32.mrf.mxu0 }
 0x2f3   : > { %1302 = vmatmul.mubr.msk.bf16.vlgmr.msra.gmra.mxu0 %vm383_vm1, %v847_v44 }
 0x2f4   : > { %v793_v47 = vpop.f32.mrf.mxu0  ;;  %v839_v48 = vpop.f32.mrf.mxu1 }
 0x2f5   : > { %v848_v49 = vpack.c.bf16 %v839_v48, %v839_v48 }
 0x2f6   : > { %v1280_v50 = vpop.f32.mrf.mxu0  ;;  %v1285_v51 = vpop.f32.mrf.mxu1 }
 0x2f7   : > { %1308 = vmatmul.mubr.msk.bf16.vlgmr.msra.gmra.mxu1 %vm383_vm1, %v848_v49 }
 0x2f8   : > { %v842_v52 = vpop.f32.mrf.mxu1 }
 0x2fa   : > { %v1286_v53 = vpop.f32.mrf.mxu1 }
 0x3ab   : > { %v894_v54 = vpop.f32.mrf.mxu0 }
 0x3ac   : > { %v1039_v62 = vsel %vm1038_vm6, %v894_v54, 0.0 }
 0x3ad   : > { %v1291_v55 = vpop.f32.mrf.mxu0 }
 0x3af   : > { %v897_v56 = vpop.f32.mrf.mxu0  ;;  %v940_v57 = vpop.f32.mrf.mxu1 }
 0x3b0   : > { %v1040_v59 = vsel %vm1038_vm6, %v940_v57, 0.0 }
 0x3b1   : > { %v1292_v0 = vpop.f32.mrf.mxu0  ;;  %v1297_v58 = vpop.f32.mrf.mxu1  ;;  %v1041_v1 = vadd.f32 %v1040_v59, %v1039_v62 }
 0x3b3   : > { %v943_v60 = vpop.f32.mrf.mxu1  ;;  %v986_v61 = vpop.f32.mrf.mxu0 }
 0x3b4   : > { %v1042_v63 = vsel %vm1038_vm6, %v986_v61, 0.0 }
 0x3b5   : > { %v1298_v2 = vpop.f32.mrf.mxu1  ;;  %v1303_v3 = vpop.f32.mrf.mxu0  ;;  %v1043_v5 = vadd.f32 %v1042_v63, %v1041_v1 }
 0x3b7   : > { %v989_v6 = vpop.f32.mrf.mxu0  ;;  %v1032_v7 = vpop.f32.mrf.mxu1 }
 0x3b8   : > { %v1044_v8 = vsel %vm1038_vm6, %v1032_v7, 0.0 }
 0x3b9   : > { %v1045_v10 = vadd.f32 %v1044_v8, %v1043_v5  ;;  %v1304_v12 = vpop.f32.mrf.mxu0  ;;  %v1309_v13 = vpop.f32.mrf.mxu1 }
 0x3bb   : > { %v1053_v14 = vadd.f32 %v1209_v9, %v1045_v10  ;;  %v1035_v15 = vpop.f32.mrf.mxu1 }
 0x3bd   : > { %v1056_v16 = vadd.f32 %v1055_v11, %v1053_v14  ;;  %v1310_v17 = vpop.f32.mrf.mxu1 }
 0x3bf   : > { %v1057_v18 = vpack.c.bf16 %v1056_v16, %v1056_v16 }
 0x3c1   : > { %1059 = vst.msk [vmem:[%s355_s17] sm:$0x7] %vm1058_vm7, %v1057_v18 }
 0x3c2 PF: > { %s23_s8 = sadd.s32 1, %s1398_s8   ;;  %s1609_s29 = smov %s1394_s30 }
 0x3c3   : > { %p20_p10 = scmp.ge.s32.totalorder %s23_s8, 4   ;;  %s1610_s30 = smov %s1612_s0 }
 0x3c5   :  { %22 = sbr.rel (!%p20_p10) target bundleno = 17 (0x11), region = 83 }

</bundles_post_ra>
